<compile_context>
chip_gen: v5e
topology: v5e:2x2
jax: 0.10.0
libtpu: 0.0.40
codegen_flags: <defaults>
</compile_context>

<pallas_src>
import functools

import jax
import jax.numpy as jnp
from jax.experimental import pallas as pl
from jax.experimental.pallas import tpu as pltpu


# ------------------------------ Pallas kernel ------------------------------ #

def _stem_kernel(p1_ref, w1_ref, b1_ref, w2_ref, b2_ref, w3_ref, b3_ref,
                 o_ref, h1_ref, h2_ref, patch_ref, *, ho, wo, row_chunk):
    """Fused 3-layer stem (conv+BN+Swish x3) for one image.

    p1_ref   : [1, M, 9*C1]    bf16  im2col patches of the stride-2 conv1
    w*_ref   : [9*Cin, Cout]   bf16  conv weights with BN scale folded in
    b*_ref   : [1, Cout]       f32   folded BN bias
    o_ref    : [1, M, C2]      f32   stem output (M = Ho*Wo)
    h1_ref   : [Ho+2, Wo+2, Cm] bf16 scratch: conv1 output, zero-padded
    h2_ref   : [Ho+2, Wo+2, Cm] bf16 scratch: conv2 output, zero-padded
    patch_ref: [row_chunk*Wo, 9*Cm] bf16 scratch: im2col staging buffer
    """
    cm = h1_ref.shape[-1]
    chunk_m = row_chunk * wo
    n_chunks = ho // row_chunk            # wrapper guarantees divisibility

    # Zero only the 1-pixel halo of the padded intermediates: the interior is
    # fully overwritten every grid step.  Scratch is per-core and the batch
    # axis is "parallel", so do it on every step (a program_id==0 guard would
    # miss the second core); it is O(perimeter) and cheap.
    zrow = jnp.zeros((1, wo + 2, cm), h1_ref.dtype)
    zcol = jnp.zeros((ho + 2, 1, cm), h1_ref.dtype)
    for h_ref in (h1_ref, h2_ref):
        h_ref[0:1, :, :] = zrow
        h_ref[ho + 1:ho + 2, :, :] = zrow
        h_ref[:, 0:1, :] = zcol
        h_ref[:, wo + 1:wo + 2, :] = zcol

    def swish(v):
        return v * jax.nn.sigmoid(v)

    def for_chunks(body):
        """Run `body(r0)` for every row chunk start r0 = 0, rc, 2*rc, ..."""
        if n_chunks <= 4:                         # short: static unroll
            for i in range(n_chunks):
                body(i * row_chunk)
        else:                                     # long: bounded code size
            @pl.loop(0, n_chunks)
            def _(i):
                body(pl.multiple_of(i * row_chunk, row_chunk))

    def store_h(h_ref, r0, y):
        h_ref[pl.ds(1 + r0, row_chunk), 1:1 + wo, :] = (
            y.astype(h_ref.dtype).reshape(row_chunk, wo, cm))

    def store_out(r0, y):
        # TODO(synk): pack two output pixels per 128-lane vreg (lane-dense
        # store) when C2 < 128 instead of the masked partial-lane store.
        o_ref[0, pl.ds(r0 * wo, chunk_m), :] = y.astype(o_ref.dtype)

    # ---- layer 1: stride-2 conv, one K = 9*C1 matmul per row chunk -------- #
    def conv1_chunk(r0):
        acc = jnp.dot(p1_ref[0, pl.ds(r0 * wo, chunk_m), :], w1_ref[...],
                      preferred_element_type=jnp.float32)
        store_h(h1_ref, r0, swish(acc + b1_ref[...]))      # f32 epilogue

    for_chunks(conv1_chunk)

    # ---- layers 2 & 3: stride-1 convs, im2col staged in VMEM -------------- #
    def conv3x3_s1(src_ref, w_ref, b_ref, store):
        def chunk(r0):
            # Build the [chunk_m, 9*Cm] patch matrix from the padded VMEM
            # buffer (already bf16 -> no per-tap cast).
            for t in range(9):
                ky, kx = divmod(t, 3)
                tap = src_ref[pl.ds(r0 + ky, row_chunk), kx:kx + wo, :]
                patch_ref[:, t * cm:(t + 1) * cm] = tap.reshape(chunk_m, cm)
            acc = jnp.dot(patch_ref[...], w_ref[...],
                          preferred_element_type=jnp.float32)
            store(r0, swish(acc + b_ref[...]))
        for_chunks(chunk)

    conv3x3_s1(h1_ref, w2_ref, b2_ref, lambda r0, y: store_h(h2_ref, r0, y))
    conv3x3_s1(h2_ref, w3_ref, b3_ref, store_out)


# ------------------------------ wrapper helpers ----------------------------- #

def _fold_bn(w_hwio, gamma, beta, mean, var, eps=1e-5):
    """Fold BN (inference stats) scale into the conv weights; return bias."""
    inv_std = 1.0 / jnp.sqrt(var + eps)
    scale = gamma * inv_std                                   # (Cout,)
    kh, kw, cin, cout = w_hwio.shape
    w_folded = (w_hwio * scale).astype(jnp.bfloat16).reshape(kh * kw * cin, cout)
    bias = (beta - mean * scale).reshape(1, cout).astype(jnp.float32)
    return w_folded, bias


def _im2col_stride2(x_nhwc):
    """im2col for a 3x3 / stride-2 / pad-1 conv: (N,H,W,C) -> (N, Ho*Wo, 9*C)."""
    n, h, w, c = x_nhwc.shape
    ho = (h + 2 - 3) // 2 + 1
    wo = (w + 2 - 3) // 2 + 1
    xp = jnp.pad(x_nhwc, ((0, 0), (1, 1), (1, 1), (0, 0)))
    taps = []
    for ky in range(3):
        for kx in range(3):
            taps.append(jax.lax.slice(
                xp, (0, ky, kx, 0),
                (n, ky + 2 * (ho - 1) + 1, kx + 2 * (wo - 1) + 1, c),
                (1, 2, 2, 1)))
    patches = jnp.concatenate(taps, axis=-1)                  # (N, Ho, Wo, 9*C)
    return patches.reshape(n, ho * wo, 9 * c), ho, wo


# -------------------------------- full module ------------------------------- #

def csp_resnet_cbs_forward(x_nchw, params, *, row_chunk=None):
    """Forward of CSPResNet_CBS (use_large_stem=True, act='swish').

    Input / output layouts match PyTorch: NCHW in, NCHW out.
    """
    p1p, p2p, p3p = params
    x = jnp.transpose(x_nchw, (0, 2, 3, 1)).astype(jnp.float32)   # NCHW -> NHWC
    n = x.shape[0]
    c1 = x.shape[-1]

    patches1, ho, wo = _im2col_stride2(x)
    patches1 = patches1.astype(jnp.bfloat16)
    m = ho * wo

    w1, b1 = _fold_bn(p1p["w"], p1p["gamma"], p1p["beta"], p1p["mean"], p1p["var"])
    w2, b2 = _fold_bn(p2p["w"], p2p["gamma"], p2p["beta"], p2p["mean"], p2p["var"])
    w3, b3 = _fold_bn(p3p["w"], p3p["gamma"], p3p["beta"], p3p["mean"], p3p["var"])
    cm = w1.shape[1]
    c2 = w3.shape[1]

    # ~512 output pixels per matmul, and row_chunk must divide Ho so chunks
    # are uniform (required by the in-kernel loop).
    if row_chunk is None:
        row_chunk = max(1, min(ho, 512 // max(1, wo)))
    row_chunk = max(1, int(min(row_chunk, ho)))
    while ho % row_chunk:
        row_chunk -= 1
    chunk_m = row_chunk * wo

    # Explicit scoped-VMEM budget (blocks are double-buffered by the pipeline),
    # capped below v7x's 64 MiB physical VMEM with headroom.
    est = (2 * m * 9 * c1 * 2                              # p1 block (bf16) x2
           + 2 * m * c2 * 4                                # out block (f32) x2
           + 2 * (9 * c1 * cm + 9 * cm * cm + 9 * cm * c2) * 2   # weights
           + 2 * (2 * cm + c2) * 4                         # biases
           + 2 * (ho + 2) * (wo + 2) * cm * 2              # h1/h2 scratch bf16
           + chunk_m * 9 * cm * 2)                         # im2col staging
    vmem_limit = int(min(48 * 2 ** 20, max(32 * 2 ** 20, 2 * est)))

    # TODO(synk): for very large images add a grid-level spatial (row-tile)
    # axis with halo handling so the per-image padded intermediates / output
    # block need not fit VMEM at once.
    kernel = functools.partial(_stem_kernel, ho=ho, wo=wo, row_chunk=row_chunk)

    out = pl.pallas_call(
        kernel,
        out_shape=jax.ShapeDtypeStruct((n, m, c2), jnp.float32),
        grid_spec=pltpu.PrefetchScalarGridSpec(
            num_scalar_prefetch=0,
            grid=(n,),                                   # one image per step
            in_specs=[
                pl.BlockSpec((1, m, 9 * c1), lambda i: (i, 0, 0)),
                pl.BlockSpec((9 * c1, cm), lambda i: (0, 0)),
                pl.BlockSpec((1, cm), lambda i: (0, 0)),
                pl.BlockSpec((9 * cm, cm), lambda i: (0, 0)),
                pl.BlockSpec((1, cm), lambda i: (0, 0)),
                pl.BlockSpec((9 * cm, c2), lambda i: (0, 0)),
                pl.BlockSpec((1, c2), lambda i: (0, 0)),
            ],
            out_specs=pl.BlockSpec((1, m, c2), lambda i: (i, 0, 0)),
            scratch_shapes=[
                pltpu.VMEM((ho + 2, wo + 2, cm), jnp.bfloat16),   # h1 (padded)
                pltpu.VMEM((ho + 2, wo + 2, cm), jnp.bfloat16),   # h2 (padded)
                pltpu.VMEM((chunk_m, 9 * cm), jnp.bfloat16),      # im2col stage
            ],
        ),
        compiler_params=pltpu.CompilerParams(
            dimension_semantics=("parallel",),
            vmem_limit_bytes=vmem_limit,
        ),
    )(patches1, w1, b1, w2, b2, w3, b3)

    out = out.reshape(n, ho, wo, c2)
    return jnp.transpose(out, (0, 3, 1, 2))              # NHWC -> NCHW


# --------------------------- parameter initialization ----------------------- #

def _init_layer(key, cin, cout):
    kw, kg, kb, km, kv = jax.random.split(key, 5)
    w = 0.1 * jax.random.normal(kw, (3, 3, cin, cout), jnp.float32)  # HWIO
    gamma = 1.0 + 0.1 * jax.random.normal(kg, (cout,), jnp.float32)
    beta = 0.1 * jax.random.normal(kb, (cout,), jnp.float32)
    mean = 0.05 * jax.random.normal(km, (cout,), jnp.float32)
    var = 1.0 + 0.1 * jnp.abs(jax.random.normal(kv, (cout,), jnp.float32))
    return dict(w=w, gamma=gamma, beta=beta, mean=mean, var=var)


def init_csp_resnet_cbs_params(key, c1, c2):
    k1, k2, k3 = jax.random.split(key, 3)
    return [
        _init_layer(k1, c1, c2 // 2),       # stem[0]: stride 2
        _init_layer(k2, c2 // 2, c2 // 2),  # stem[1]: stride 1
        _init_layer(k3, c2 // 2, c2),       # stem[2]: stride 1
    ]


# ------------------------------ plain-JAX reference ------------------------- #

def _reference_forward(x_nchw, params, eps=1e-5):
    x = jnp.transpose(x_nchw, (0, 2, 3, 1))
    strides = (2, 1, 1)
    for p, s in zip(params, strides):
        x = jax.lax.conv_general_dilated(
            x, p["w"], window_strides=(s, s), padding=((1, 1), (1, 1)),
            dimension_numbers=("NHWC", "HWIO", "NHWC"))
        inv = 1.0 / jnp.sqrt(p["var"] + eps)
        x = x * (p["gamma"] * inv) + (p["beta"] - p["mean"] * p["gamma"] * inv)
        x = x * jax.nn.sigmoid(x)
    return jnp.transpose(x, (0, 3, 1, 2))


# ------------------------------------ main ----------------------------------- #

if __name__ == "__main__":
    N, C1, H, W = 2, 4, 16, 16
    C2 = 64

    x = jax.random.normal(jax.random.PRNGKey(0), (N, C1, H, W), jnp.float32)
    params = init_csp_resnet_cbs_params(jax.random.PRNGKey(1), C1, C2)
    y_ref = _reference_forward(x, params)

    # Exercise both in-kernel loop flavors:
    #   row_chunk=4 -> 2 chunks  -> static unroll
    #   row_chunk=1 -> 8 chunks  -> pl.loop (scf.for, dynamic pl.ds)
    for rc in (4, 1):
        fwd = jax.jit(functools.partial(csp_resnet_cbs_forward, row_chunk=rc))
        y = jax.block_until_ready(fwd(x, params))

        assert y.shape == (N, C2, H // 2, W // 2), y.shape
        assert bool(jnp.isfinite(y).all())

        # Loose accuracy check vs a plain-JAX reference (bf16 matmul operands).
        max_err = float(jnp.max(jnp.abs(y - y_ref)))
        assert max_err < 0.2, (rc, max_err)

    print("KERNEL_OK")
</pallas_src>

<mosaic_0001>
module attributes {stable_mosaic.version = 11 : i64} {
  func.func @_stem_kernel(%arg0: i32, %arg1: memref<1x64x36xbf16, #tpu.memory_space<vmem>>, %arg2: memref<36x32xbf16, #tpu.memory_space<vmem>>, %arg3: memref<1x32xf32, #tpu.memory_space<vmem>>, %arg4: memref<288x32xbf16, #tpu.memory_space<vmem>>, %arg5: memref<1x32xf32, #tpu.memory_space<vmem>>, %arg6: memref<288x64xbf16, #tpu.memory_space<vmem>>, %arg7: memref<1x64xf32, #tpu.memory_space<vmem>>, %arg8: memref<1x64x64xf32, #tpu.memory_space<vmem>>, %arg9: memref<10x10x32xbf16, #tpu.memory_space<vmem>>, %arg10: memref<10x10x32xbf16, #tpu.memory_space<vmem>>, %arg11: memref<32x288xbf16, #tpu.memory_space<vmem>>) attributes {dimension_semantics = [#tpu.dimension_semantics<parallel>], iteration_bounds = array<i64: 2>, scalar_prefetch = 0 : i64, scratch_operands = 3 : i64, tpu.core_type = #tpu.core_type<tc>, window_params = [{transform_indices = @transform_0, window_bounds = array<i64: 1, 64, 36>}, {pipeline_mode = #tpu.pipeline_mode<synchronous>, transform_indices = @transform_1, window_bounds = array<i64: 36, 32>}, {pipeline_mode = #tpu.pipeline_mode<synchronous>, transform_indices = @transform_2, window_bounds = array<i64: 1, 32>}, {pipeline_mode = #tpu.pipeline_mode<synchronous>, transform_indices = @transform_3, window_bounds = array<i64: 288, 32>}, {pipeline_mode = #tpu.pipeline_mode<synchronous>, transform_indices = @transform_4, window_bounds = array<i64: 1, 32>}, {pipeline_mode = #tpu.pipeline_mode<synchronous>, transform_indices = @transform_5, window_bounds = array<i64: 288, 64>}, {pipeline_mode = #tpu.pipeline_mode<synchronous>, transform_indices = @transform_6, window_bounds = array<i64: 1, 64>}, {transform_indices = @transform_7, window_bounds = array<i64: 1, 64, 64>}]} {
    %cst = arith.constant 0.000000e+00 : bf16
    %0 = vector.broadcast %cst : bf16 to vector<1x10x32xbf16>
    %cst_0 = arith.constant 0.000000e+00 : bf16
    %1 = vector.broadcast %cst_0 : bf16 to vector<10x1x32xbf16>
    %c0 = arith.constant 0 : index
    %c0_1 = arith.constant 0 : index
    %c0_2 = arith.constant 0 : index
    %2 = vector.load %arg9[%c0, %c0_1, %c0_2] : memref<10x10x32xbf16, #tpu.memory_space<vmem>>, vector<1x10x32xbf16>
    tpu.vector_store %arg9[%c0, %c0_1, %c0_2], %0 {strides = array<i32>} : memref<10x10x32xbf16, #tpu.memory_space<vmem>>, vector<1x10x32xbf16>,
    %c9 = arith.constant 9 : index
    %c0_3 = arith.constant 0 : index
    %c0_4 = arith.constant 0 : index
    %3 = vector.load %arg9[%c9, %c0_3, %c0_4] : memref<10x10x32xbf16, #tpu.memory_space<vmem>>, vector<1x10x32xbf16>
    tpu.vector_store %arg9[%c9, %c0_3, %c0_4], %0 {strides = array<i32>} : memref<10x10x32xbf16, #tpu.memory_space<vmem>>, vector<1x10x32xbf16>,
    %c0_5 = arith.constant 0 : index
    %c0_6 = arith.constant 0 : index
    %c0_7 = arith.constant 0 : index
    %4 = vector.load %arg9[%c0_5, %c0_6, %c0_7] : memref<10x10x32xbf16, #tpu.memory_space<vmem>>, vector<10x1x32xbf16>
    tpu.vector_store %arg9[%c0_5, %c0_6, %c0_7], %1 {strides = array<i32>} : memref<10x10x32xbf16, #tpu.memory_space<vmem>>, vector<10x1x32xbf16>,
    %c0_8 = arith.constant 0 : index
    %c9_9 = arith.constant 9 : index
    %c0_10 = arith.constant 0 : index
    %5 = vector.load %arg9[%c0_8, %c9_9, %c0_10] : memref<10x10x32xbf16, #tpu.memory_space<vmem>>, vector<10x1x32xbf16>
    tpu.vector_store %arg9[%c0_8, %c9_9, %c0_10], %1 {strides = array<i32>} : memref<10x10x32xbf16, #tpu.memory_space<vmem>>, vector<10x1x32xbf16>,
    %c0_11 = arith.constant 0 : index
    %c0_12 = arith.constant 0 : index
    %c0_13 = arith.constant 0 : index
    %6 = vector.load %arg10[%c0_11, %c0_12, %c0_13] : memref<10x10x32xbf16, #tpu.memory_space<vmem>>, vector<1x10x32xbf16>
    tpu.vector_store %arg10[%c0_11, %c0_12, %c0_13], %0 {strides = array<i32>} : memref<10x10x32xbf16, #tpu.memory_space<vmem>>, vector<1x10x32xbf16>,
    %c9_14 = arith.constant 9 : index
    %c0_15 = arith.constant 0 : index
    %c0_16 = arith.constant 0 : index
    %7 = vector.load %arg10[%c9_14, %c0_15, %c0_16] : memref<10x10x32xbf16, #tpu.memory_space<vmem>>, vector<1x10x32xbf16>
    tpu.vector_store %arg10[%c9_14, %c0_15, %c0_16], %0 {strides = array<i32>} : memref<10x10x32xbf16, #tpu.memory_space<vmem>>, vector<1x10x32xbf16>,
    %c0_17 = arith.constant 0 : index
    %c0_18 = arith.constant 0 : index
    %c0_19 = arith.constant 0 : index
    %8 = vector.load %arg10[%c0_17, %c0_18, %c0_19] : memref<10x10x32xbf16, #tpu.memory_space<vmem>>, vector<10x1x32xbf16>
    tpu.vector_store %arg10[%c0_17, %c0_18, %c0_19], %1 {strides = array<i32>} : memref<10x10x32xbf16, #tpu.memory_space<vmem>>, vector<10x1x32xbf16>,
    %c0_20 = arith.constant 0 : index
    %c9_21 = arith.constant 9 : index
    %c0_22 = arith.constant 0 : index
    %9 = vector.load %arg10[%c0_20, %c9_21, %c0_22] : memref<10x10x32xbf16, #tpu.memory_space<vmem>>, vector<10x1x32xbf16>
    tpu.vector_store %arg10[%c0_20, %c9_21, %c0_22], %1 {strides = array<i32>} : memref<10x10x32xbf16, #tpu.memory_space<vmem>>, vector<10x1x32xbf16>,
    %c0_23 = arith.constant 0 : index
    %c0_24 = arith.constant 0 : index
    %c0_25 = arith.constant 0 : index
    %10 = vector.load %arg1[%c0_23, %c0_24, %c0_25] : memref<1x64x36xbf16, #tpu.memory_space<vmem>>, vector<1x32x36xbf16>
    %11 = vector.shape_cast %10 : vector<1x32x36xbf16> to vector<32x36xbf16>
    %c0_26 = arith.constant 0 : index
    %c0_27 = arith.constant 0 : index
    %12 = vector.load %arg2[%c0_26, %c0_27] : memref<36x32xbf16, #tpu.memory_space<vmem>>, vector<36x32xbf16>
    %cst_28 = arith.constant dense<0.000000e+00> : vector<32x32xf32>
    %13 = tpu.matmul %11, %12, %cst_28 {dimension_numbers = #tpu.dot_dimension_numbers<[1], [0], [0], [1], [0, 0, 1, 1], [], []>} : vector<32x36xbf16>, vector<36x32xbf16>, vector<32x32xf32> -> vector<32x32xf32>
    %c0_29 = arith.constant 0 : index
    %c0_30 = arith.constant 0 : index
    %14 = vector.load %arg3[%c0_29, %c0_30] : memref<1x32xf32, #tpu.memory_space<vmem>>, vector<1x32xf32>
    %15 = vector.broadcast %14 : vector<1x32xf32> to vector<32x32xf32>
    %16 = arith.addf %13, %15 : vector<32x32xf32>
    %17 = arith.negf %16 : vector<32x32xf32>
    %18 = math.exp %17 : vector<32x32xf32>
    %cst_31 = arith.constant 1.000000e+00 : f32
    %19 = vector.broadcast %cst_31 : f32 to vector<32x32xf32>
    %20 = arith.addf %19, %18 : vector<32x32xf32>
    %21 = arith.divf %19, %20 : vector<32x32xf32>
    %22 = arith.mulf %16, %21 : vector<32x32xf32>
    %23 = arith.truncf %22 : vector<32x32xf32> to vector<32x32xbf16>
    %24 = vector.shape_cast %23 : vector<32x32xbf16> to vector<4x8x32xbf16>
    %c1 = arith.constant 1 : index
    %c1_32 = arith.constant 1 : index
    %c0_33 = arith.constant 0 : index
    %25 = vector.load %arg9[%c1, %c1_32, %c0_33] : memref<10x10x32xbf16, #tpu.memory_space<vmem>>, vector<4x8x32xbf16>
    tpu.vector_store %arg9[%c1, %c1_32, %c0_33], %24 {strides = array<i32>} : memref<10x10x32xbf16, #tpu.memory_space<vmem>>, vector<4x8x32xbf16>,
    %c0_34 = arith.constant 0 : index
    %c32 = arith.constant 32 : index
    %c0_35 = arith.constant 0 : index
    %26 = vector.load %arg1[%c0_34, %c32, %c0_35] : memref<1x64x36xbf16, #tpu.memory_space<vmem>>, vector<1x32x36xbf16>
    %27 = vector.shape_cast %26 : vector<1x32x36xbf16> to vector<32x36xbf16>
    %c0_36 = arith.constant 0 : index
    %c0_37 = arith.constant 0 : index
    %28 = vector.load %arg2[%c0_36, %c0_37] : memref<36x32xbf16, #tpu.memory_space<vmem>>, vector<36x32xbf16>
    %cst_38 = arith.constant dense<0.000000e+00> : vector<32x32xf32>
    %29 = tpu.matmul %27, %28, %cst_38 {dimension_numbers = #tpu.dot_dimension_numbers<[1], [0], [0], [1], [0, 0, 1, 1], [], []>} : vector<32x36xbf16>, vector<36x32xbf16>, vector<32x32xf32> -> vector<32x32xf32>
    %c0_39 = arith.constant 0 : index
    %c0_40 = arith.constant 0 : index
    %30 = vector.load %arg3[%c0_39, %c0_40] : memref<1x32xf32, #tpu.memory_space<vmem>>, vector<1x32xf32>
    %31 = vector.broadcast %30 : vector<1x32xf32> to vector<32x32xf32>
    %32 = arith.addf %29, %31 : vector<32x32xf32>
    %33 = arith.negf %32 : vector<32x32xf32>
    %34 = math.exp %33 : vector<32x32xf32>
    %cst_41 = arith.constant 1.000000e+00 : f32
    %35 = vector.broadcast %cst_41 : f32 to vector<32x32xf32>
    %36 = arith.addf %35, %34 : vector<32x32xf32>
    %37 = arith.divf %35, %36 : vector<32x32xf32>
    %38 = arith.mulf %32, %37 : vector<32x32xf32>
    %39 = arith.truncf %38 : vector<32x32xf32> to vector<32x32xbf16>
    %40 = vector.shape_cast %39 : vector<32x32xbf16> to vector<4x8x32xbf16>
    %c5 = arith.constant 5 : index
    %c1_42 = arith.constant 1 : index
    %c0_43 = arith.constant 0 : index
    %41 = vector.load %arg9[%c5, %c1_42, %c0_43] : memref<10x10x32xbf16, #tpu.memory_space<vmem>>, vector<4x8x32xbf16>
    tpu.vector_store %arg9[%c5, %c1_42, %c0_43], %40 {strides = array<i32>} : memref<10x10x32xbf16, #tpu.memory_space<vmem>>, vector<4x8x32xbf16>,
    %c0_44 = arith.constant 0 : index
    %c0_45 = arith.constant 0 : index
    %c0_46 = arith.constant 0 : index
    %42 = vector.load %arg9[%c0_44, %c0_45, %c0_46] : memref<10x10x32xbf16, #tpu.memory_space<vmem>>, vector<4x8x32xbf16>
    %43 = vector.shape_cast %42 : vector<4x8x32xbf16> to vector<32x32xbf16>
    %c0_47 = arith.constant 0 : index
    %c0_48 = arith.constant 0 : index
    %44 = vector.load %arg11[%c0_47, %c0_48] : memref<32x288xbf16, #tpu.memory_space<vmem>>, vector<32x32xbf16>
    tpu.vector_store %arg11[%c0_47, %c0_48], %43 {strides = array<i32>} : memref<32x288xbf16, #tpu.memory_space<vmem>>, vector<32x32xbf16>,
    %c0_49 = arith.constant 0 : index
    %c1_50 = arith.constant 1 : index
    %c0_51 = arith.constant 0 : index
    %45 = vector.load %arg9[%c0_49, %c1_50, %c0_51] : memref<10x10x32xbf16, #tpu.memory_space<vmem>>, vector<4x8x32xbf16>
    %46 = vector.shape_cast %45 : vector<4x8x32xbf16> to vector<32x32xbf16>
    %c0_52 = arith.constant 0 : index
    %c32_53 = arith.constant 32 : index
    %47 = vector.load %arg11[%c0_52, %c32_53] : memref<32x288xbf16, #tpu.memory_space<vmem>>, vector<32x32xbf16>
    tpu.vector_store %arg11[%c0_52, %c32_53], %46 {strides = array<i32>} : memref<32x288xbf16, #tpu.memory_space<vmem>>, vector<32x32xbf16>,
    %c0_54 = arith.constant 0 : index
    %c2 = arith.constant 2 : index
    %c0_55 = arith.constant 0 : index
    %48 = vector.load %arg9[%c0_54, %c2, %c0_55] : memref<10x10x32xbf16, #tpu.memory_space<vmem>>, vector<4x8x32xbf16>
    %49 = vector.shape_cast %48 : vector<4x8x32xbf16> to vector<32x32xbf16>
    %c0_56 = arith.constant 0 : index
    %c64 = arith.constant 64 : index
    %50 = vector.load %arg11[%c0_56, %c64] : memref<32x288xbf16, #tpu.memory_space<vmem>>, vector<32x32xbf16>
    tpu.vector_store %arg11[%c0_56, %c64], %49 {strides = array<i32>} : memref<32x288xbf16, #tpu.memory_space<vmem>>, vector<32x32xbf16>,
    %c1_57 = arith.constant 1 : index
    %c0_58 = arith.constant 0 : index
    %c0_59 = arith.constant 0 : index
    %51 = vector.load %arg9[%c1_57, %c0_58, %c0_59] : memref<10x10x32xbf16, #tpu.memory_space<vmem>>, vector<4x8x32xbf16>
    %52 = vector.shape_cast %51 : vector<4x8x32xbf16> to vector<32x32xbf16>
    %c0_60 = arith.constant 0 : index
    %c96 = arith.constant 96 : index
    %53 = vector.load %arg11[%c0_60, %c96] : memref<32x288xbf16, #tpu.memory_space<vmem>>, vector<32x32xbf16>
    tpu.vector_store %arg11[%c0_60, %c96], %52 {strides = array<i32>} : memref<32x288xbf16, #tpu.memory_space<vmem>>, vector<32x32xbf16>,
    %c1_61 = arith.constant 1 : index
    %c1_62 = arith.constant 1 : index
    %c0_63 = arith.constant 0 : index
    %54 = vector.load %arg9[%c1_61, %c1_62, %c0_63] : memref<10x10x32xbf16, #tpu.memory_space<vmem>>, vector<4x8x32xbf16>
    %55 = vector.shape_cast %54 : vector<4x8x32xbf16> to vector<32x32xbf16>
    %c0_64 = arith.constant 0 : index
    %c128 = arith.constant 128 : index
    %56 = vector.load %arg11[%c0_64, %c128] : memref<32x288xbf16, #tpu.memory_space<vmem>>, vector<32x32xbf16>
    tpu.vector_store %arg11[%c0_64, %c128], %55 {strides = array<i32>} : memref<32x288xbf16, #tpu.memory_space<vmem>>, vector<32x32xbf16>,
    %c1_65 = arith.constant 1 : index
    %c2_66 = arith.constant 2 : index
    %c0_67 = arith.constant 0 : index
    %57 = vector.load %arg9[%c1_65, %c2_66, %c0_67] : memref<10x10x32xbf16, #tpu.memory_space<vmem>>, vector<4x8x32xbf16>
    %58 = vector.shape_cast %57 : vector<4x8x32xbf16> to vector<32x32xbf16>
    %c0_68 = arith.constant 0 : index
    %c160 = arith.constant 160 : index
    %59 = vector.load %arg11[%c0_68, %c160] : memref<32x288xbf16, #tpu.memory_space<vmem>>, vector<32x32xbf16>
    tpu.vector_store %arg11[%c0_68, %c160], %58 {strides = array<i32>} : memref<32x288xbf16, #tpu.memory_space<vmem>>, vector<32x32xbf16>,
    %c2_69 = arith.constant 2 : index
    %c0_70 = arith.constant 0 : index
    %c0_71 = arith.constant 0 : index
    %60 = vector.load %arg9[%c2_69, %c0_70, %c0_71] : memref<10x10x32xbf16, #tpu.memory_space<vmem>>, vector<4x8x32xbf16>
    %61 = vector.shape_cast %60 : vector<4x8x32xbf16> to vector<32x32xbf16>
    %c0_72 = arith.constant 0 : index
    %c192 = arith.constant 192 : index
    %62 = vector.load %arg11[%c0_72, %c192] : memref<32x288xbf16, #tpu.memory_space<vmem>>, vector<32x32xbf16>
    tpu.vector_store %arg11[%c0_72, %c192], %61 {strides = array<i32>} : memref<32x288xbf16, #tpu.memory_space<vmem>>, vector<32x32xbf16>,
    %c2_73 = arith.constant 2 : index
    %c1_74 = arith.constant 1 : index
    %c0_75 = arith.constant 0 : index
    %63 = vector.load %arg9[%c2_73, %c1_74, %c0_75] : memref<10x10x32xbf16, #tpu.memory_space<vmem>>, vector<4x8x32xbf16>
    %64 = vector.shape_cast %63 : vector<4x8x32xbf16> to vector<32x32xbf16>
    %c0_76 = arith.constant 0 : index
    %c224 = arith.constant 224 : index
    %65 = vector.load %arg11[%c0_76, %c224] : memref<32x288xbf16, #tpu.memory_space<vmem>>, vector<32x32xbf16>
    tpu.vector_store %arg11[%c0_76, %c224], %64 {strides = array<i32>} : memref<32x288xbf16, #tpu.memory_space<vmem>>, vector<32x32xbf16>,
    %c2_77 = arith.constant 2 : index
    %c2_78 = arith.constant 2 : index
    %c0_79 = arith.constant 0 : index
    %66 = vector.load %arg9[%c2_77, %c2_78, %c0_79] : memref<10x10x32xbf16, #tpu.memory_space<vmem>>, vector<4x8x32xbf16>
    %67 = vector.shape_cast %66 : vector<4x8x32xbf16> to vector<32x32xbf16>
    %c0_80 = arith.constant 0 : index
    %c256 = arith.constant 256 : index
    %68 = vector.load %arg11[%c0_80, %c256] : memref<32x288xbf16, #tpu.memory_space<vmem>>, vector<32x32xbf16>
    tpu.vector_store %arg11[%c0_80, %c256], %67 {strides = array<i32>} : memref<32x288xbf16, #tpu.memory_space<vmem>>, vector<32x32xbf16>,
    %c0_81 = arith.constant 0 : index
    %c0_82 = arith.constant 0 : index
    %69 = vector.load %arg11[%c0_81, %c0_82] : memref<32x288xbf16, #tpu.memory_space<vmem>>, vector<32x288xbf16>
    %c0_83 = arith.constant 0 : index
    %c0_84 = arith.constant 0 : index
    %70 = vector.load %arg4[%c0_83, %c0_84] : memref<288x32xbf16, #tpu.memory_space<vmem>>, vector<288x32xbf16>
    %cst_85 = arith.constant dense<0.000000e+00> : vector<32x32xf32>
    %71 = tpu.matmul %69, %70, %cst_85 {dimension_numbers = #tpu.dot_dimension_numbers<[1], [0], [0], [1], [0, 0, 1, 1], [], []>} : vector<32x288xbf16>, vector<288x32xbf16>, vector<32x32xf32> -> vector<32x32xf32>
    %c0_86 = arith.constant 0 : index
    %c0_87 = arith.constant 0 : index
    %72 = vector.load %arg5[%c0_86, %c0_87] : memref<1x32xf32, #tpu.memory_space<vmem>>, vector<1x32xf32>
    %73 = vector.broadcast %72 : vector<1x32xf32> to vector<32x32xf32>
    %74 = arith.addf %71, %73 : vector<32x32xf32>
    %75 = arith.negf %74 : vector<32x32xf32>
    %76 = math.exp %75 : vector<32x32xf32>
    %cst_88 = arith.constant 1.000000e+00 : f32
    %77 = vector.broadcast %cst_88 : f32 to vector<32x32xf32>
    %78 = arith.addf %77, %76 : vector<32x32xf32>
    %79 = arith.divf %77, %78 : vector<32x32xf32>
    %80 = arith.mulf %74, %79 : vector<32x32xf32>
    %81 = arith.truncf %80 : vector<32x32xf32> to vector<32x32xbf16>
    %82 = vector.shape_cast %81 : vector<32x32xbf16> to vector<4x8x32xbf16>
    %c1_89 = arith.constant 1 : index
    %c1_90 = arith.constant 1 : index
    %c0_91 = arith.constant 0 : index
    %83 = vector.load %arg10[%c1_89, %c1_90, %c0_91] : memref<10x10x32xbf16, #tpu.memory_space<vmem>>, vector<4x8x32xbf16>
    tpu.vector_store %arg10[%c1_89, %c1_90, %c0_91], %82 {strides = array<i32>} : memref<10x10x32xbf16, #tpu.memory_space<vmem>>, vector<4x8x32xbf16>,
    %c4 = arith.constant 4 : index
    %c0_92 = arith.constant 0 : index
    %c0_93 = arith.constant 0 : index
    %84 = vector.load %arg9[%c4, %c0_92, %c0_93] : memref<10x10x32xbf16, #tpu.memory_space<vmem>>, vector<4x8x32xbf16>
    %85 = vector.shape_cast %84 : vector<4x8x32xbf16> to vector<32x32xbf16>
    %c0_94 = arith.constant 0 : index
    %c0_95 = arith.constant 0 : index
    %86 = vector.load %arg11[%c0_94, %c0_95] : memref<32x288xbf16, #tpu.memory_space<vmem>>, vector<32x32xbf16>
    tpu.vector_store %arg11[%c0_94, %c0_95], %85 {strides = array<i32>} : memref<32x288xbf16, #tpu.memory_space<vmem>>, vector<32x32xbf16>,
    %c4_96 = arith.constant 4 : index
    %c1_97 = arith.constant 1 : index
    %c0_98 = arith.constant 0 : index
    %87 = vector.load %arg9[%c4_96, %c1_97, %c0_98] : memref<10x10x32xbf16, #tpu.memory_space<vmem>>, vector<4x8x32xbf16>
    %88 = vector.shape_cast %87 : vector<4x8x32xbf16> to vector<32x32xbf16>
    %c0_99 = arith.constant 0 : index
    %c32_100 = arith.constant 32 : index
    %89 = vector.load %arg11[%c0_99, %c32_100] : memref<32x288xbf16, #tpu.memory_space<vmem>>, vector<32x32xbf16>
    tpu.vector_store %arg11[%c0_99, %c32_100], %88 {strides = array<i32>} : memref<32x288xbf16, #tpu.memory_space<vmem>>, vector<32x32xbf16>,
    %c4_101 = arith.constant 4 : index
    %c2_102 = arith.constant 2 : index
    %c0_103 = arith.constant 0 : index
    %90 = vector.load %arg9[%c4_101, %c2_102, %c0_103] : memref<10x10x32xbf16, #tpu.memory_space<vmem>>, vector<4x8x32xbf16>
    %91 = vector.shape_cast %90 : vector<4x8x32xbf16> to vector<32x32xbf16>
    %c0_104 = arith.constant 0 : index
    %c64_105 = arith.constant 64 : index
    %92 = vector.load %arg11[%c0_104, %c64_105] : memref<32x288xbf16, #tpu.memory_space<vmem>>, vector<32x32xbf16>
    tpu.vector_store %arg11[%c0_104, %c64_105], %91 {strides = array<i32>} : memref<32x288xbf16, #tpu.memory_space<vmem>>, vector<32x32xbf16>,
    %c5_106 = arith.constant 5 : index
    %c0_107 = arith.constant 0 : index
    %c0_108 = arith.constant 0 : index
    %93 = vector.load %arg9[%c5_106, %c0_107, %c0_108] : memref<10x10x32xbf16, #tpu.memory_space<vmem>>, vector<4x8x32xbf16>
    %94 = vector.shape_cast %93 : vector<4x8x32xbf16> to vector<32x32xbf16>
    %c0_109 = arith.constant 0 : index
    %c96_110 = arith.constant 96 : index
    %95 = vector.load %arg11[%c0_109, %c96_110] : memref<32x288xbf16, #tpu.memory_space<vmem>>, vector<32x32xbf16>
    tpu.vector_store %arg11[%c0_109, %c96_110], %94 {strides = array<i32>} : memref<32x288xbf16, #tpu.memory_space<vmem>>, vector<32x32xbf16>,
    %c5_111 = arith.constant 5 : index
    %c1_112 = arith.constant 1 : index
    %c0_113 = arith.constant 0 : index
    %96 = vector.load %arg9[%c5_111, %c1_112, %c0_113] : memref<10x10x32xbf16, #tpu.memory_space<vmem>>, vector<4x8x32xbf16>
    %97 = vector.shape_cast %96 : vector<4x8x32xbf16> to vector<32x32xbf16>
    %c0_114 = arith.constant 0 : index
    %c128_115 = arith.constant 128 : index
    %98 = vector.load %arg11[%c0_114, %c128_115] : memref<32x288xbf16, #tpu.memory_space<vmem>>, vector<32x32xbf16>
    tpu.vector_store %arg11[%c0_114, %c128_115], %97 {strides = array<i32>} : memref<32x288xbf16, #tpu.memory_space<vmem>>, vector<32x32xbf16>,
    %c5_116 = arith.constant 5 : index
    %c2_117 = arith.constant 2 : index
    %c0_118 = arith.constant 0 : index
    %99 = vector.load %arg9[%c5_116, %c2_117, %c0_118] : memref<10x10x32xbf16, #tpu.memory_space<vmem>>, vector<4x8x32xbf16>
    %100 = vector.shape_cast %99 : vector<4x8x32xbf16> to vector<32x32xbf16>
    %c0_119 = arith.constant 0 : index
    %c160_120 = arith.constant 160 : index
    %101 = vector.load %arg11[%c0_119, %c160_120] : memref<32x288xbf16, #tpu.memory_space<vmem>>, vector<32x32xbf16>
    tpu.vector_store %arg11[%c0_119, %c160_120], %100 {strides = array<i32>} : memref<32x288xbf16, #tpu.memory_space<vmem>>, vector<32x32xbf16>,
    %c6 = arith.constant 6 : index
    %c0_121 = arith.constant 0 : index
    %c0_122 = arith.constant 0 : index
    %102 = vector.load %arg9[%c6, %c0_121, %c0_122] : memref<10x10x32xbf16, #tpu.memory_space<vmem>>, vector<4x8x32xbf16>
    %103 = vector.shape_cast %102 : vector<4x8x32xbf16> to vector<32x32xbf16>
    %c0_123 = arith.constant 0 : index
    %c192_124 = arith.constant 192 : index
    %104 = vector.load %arg11[%c0_123, %c192_124] : memref<32x288xbf16, #tpu.memory_space<vmem>>, vector<32x32xbf16>
    tpu.vector_store %arg11[%c0_123, %c192_124], %103 {strides = array<i32>} : memref<32x288xbf16, #tpu.memory_space<vmem>>, vector<32x32xbf16>,
    %c6_125 = arith.constant 6 : index
    %c1_126 = arith.constant 1 : index
    %c0_127 = arith.constant 0 : index
    %105 = vector.load %arg9[%c6_125, %c1_126, %c0_127] : memref<10x10x32xbf16, #tpu.memory_space<vmem>>, vector<4x8x32xbf16>
    %106 = vector.shape_cast %105 : vector<4x8x32xbf16> to vector<32x32xbf16>
    %c0_128 = arith.constant 0 : index
    %c224_129 = arith.constant 224 : index
    %107 = vector.load %arg11[%c0_128, %c224_129] : memref<32x288xbf16, #tpu.memory_space<vmem>>, vector<32x32xbf16>
    tpu.vector_store %arg11[%c0_128, %c224_129], %106 {strides = array<i32>} : memref<32x288xbf16, #tpu.memory_space<vmem>>, vector<32x32xbf16>,
    %c6_130 = arith.constant 6 : index
    %c2_131 = arith.constant 2 : index
    %c0_132 = arith.constant 0 : index
    %108 = vector.load %arg9[%c6_130, %c2_131, %c0_132] : memref<10x10x32xbf16, #tpu.memory_space<vmem>>, vector<4x8x32xbf16>
    %109 = vector.shape_cast %108 : vector<4x8x32xbf16> to vector<32x32xbf16>
    %c0_133 = arith.constant 0 : index
    %c256_134 = arith.constant 256 : index
    %110 = vector.load %arg11[%c0_133, %c256_134] : memref<32x288xbf16, #tpu.memory_space<vmem>>, vector<32x32xbf16>
    tpu.vector_store %arg11[%c0_133, %c256_134], %109 {strides = array<i32>} : memref<32x288xbf16, #tpu.memory_space<vmem>>, vector<32x32xbf16>,
    %c0_135 = arith.constant 0 : index
    %c0_136 = arith.constant 0 : index
    %111 = vector.load %arg11[%c0_135, %c0_136] : memref<32x288xbf16, #tpu.memory_space<vmem>>, vector<32x288xbf16>
    %c0_137 = arith.constant 0 : index
    %c0_138 = arith.constant 0 : index
    %112 = vector.load %arg4[%c0_137, %c0_138] : memref<288x32xbf16, #tpu.memory_space<vmem>>, vector<288x32xbf16>
    %cst_139 = arith.constant dense<0.000000e+00> : vector<32x32xf32>
    %113 = tpu.matmul %111, %112, %cst_139 {dimension_numbers = #tpu.dot_dimension_numbers<[1], [0], [0], [1], [0, 0, 1, 1], [], []>} : vector<32x288xbf16>, vector<288x32xbf16>, vector<32x32xf32> -> vector<32x32xf32>
    %c0_140 = arith.constant 0 : index
    %c0_141 = arith.constant 0 : index
    %114 = vector.load %arg5[%c0_140, %c0_141] : memref<1x32xf32, #tpu.memory_space<vmem>>, vector<1x32xf32>
    %115 = vector.broadcast %114 : vector<1x32xf32> to vector<32x32xf32>
    %116 = arith.addf %113, %115 : vector<32x32xf32>
    %117 = arith.negf %116 : vector<32x32xf32>
    %118 = math.exp %117 : vector<32x32xf32>
    %cst_142 = arith.constant 1.000000e+00 : f32
    %119 = vector.broadcast %cst_142 : f32 to vector<32x32xf32>
    %120 = arith.addf %119, %118 : vector<32x32xf32>
    %121 = arith.divf %119, %120 : vector<32x32xf32>
    %122 = arith.mulf %116, %121 : vector<32x32xf32>
    %123 = arith.truncf %122 : vector<32x32xf32> to vector<32x32xbf16>
    %124 = vector.shape_cast %123 : vector<32x32xbf16> to vector<4x8x32xbf16>
    %c5_143 = arith.constant 5 : index
    %c1_144 = arith.constant 1 : index
    %c0_145 = arith.constant 0 : index
    %125 = vector.load %arg10[%c5_143, %c1_144, %c0_145] : memref<10x10x32xbf16, #tpu.memory_space<vmem>>, vector<4x8x32xbf16>
    tpu.vector_store %arg10[%c5_143, %c1_144, %c0_145], %124 {strides = array<i32>} : memref<10x10x32xbf16, #tpu.memory_space<vmem>>, vector<4x8x32xbf16>,
    %c0_146 = arith.constant 0 : index
    %c0_147 = arith.constant 0 : index
    %c0_148 = arith.constant 0 : index
    %126 = vector.load %arg10[%c0_146, %c0_147, %c0_148] : memref<10x10x32xbf16, #tpu.memory_space<vmem>>, vector<4x8x32xbf16>
    %127 = vector.shape_cast %126 : vector<4x8x32xbf16> to vector<32x32xbf16>
    %c0_149 = arith.constant 0 : index
    %c0_150 = arith.constant 0 : index
    %128 = vector.load %arg11[%c0_149, %c0_150] : memref<32x288xbf16, #tpu.memory_space<vmem>>, vector<32x32xbf16>
    tpu.vector_store %arg11[%c0_149, %c0_150], %127 {strides = array<i32>} : memref<32x288xbf16, #tpu.memory_space<vmem>>, vector<32x32xbf16>,
    %c0_151 = arith.constant 0 : index
    %c1_152 = arith.constant 1 : index
    %c0_153 = arith.constant 0 : index
    %129 = vector.load %arg10[%c0_151, %c1_152, %c0_153] : memref<10x10x32xbf16, #tpu.memory_space<vmem>>, vector<4x8x32xbf16>
    %130 = vector.shape_cast %129 : vector<4x8x32xbf16> to vector<32x32xbf16>
    %c0_154 = arith.constant 0 : index
    %c32_155 = arith.constant 32 : index
    %131 = vector.load %arg11[%c0_154, %c32_155] : memref<32x288xbf16, #tpu.memory_space<vmem>>, vector<32x32xbf16>
    tpu.vector_store %arg11[%c0_154, %c32_155], %130 {strides = array<i32>} : memref<32x288xbf16, #tpu.memory_space<vmem>>, vector<32x32xbf16>,
    %c0_156 = arith.constant 0 : index
    %c2_157 = arith.constant 2 : index
    %c0_158 = arith.constant 0 : index
    %132 = vector.load %arg10[%c0_156, %c2_157, %c0_158] : memref<10x10x32xbf16, #tpu.memory_space<vmem>>, vector<4x8x32xbf16>
    %133 = vector.shape_cast %132 : vector<4x8x32xbf16> to vector<32x32xbf16>
    %c0_159 = arith.constant 0 : index
    %c64_160 = arith.constant 64 : index
    %134 = vector.load %arg11[%c0_159, %c64_160] : memref<32x288xbf16, #tpu.memory_space<vmem>>, vector<32x32xbf16>
    tpu.vector_store %arg11[%c0_159, %c64_160], %133 {strides = array<i32>} : memref<32x288xbf16, #tpu.memory_space<vmem>>, vector<32x32xbf16>,
    %c1_161 = arith.constant 1 : index
    %c0_162 = arith.constant 0 : index
    %c0_163 = arith.constant 0 : index
    %135 = vector.load %arg10[%c1_161, %c0_162, %c0_163] : memref<10x10x32xbf16, #tpu.memory_space<vmem>>, vector<4x8x32xbf16>
    %136 = vector.shape_cast %135 : vector<4x8x32xbf16> to vector<32x32xbf16>
    %c0_164 = arith.constant 0 : index
    %c96_165 = arith.constant 96 : index
    %137 = vector.load %arg11[%c0_164, %c96_165] : memref<32x288xbf16, #tpu.memory_space<vmem>>, vector<32x32xbf16>
    tpu.vector_store %arg11[%c0_164, %c96_165], %136 {strides = array<i32>} : memref<32x288xbf16, #tpu.memory_space<vmem>>, vector<32x32xbf16>,
    %c1_166 = arith.constant 1 : index
    %c1_167 = arith.constant 1 : index
    %c0_168 = arith.constant 0 : index
    %138 = vector.load %arg10[%c1_166, %c1_167, %c0_168] : memref<10x10x32xbf16, #tpu.memory_space<vmem>>, vector<4x8x32xbf16>
    %139 = vector.shape_cast %138 : vector<4x8x32xbf16> to vector<32x32xbf16>
    %c0_169 = arith.constant 0 : index
    %c128_170 = arith.constant 128 : index
    %140 = vector.load %arg11[%c0_169, %c128_170] : memref<32x288xbf16, #tpu.memory_space<vmem>>, vector<32x32xbf16>
    tpu.vector_store %arg11[%c0_169, %c128_170], %139 {strides = array<i32>} : memref<32x288xbf16, #tpu.memory_space<vmem>>, vector<32x32xbf16>,
    %c1_171 = arith.constant 1 : index
    %c2_172 = arith.constant 2 : index
    %c0_173 = arith.constant 0 : index
    %141 = vector.load %arg10[%c1_171, %c2_172, %c0_173] : memref<10x10x32xbf16, #tpu.memory_space<vmem>>, vector<4x8x32xbf16>
    %142 = vector.shape_cast %141 : vector<4x8x32xbf16> to vector<32x32xbf16>
    %c0_174 = arith.constant 0 : index
    %c160_175 = arith.constant 160 : index
    %143 = vector.load %arg11[%c0_174, %c160_175] : memref<32x288xbf16, #tpu.memory_space<vmem>>, vector<32x32xbf16>
    tpu.vector_store %arg11[%c0_174, %c160_175], %142 {strides = array<i32>} : memref<32x288xbf16, #tpu.memory_space<vmem>>, vector<32x32xbf16>,
    %c2_176 = arith.constant 2 : index
    %c0_177 = arith.constant 0 : index
    %c0_178 = arith.constant 0 : index
    %144 = vector.load %arg10[%c2_176, %c0_177, %c0_178] : memref<10x10x32xbf16, #tpu.memory_space<vmem>>, vector<4x8x32xbf16>
    %145 = vector.shape_cast %144 : vector<4x8x32xbf16> to vector<32x32xbf16>
    %c0_179 = arith.constant 0 : index
    %c192_180 = arith.constant 192 : index
    %146 = vector.load %arg11[%c0_179, %c192_180] : memref<32x288xbf16, #tpu.memory_space<vmem>>, vector<32x32xbf16>
    tpu.vector_store %arg11[%c0_179, %c192_180], %145 {strides = array<i32>} : memref<32x288xbf16, #tpu.memory_space<vmem>>, vector<32x32xbf16>,
    %c2_181 = arith.constant 2 : index
    %c1_182 = arith.constant 1 : index
    %c0_183 = arith.constant 0 : index
    %147 = vector.load %arg10[%c2_181, %c1_182, %c0_183] : memref<10x10x32xbf16, #tpu.memory_space<vmem>>, vector<4x8x32xbf16>
    %148 = vector.shape_cast %147 : vector<4x8x32xbf16> to vector<32x32xbf16>
    %c0_184 = arith.constant 0 : index
    %c224_185 = arith.constant 224 : index
    %149 = vector.load %arg11[%c0_184, %c224_185] : memref<32x288xbf16, #tpu.memory_space<vmem>>, vector<32x32xbf16>
    tpu.vector_store %arg11[%c0_184, %c224_185], %148 {strides = array<i32>} : memref<32x288xbf16, #tpu.memory_space<vmem>>, vector<32x32xbf16>,
    %c2_186 = arith.constant 2 : index
    %c2_187 = arith.constant 2 : index
    %c0_188 = arith.constant 0 : index
    %150 = vector.load %arg10[%c2_186, %c2_187, %c0_188] : memref<10x10x32xbf16, #tpu.memory_space<vmem>>, vector<4x8x32xbf16>
    %151 = vector.shape_cast %150 : vector<4x8x32xbf16> to vector<32x32xbf16>
    %c0_189 = arith.constant 0 : index
    %c256_190 = arith.constant 256 : index
    %152 = vector.load %arg11[%c0_189, %c256_190] : memref<32x288xbf16, #tpu.memory_space<vmem>>, vector<32x32xbf16>
    tpu.vector_store %arg11[%c0_189, %c256_190], %151 {strides = array<i32>} : memref<32x288xbf16, #tpu.memory_space<vmem>>, vector<32x32xbf16>,
    %c0_191 = arith.constant 0 : index
    %c0_192 = arith.constant 0 : index
    %153 = vector.load %arg11[%c0_191, %c0_192] : memref<32x288xbf16, #tpu.memory_space<vmem>>, vector<32x288xbf16>
    %c0_193 = arith.constant 0 : index
    %c0_194 = arith.constant 0 : index
    %154 = vector.load %arg6[%c0_193, %c0_194] : memref<288x64xbf16, #tpu.memory_space<vmem>>, vector<288x64xbf16>
    %cst_195 = arith.constant dense<0.000000e+00> : vector<32x64xf32>
    %155 = tpu.matmul %153, %154, %cst_195 {dimension_numbers = #tpu.dot_dimension_numbers<[1], [0], [0], [1], [0, 0, 1, 1], [], []>} : vector<32x288xbf16>, vector<288x64xbf16>, vector<32x64xf32> -> vector<32x64xf32>
    %c0_196 = arith.constant 0 : index
    %c0_197 = arith.constant 0 : index
    %156 = vector.load %arg7[%c0_196, %c0_197] : memref<1x64xf32, #tpu.memory_space<vmem>>, vector<1x64xf32>
    %157 = vector.broadcast %156 : vector<1x64xf32> to vector<32x64xf32>
    %158 = arith.addf %155, %157 : vector<32x64xf32>
    %159 = arith.negf %158 : vector<32x64xf32>
    %160 = math.exp %159 : vector<32x64xf32>
    %cst_198 = arith.constant 1.000000e+00 : f32
    %161 = vector.broadcast %cst_198 : f32 to vector<32x64xf32>
    %162 = arith.addf %161, %160 : vector<32x64xf32>
    %163 = arith.divf %161, %162 : vector<32x64xf32>
    %164 = arith.mulf %158, %163 : vector<32x64xf32>
    %c0_199 = arith.constant 0 : index
    %c0_200 = arith.constant 0 : index
    %c0_201 = arith.constant 0 : index
    %165 = vector.load %arg8[%c0_199, %c0_200, %c0_201] : memref<1x64x64xf32, #tpu.memory_space<vmem>>, vector<1x32x64xf32>
    %166 = vector.shape_cast %165 : vector<1x32x64xf32> to vector<32x64xf32>
    %167 = vector.shape_cast %164 : vector<32x64xf32> to vector<1x32x64xf32>
    tpu.vector_store %arg8[%c0_199, %c0_200, %c0_201], %167 {strides = array<i32>} : memref<1x64x64xf32, #tpu.memory_space<vmem>>, vector<1x32x64xf32>,
    %c4_202 = arith.constant 4 : index
    %c0_203 = arith.constant 0 : index
    %c0_204 = arith.constant 0 : index
    %168 = vector.load %arg10[%c4_202, %c0_203, %c0_204] : memref<10x10x32xbf16, #tpu.memory_space<vmem>>, vector<4x8x32xbf16>
    %169 = vector.shape_cast %168 : vector<4x8x32xbf16> to vector<32x32xbf16>
    %c0_205 = arith.constant 0 : index
    %c0_206 = arith.constant 0 : index
    %170 = vector.load %arg11[%c0_205, %c0_206] : memref<32x288xbf16, #tpu.memory_space<vmem>>, vector<32x32xbf16>
    tpu.vector_store %arg11[%c0_205, %c0_206], %169 {strides = array<i32>} : memref<32x288xbf16, #tpu.memory_space<vmem>>, vector<32x32xbf16>,
    %c4_207 = arith.constant 4 : index
    %c1_208 = arith.constant 1 : index
    %c0_209 = arith.constant 0 : index
    %171 = vector.load %arg10[%c4_207, %c1_208, %c0_209] : memref<10x10x32xbf16, #tpu.memory_space<vmem>>, vector<4x8x32xbf16>
    %172 = vector.shape_cast %171 : vector<4x8x32xbf16> to vector<32x32xbf16>
    %c0_210 = arith.constant 0 : index
    %c32_211 = arith.constant 32 : index
    %173 = vector.load %arg11[%c0_210, %c32_211] : memref<32x288xbf16, #tpu.memory_space<vmem>>, vector<32x32xbf16>
    tpu.vector_store %arg11[%c0_210, %c32_211], %172 {strides = array<i32>} : memref<32x288xbf16, #tpu.memory_space<vmem>>, vector<32x32xbf16>,
    %c4_212 = arith.constant 4 : index
    %c2_213 = arith.constant 2 : index
    %c0_214 = arith.constant 0 : index
    %174 = vector.load %arg10[%c4_212, %c2_213, %c0_214] : memref<10x10x32xbf16, #tpu.memory_space<vmem>>, vector<4x8x32xbf16>
    %175 = vector.shape_cast %174 : vector<4x8x32xbf16> to vector<32x32xbf16>
    %c0_215 = arith.constant 0 : index
    %c64_216 = arith.constant 64 : index
    %176 = vector.load %arg11[%c0_215, %c64_216] : memref<32x288xbf16, #tpu.memory_space<vmem>>, vector<32x32xbf16>
    tpu.vector_store %arg11[%c0_215, %c64_216], %175 {strides = array<i32>} : memref<32x288xbf16, #tpu.memory_space<vmem>>, vector<32x32xbf16>,
    %c5_217 = arith.constant 5 : index
    %c0_218 = arith.constant 0 : index
    %c0_219 = arith.constant 0 : index
    %177 = vector.load %arg10[%c5_217, %c0_218, %c0_219] : memref<10x10x32xbf16, #tpu.memory_space<vmem>>, vector<4x8x32xbf16>
    %178 = vector.shape_cast %177 : vector<4x8x32xbf16> to vector<32x32xbf16>
    %c0_220 = arith.constant 0 : index
    %c96_221 = arith.constant 96 : index
    %179 = vector.load %arg11[%c0_220, %c96_221] : memref<32x288xbf16, #tpu.memory_space<vmem>>, vector<32x32xbf16>
    tpu.vector_store %arg11[%c0_220, %c96_221], %178 {strides = array<i32>} : memref<32x288xbf16, #tpu.memory_space<vmem>>, vector<32x32xbf16>,
    %c5_222 = arith.constant 5 : index
    %c1_223 = arith.constant 1 : index
    %c0_224 = arith.constant 0 : index
    %180 = vector.load %arg10[%c5_222, %c1_223, %c0_224] : memref<10x10x32xbf16, #tpu.memory_space<vmem>>, vector<4x8x32xbf16>
    %181 = vector.shape_cast %180 : vector<4x8x32xbf16> to vector<32x32xbf16>
    %c0_225 = arith.constant 0 : index
    %c128_226 = arith.constant 128 : index
    %182 = vector.load %arg11[%c0_225, %c128_226] : memref<32x288xbf16, #tpu.memory_space<vmem>>, vector<32x32xbf16>
    tpu.vector_store %arg11[%c0_225, %c128_226], %181 {strides = array<i32>} : memref<32x288xbf16, #tpu.memory_space<vmem>>, vector<32x32xbf16>,
    %c5_227 = arith.constant 5 : index
    %c2_228 = arith.constant 2 : index
    %c0_229 = arith.constant 0 : index
    %183 = vector.load %arg10[%c5_227, %c2_228, %c0_229] : memref<10x10x32xbf16, #tpu.memory_space<vmem>>, vector<4x8x32xbf16>
    %184 = vector.shape_cast %183 : vector<4x8x32xbf16> to vector<32x32xbf16>
    %c0_230 = arith.constant 0 : index
    %c160_231 = arith.constant 160 : index
    %185 = vector.load %arg11[%c0_230, %c160_231] : memref<32x288xbf16, #tpu.memory_space<vmem>>, vector<32x32xbf16>
    tpu.vector_store %arg11[%c0_230, %c160_231], %184 {strides = array<i32>} : memref<32x288xbf16, #tpu.memory_space<vmem>>, vector<32x32xbf16>,
    %c6_232 = arith.constant 6 : index
    %c0_233 = arith.constant 0 : index
    %c0_234 = arith.constant 0 : index
    %186 = vector.load %arg10[%c6_232, %c0_233, %c0_234] : memref<10x10x32xbf16, #tpu.memory_space<vmem>>, vector<4x8x32xbf16>
    %187 = vector.shape_cast %186 : vector<4x8x32xbf16> to vector<32x32xbf16>
    %c0_235 = arith.constant 0 : index
    %c192_236 = arith.constant 192 : index
    %188 = vector.load %arg11[%c0_235, %c192_236] : memref<32x288xbf16, #tpu.memory_space<vmem>>, vector<32x32xbf16>
    tpu.vector_store %arg11[%c0_235, %c192_236], %187 {strides = array<i32>} : memref<32x288xbf16, #tpu.memory_space<vmem>>, vector<32x32xbf16>,
    %c6_237 = arith.constant 6 : index
    %c1_238 = arith.constant 1 : index
    %c0_239 = arith.constant 0 : index
    %189 = vector.load %arg10[%c6_237, %c1_238, %c0_239] : memref<10x10x32xbf16, #tpu.memory_space<vmem>>, vector<4x8x32xbf16>
    %190 = vector.shape_cast %189 : vector<4x8x32xbf16> to vector<32x32xbf16>
    %c0_240 = arith.constant 0 : index
    %c224_241 = arith.constant 224 : index
    %191 = vector.load %arg11[%c0_240, %c224_241] : memref<32x288xbf16, #tpu.memory_space<vmem>>, vector<32x32xbf16>
    tpu.vector_store %arg11[%c0_240, %c224_241], %190 {strides = array<i32>} : memref<32x288xbf16, #tpu.memory_space<vmem>>, vector<32x32xbf16>,
    %c6_242 = arith.constant 6 : index
    %c2_243 = arith.constant 2 : index
    %c0_244 = arith.constant 0 : index
    %192 = vector.load %arg10[%c6_242, %c2_243, %c0_244] : memref<10x10x32xbf16, #tpu.memory_space<vmem>>, vector<4x8x32xbf16>
    %193 = vector.shape_cast %192 : vector<4x8x32xbf16> to vector<32x32xbf16>
    %c0_245 = arith.constant 0 : index
    %c256_246 = arith.constant 256 : index
    %194 = vector.load %arg11[%c0_245, %c256_246] : memref<32x288xbf16, #tpu.memory_space<vmem>>, vector<32x32xbf16>
    tpu.vector_store %arg11[%c0_245, %c256_246], %193 {strides = array<i32>} : memref<32x288xbf16, #tpu.memory_space<vmem>>, vector<32x32xbf16>,
    %c0_247 = arith.constant 0 : index
    %c0_248 = arith.constant 0 : index
    %195 = vector.load %arg11[%c0_247, %c0_248] : memref<32x288xbf16, #tpu.memory_space<vmem>>, vector<32x288xbf16>
    %c0_249 = arith.constant 0 : index
    %c0_250 = arith.constant 0 : index
    %196 = vector.load %arg6[%c0_249, %c0_250] : memref<288x64xbf16, #tpu.memory_space<vmem>>, vector<288x64xbf16>
    %cst_251 = arith.constant dense<0.000000e+00> : vector<32x64xf32>
    %197 = tpu.matmul %195, %196, %cst_251 {dimension_numbers = #tpu.dot_dimension_numbers<[1], [0], [0], [1], [0, 0, 1, 1], [], []>} : vector<32x288xbf16>, vector<288x64xbf16>, vector<32x64xf32> -> vector<32x64xf32>
    %c0_252 = arith.constant 0 : index
    %c0_253 = arith.constant 0 : index
    %198 = vector.load %arg7[%c0_252, %c0_253] : memref<1x64xf32, #tpu.memory_space<vmem>>, vector<1x64xf32>
    %199 = vector.broadcast %198 : vector<1x64xf32> to vector<32x64xf32>
    %200 = arith.addf %197, %199 : vector<32x64xf32>
    %201 = arith.negf %200 : vector<32x64xf32>
    %202 = math.exp %201 : vector<32x64xf32>
    %cst_254 = arith.constant 1.000000e+00 : f32
    %203 = vector.broadcast %cst_254 : f32 to vector<32x64xf32>
    %204 = arith.addf %203, %202 : vector<32x64xf32>
    %205 = arith.divf %203, %204 : vector<32x64xf32>
    %206 = arith.mulf %200, %205 : vector<32x64xf32>
    %c0_255 = arith.constant 0 : index
    %c32_256 = arith.constant 32 : index
    %c0_257 = arith.constant 0 : index
    %207 = vector.load %arg8[%c0_255, %c32_256, %c0_257] : memref<1x64x64xf32, #tpu.memory_space<vmem>>, vector<1x32x64xf32>
    %208 = vector.shape_cast %207 : vector<1x32x64xf32> to vector<32x64xf32>
    %209 = vector.shape_cast %206 : vector<32x64xf32> to vector<1x32x64xf32>
    tpu.vector_store %arg8[%c0_255, %c32_256, %c0_257], %209 {strides = array<i32>} : memref<1x64x64xf32, #tpu.memory_space<vmem>>, vector<1x32x64xf32>,
    return
  }
  func.func @transform_0(%arg0: i32) -> (i32, i32, i32) {
    %c0_i32 = arith.constant 0 : i32
    %c0_i32_0 = arith.constant 0 : i32
    %c0_i32_1 = arith.constant 0 : i32
    return %arg0, %c0_i32, %c0_i32_0 : i32, i32, i32
  }
  func.func @transform_1(%arg0: i32) -> (i32, i32) {
    %c0_i32 = arith.constant 0 : i32
    %c0_i32_0 = arith.constant 0 : i32
    %c0_i32_1 = arith.constant 0 : i32
    return %c0_i32, %c0_i32_0 : i32, i32
  }
  func.func @transform_2(%arg0: i32) -> (i32, i32) {
    %c0_i32 = arith.constant 0 : i32
    %c0_i32_0 = arith.constant 0 : i32
    %c0_i32_1 = arith.constant 0 : i32
    return %c0_i32, %c0_i32_0 : i32, i32
  }
  func.func @transform_3(%arg0: i32) -> (i32, i32) {
    %c0_i32 = arith.constant 0 : i32
    %c0_i32_0 = arith.constant 0 : i32
    %c0_i32_1 = arith.constant 0 : i32
    return %c0_i32, %c0_i32_0 : i32, i32
  }
  func.func @transform_4(%arg0: i32) -> (i32, i32) {
    %c0_i32 = arith.constant 0 : i32
    %c0_i32_0 = arith.constant 0 : i32
    %c0_i32_1 = arith.constant 0 : i32
    return %c0_i32, %c0_i32_0 : i32, i32
  }
  func.func @transform_5(%arg0: i32) -> (i32, i32) {
    %c0_i32 = arith.constant 0 : i32
    %c0_i32_0 = arith.constant 0 : i32
    %c0_i32_1 = arith.constant 0 : i32
    return %c0_i32, %c0_i32_0 : i32, i32
  }
  func.func @transform_6(%arg0: i32) -> (i32, i32) {
    %c0_i32 = arith.constant 0 : i32
    %c0_i32_0 = arith.constant 0 : i32
    %c0_i32_1 = arith.constant 0 : i32
    return %c0_i32, %c0_i32_0 : i32, i32
  }
  func.func @transform_7(%arg0: i32) -> (i32, i32, i32) {
    %c0_i32 = arith.constant 0 : i32
    %c0_i32_0 = arith.constant 0 : i32
    %c0_i32_1 = arith.constant 0 : i32
    return %arg0, %c0_i32, %c0_i32_0 : i32, i32, i32
  }
}

</mosaic_0001>

<bundles_post_ra>
// kernel: csp_resnet_cbs_forward.1
= control target key start
LH: loop header
LB: loop body
LE: loop exit
PB: predicated region body
PF: predicated region fallthrough
CT: control target
= control target key end

     0   :  { %12 = vsyncpa [#allocation6], 0  ;;  %s6390_s0 = inlined_call_operand.vmem [shape: bf16[2,64,36], index: 0, kind: input, shape index: {}]   ;;  %s6391_s1 = inlined_call_operand.vmem [shape: bf16[36,32], index: 1, kind: input, shape index: {}]   ;;  %s6392_s2 = inlined_call_operand.vmem [shape: f32[1,32], index: 2, kind: input, shape index: {}]   ;;  %s6393_s3 = inlined_call_operand.vmem [shape: bf16[288,32], index: 3, kind: input, shape index: {}]   ;;  %s6394_s4 = inlined_call_operand.vmem [shape: f32[1,32], index: 4, kind: input, shape index: {}]   ;;  %s6395_s5 = inlined_call_operand.vmem [shape: bf16[288,64], index: 5, kind: input, shape index: {}]   ;;  %s6396_s6 = inlined_call_operand.vmem [shape: f32[1,64], index: 6, kind: input, shape index: {}]   ;;  %s6397_s7 = inlined_call_operand.hbm [shape: f32[2,64,64], index: 7, kind: output, shape index: {}]  }
   0x1   :  { %14 = vsyncpa [#allocation6 + $0x1], 0  ;;  %s4977_s24 = smov 0   ;;  %s4979_s25 = smov 0  }
   0x2   :  { %s4981_s26 = smov 0   ;;  %s4983_s27 = smov 0  }
   0x3 LB: > { %s4998_s28 = sadd.s32 4294967295, %s4929_s27   ;;  %s4102_s29 = sadd.s32 4294967294, %s4929_s27   ;;  %s4929_s27 = sphi %s4983_s27, %s6443_s27   ;;  %s4925_s26 = sphi %s4981_s26, %s6442_s26   ;;  %s4921_s25 = sphi %s4979_s25, %s6441_s25   ;;  %s4917_s24 = sphi %s4977_s24, %s6440_s24  }
   0x4   : > { %s5002_s30 = sadd.s32 1, %s4929_s27   ;;  %s179_s8 = sadd.s32 1, %s4925_s26 }
   0x5   : > { %s176_s9 = ssub.s32 %s4929_s27, %s5002_s30  ;;  %p189_p0 = scmp.ne.s32.totalorder %s4925_s26, %s4921_s25 }
   0x6   : > { %p177_p1 = scmp.eq.s32.totalorder %s176_s9, 0  ;;  %p190_p2 = scmp.eq.s32.totalorder %s4998_s28, 1 }
   0x7   : > { %p195_p3 = scmp.ne.s32.totalorder %s4921_s25, %s4917_s24  ;;  %p196_p4 = scmp.eq.s32.totalorder %s4102_s29, 1 }
   0x8   : > { %s5013_s10 = scalar_select %p177_p1, %s4925_s26, %s179_s8  }
   0x9   : > { %p5015_p5 = por %p190_p2, %p189_p0  ;;  %p5019_p6 = por %p196_p4, %p195_p3 }
   0xa   : > { %p4105_p7 = scmp.ge.s32.totalorder %s4929_s27, 1  ;;  %p240_p8 = scmp.lt.s32.totalorder %s4929_s27, 3 }
   0xc   : > { %p241_p9 = pnand %p4105_p7, %p240_p8 }
   0xd   : > { %p272_p10 = scmp.lt.s32.totalorder (!%p241_p9), %s4998_s28, 1  ;;  %s4932_s20 = smov (!%p241_p9), 32  }
   0xe   : > { %244 = sbr.rel (%p241_p9) target bundleno = 1023 (0x3ff), region = 48  ;;  %s4933_s21 = smov (!%p241_p9), 64  }
   0xf   : > { %s4887_s23 = scalar_lea.hbm (!%p241_p9), %s6397_s7, 128 }
  0x13   : > { %v423_v0 = vld [vmem:[%s6391_s1 + $0x10] sm:$0x3]  ;;  %vm460_vm0 = vcmask 1041408   ;;  %vm280_vm1 = vcmask 253952   ;;  %vm286_vm2 = vsmask.f32 256 }
  0x14   : > { %v642_v1 = vld [vmem:[%s6391_s1 + $0x10] sm:$0x3]  ;;  %v447_v2 = vunpack.c.l.b16 %v423_v0  ;;  %v291_v4 = vld [vmem:[#allocation2 + $0x8] sm:$0x1]  ;;  %s273_s17 = scalar_select %p272_p10, %s4998_s28, 1  ;;  %vm5034_vm3 = vmand %vm280_vm1, %vm286_vm2  ;;  %vm453_vm6 = vcmask 293888  }
  0x15   : > { %v666_v3 = vunpack.c.l.b16 %v642_v1  ;;  %vm318_vm4 = vsmask.f32 7938  ;;  %v323_v8 = vld [vmem:[#allocation2 + $0xc] sm:$0x1]  ;;  %v292_v10 = vsel %vm5034_vm3, 0, %v291_v4  ;;  %v4617_v16 = vld [vmem:[%s6391_s1] sm:$0xff] }
  0x16   : > { %v450_v5 = vpack.c.b16 %v447_v2, %v447_v2  ;;  %v4618_v9 = vld [vmem:[%s6391_s1 + $0x8] sm:$0xff]  ;;  %vm5045_vm5 = vmand %vm280_vm1, %vm318_vm4  ;;  %293 = vst [vmem:[#allocation2 + $0x8] sm:$0x1] %v292_v10  ;;  %s4614_s22 = sshll.u32 %s273_s17, 5  ;;  %v4621_v17 = vld [vmem:[%s6391_s1] sm:$0xff]  ;;  %vm278_vm7 = vcmask 257024  }
  0x17   : > { %v669_v6 = vpack.c.b16 %v666_v3, %v666_v3  ;;  %v4622_v14 = vld [vmem:[%s6391_s1 + $0x8] sm:$0xff]  ;;  %v324_v15 = vsel %vm5045_vm5, 0, %v323_v8  ;;  %s276_s15 = scalar_lea.vmem %s6390_s0, %s4614_s22  ;;  %v4931_v22 = vmov 0   ;;  %vm865_vm8 = vsmask.f32 3328  ;;  %s4934_s22 = smov 96  }
  0x18   : > { %v462_v12 = vsel %vm460_vm0, %v450_v5, 0  ;;  %325 = vst [vmem:[#allocation2 + $0xc] sm:$0x1] %v324_v15  ;;  %v4615_v18 = vld [vmem:[%s276_s15] sm:$0xff]  ;;  %v4619_v19 = vld [vmem:[%s276_s15 + $0x10] sm:$0xff]  ;;  %v4616_v20 = vld [vmem:[%s276_s15 + $0x8] sm:$0xff] }
  0x19   : > { %v679_v13 = vsel %vm460_vm0, %v669_v6, 0  ;;  %469 = vmatpush.bf16.msra.mxu0 %v462_v12  ;;  %v4620_v21 = vld [vmem:[%s276_s15 + $0x18] sm:$0xff]  ;;  %279 = vst.msk [vmem:[#allocation2] sm:$0xf] %vm278_vm7, %v4931_v22  ;;  %vm866_vm9 = vsmask.f32 7440 }
  0x1a   : > { %686 = vmatpush.bf16.msra.mxu1 %v679_v13  ;;  %281 = vst.msk [vmem:[#allocation2 + $0x4] sm:$0x1] %vm280_vm1, %v4931_v22  ;;  %vm5075_vm10 = vmor %vm865_vm8, %vm866_vm9  ;;  %v5082_v38 = vld [vmem:[%s6392_s2] ss:$0 sm:$0xff]  ;;  %v303_v42 = vld [vmem:[#allocation2 + $0x28] sm:$0x1] }
  0x1b   : > { %283 = vst.msk [vmem:[#allocation2 + $0x48] sm:$0xf] %vm278_vm7, %v4931_v22  ;;  %v5087_v39 = vld [vmem:[%s6392_s2] ss:$0 sm:$0xff]  ;;  %v335_v43 = vld [vmem:[#allocation2 + $0x2c] sm:$0x1] }
  0x1c   : > { %284 = vst.msk [vmem:[#allocation2 + $0x4c] sm:$0x1] %vm280_vm1, %v4931_v22  ;;  %v304_v46 = vsel %vm5034_vm3, 0, %v303_v42  ;;  %v336_v47 = vsel %vm5045_vm5, 0, %v335_v43  ;;  %v294_v55 = vld [vmem:[#allocation2 + $0x10] sm:$0x1] }
  0x1d   : > { %470 = vmatpush.bf16.msra.mxu0 %v4618_v9  ;;  %350 = vst.msk [vmem:[#allocation3] sm:$0xf] %vm278_vm7, %v4931_v22  ;;  %v326_v56 = vld [vmem:[#allocation2 + $0x14] sm:$0x1]  ;;  %v295_v58 = vsel %vm5034_vm3, 0, %v294_v55  ;;  %vm957_vm11 = vcmask 1042432  }
  0x1e   : > { %687 = vmatpush.bf16.msra.mxu1 %v4622_v14  ;;  %351 = vst.msk [vmem:[#allocation3 + $0x4] sm:$0x1] %vm280_vm1, %v4931_v22  ;;  %v327_v59 = vsel %vm5045_vm5, 0, %v326_v56  ;;  %v306_v61 = vld [vmem:[#allocation2 + $0x30] sm:$0x1]  ;;  %vm958_vm12 = vcmask 1046532  }
  0x1f   : > { %353 = vst.msk [vmem:[#allocation3 + $0x48] sm:$0xf] %vm278_vm7, %v4931_v22  ;;  %v307_v0 = vsel %vm5034_vm3, 0, %v306_v61  ;;  %v338_v1 = vld [vmem:[#allocation2 + $0x34] sm:$0x1]  ;;  %vm5145_vm15 = vmor %vm957_vm11, %vm958_vm12 }
  0x20   : > { %v288_v23 = vld [vmem:[#allocation2] sm:$0x1]  ;;  %354 = vst.msk [vmem:[#allocation3 + $0x4c] sm:$0x1] %vm280_vm1, %v4931_v22  ;;  %v339_v3 = vsel %vm5045_vm5, 0, %v338_v1 }
  0x21   : > { %471 = vmatpush.bf16.msra.mxu0 %v4617_v16  ;;  %v289_v24 = vsel %vm5034_vm3, 0, %v288_v23  ;;  %v320_v25 = vld [vmem:[#allocation2 + $0x4] sm:$0x1]  ;;  %305 = vst [vmem:[#allocation2 + $0x28] sm:$0x1] %v304_v46 }
  0x22   : > { %688 = vmatpush.bf16.msra.mxu1 %v4621_v17  ;;  %290 = vst [vmem:[#allocation2] sm:$0x1] %v289_v24  ;;  %v321_v26 = vsel %vm5045_vm5, 0, %v320_v25  ;;  %v941_v6 = vld [vmem:[#allocation2] sm:$0xe] }
  0x23   : > { %322 = vst [vmem:[#allocation2 + $0x4] sm:$0x1] %v321_v26  ;;  %v4153_v13 = vrot.slane %v941_v6, 9  ;;  %v297_v17 = vld [vmem:[#allocation2 + $0x18] sm:$0x1] }
  0x24   : > { %4125 = vmatmul.msk.bf16.vlgmr.msra.gmra.mxu0 %vm453_vm6, %v4615_v18  ;;  %337 = vst [vmem:[#allocation2 + $0x2c] sm:$0x1] %v336_v47  ;;  %v329_v18 = vld [vmem:[#allocation2 + $0x1c] sm:$0x1]  ;;  %v300_v6 = vld [vmem:[#allocation2 + $0x20] sm:$0x1] }
  0x25   : > { %4147 = vmatmul.msk.bf16.vlgmr.msra.gmra.mxu1 %vm453_vm6, %v4619_v19  ;;  %296 = vst [vmem:[#allocation2 + $0x10] sm:$0x1] %v295_v58  ;;  %v330_v22 = vsel %vm5045_vm5, 0, %v329_v18 }
  0x26   : > { %328 = vst [vmem:[#allocation2 + $0x14] sm:$0x1] %v327_v59 }
  0x27   : > { %308 = vst [vmem:[#allocation2 + $0x30] sm:$0x1] %v307_v0 }
  0x28   : > { %340 = vst [vmem:[#allocation2 + $0x34] sm:$0x1] %v339_v3 }
  0x29   : > { %v857_v27 = vld [vmem:[#allocation2] sm:$0xf]  ;;  %331 = vst [vmem:[#allocation2 + $0x1c] sm:$0x1] %v330_v22 }
  0x2a   : > { %v869_v28 = vshrl.u32 %v857_v27, 16  ;;  %v872_v29 = vshll.u32 %v857_v27, 16  ;;  %v858_v32 = vld [vmem:[#allocation2 + $0x4] sm:$0x1] }
  0x2b   : > { %v878_v34 = vshll.u32 %v858_v32, 16  ;;  %v942_v8 = vld [vmem:[#allocation2 + $0x4] sm:$0x1] }
  0x2c   : > { %v871_v30 = vrot.slane %v869_v28, 4  ;;  %v874_v31 = vrot.slane %v872_v29, 5  ;;  %v962_v14 = vrot.slane %v942_v8, 5  ;;  %v332_v8 = vld [vmem:[#allocation2 + $0x24] sm:$0x1] }
  0x2d   : > { %v880_v36 = vrot.slane %v878_v34, 5  ;;  %v309_v34 = vld [vmem:[#allocation2 + $0x38] sm:$0x1] }
  0x2e   : > { %v875_v33 = vor.u32 %v874_v31, %v871_v30  ;;  %v963_v29 = vsel %vm5145_vm15, %v4153_v13, %v962_v14  ;;  %v310_v43 = vsel %vm5034_vm3, 0, %v309_v34 }
  0x2f   : > { %976 = vrot.lane.b32.xlu1 %v963_v29, %s4933_s21  ;;  %311 = vst [vmem:[#allocation2 + $0x38] sm:$0x1] %v310_v43 }
  0x30   : > { %v876_v35 = vrot.slane %v875_v33, 4 }
  0x32   : > { %v881_v40 = vsel %vm5075_vm10, %v876_v35, %v880_v36 }
  0x33   : > { %924 = vrot.lane.b32.xlu0 %v881_v40, %s4932_s20 }
  0x34   : > { %4126 = vmatmul.msk.bf16.gmra.mxu0 %vm453_vm6, %v4616_v20 }
  0x35   : > { %4148 = vmatmul.msk.bf16.gmra.mxu1 %vm453_vm6, %v4620_v21  ;;  %v298_v21 = vsel %vm5034_vm3, 0, %v297_v17 }
  0x36   : > { %299 = vst [vmem:[#allocation2 + $0x18] sm:$0x1] %v298_v21 }
  0xa1   : > { %v473_v41 = vpop.f32.mrf.mxu0 }
  0xa2   : > { %v690_v44 = vpop.f32.mrf.mxu1  ;;  %v5093_v45 = vadd.f32 %v5082_v38, %v473_v41 }
  0xa3   : > { %v5100_v48 = vadd.f32 %v5087_v39, %v690_v44  ;;  %v341_v44 = vld [vmem:[#allocation2 + $0x3c] sm:$0x1] }
  0xa4   : > { %v4127_v49 = vmul.f32 -1.442695, %v5093_v45  ;;  %v342_v58 = vsel %vm5045_vm5, 0, %v341_v44  ;;  %v610_v44 = vld [vmem:[#allocation2 + $0x8] sm:$0xf] }
  0xa5   : > { %v4149_v50 = vmul.f32 -1.442695, %v5100_v48  ;;  %343 = vst [vmem:[#allocation2 + $0x3c] sm:$0x1] %v342_v58 }
  0xa6   : > { %4771 = vpow2.f32 %v4127_v49 }
  0xa7   : > { %4773 = vpow2.f32 %v4149_v50 }
  0xa9   : > { %v475_v51 = vpop.f32.mrf.mxu0 }
  0xaa   : > { %v692_v52 = vpop.f32.mrf.mxu1  ;;  %v5105_v53 = vadd.f32 %v5082_v38, %v475_v51 }
  0xab   : > { %v5108_v54 = vadd.f32 %v5087_v39, %v692_v52 }
  0xac   : > { %v4772_v57 = vpop.eup %4771  ;;  %v4128_v60 = vmul.f32 -1.442695, %v5105_v53 }
  0xad   : > { %v4774_v62 = vpop.eup %4773  ;;  %v5115_v63 = vadd.f32 1.0, %v4772_v57  ;;  %v4150_v4 = vmul.f32 -1.442695, %v5108_v54 }
  0xae   : > { %v5119_v2 = vadd.f32 1.0, %v4774_v62  ;;  %4775 = vpow2.f32 %v4128_v60 }
  0xaf   : > { %4777 = vrcp.f32 %v5115_v63  ;;  %v508_v9 = vand.u32 2147483647, %v5115_v63  ;;  %vm504_vm13 = vweird.f32 %v5115_v63  ;;  %v510_v16 = vand.u32 2147483648, %v5115_v63 }
  0xb0   : > { %4779 = vrcp.f32 %v5119_v2  ;;  %vm721_vm14 = vweird.f32 %v5119_v2  ;;  %v725_v27 = vand.u32 2147483647, %v5119_v2  ;;  %v727_v33 = vand.u32 2147483648, %v5119_v2 }
  0xb1   : > { %4781 = vpow2.f32 %v4150_v4  ;;  %v478_v5 = vpop.f32.mrf.mxu0  ;;  %vm5157_vm0 = vcmp.eq.f32.partialorder %v508_v9, 8.507059e+37  ;;  %v511_v36 = vor.u32 1.1754944e-38, %v510_v16  ;;  %v333_v16 = vsel %vm5045_vm5, 0, %v332_v8 }
  0xb2   : > { %v5128_v10 = vadd.f32 %v5082_v38, %v478_v5  ;;  %v695_v12 = vpop.f32.mrf.mxu1  ;;  %vm5178_vm6 = vcmp.eq.f32.partialorder %v725_v27, 8.507059e+37  ;;  %v728_v57 = vor.u32 1.1754944e-38, %v727_v33  ;;  %334 = vst [vmem:[#allocation2 + $0x24] sm:$0x1] %v333_v16 }
  0xb3   : > { %v5142_v23 = vadd.f32 %v5087_v39, %v695_v12 }
  0xb4   : > { %v4776_v15 = vpop.eup %4775  ;;  %v4129_v28 = vmul.f32 -1.442695, %v5128_v10 }
  0xb5   : > { %v5132_v19 = vpop.eup %4777  ;;  %v5135_v20 = vadd.f32 1.0, %v4776_v15  ;;  %v4151_v46 = vmul.f32 -1.442695, %v5142_v23  ;;  %v301_v15 = vsel %vm5034_vm3, 0, %v300_v6 }
  0xb6   : > { %v5149_v25 = vpop.eup %4779  ;;  %v500_v26 = vmul.f32 %v5132_v19, %v5115_v63  ;;  %vm505_vm1 = vweird.f32 %v5132_v19  ;;  %302 = vst [vmem:[#allocation2 + $0x20] sm:$0x1] %v301_v15  ;;  %v312_v15 = vld [vmem:[#allocation2 + $0x40] sm:$0x1] }
  0xb7   : > { %v4782_v30 = vpop.eup %4781  ;;  %v717_v32 = vmul.f32 %v5149_v25, %v5119_v2  ;;  %4783 = vrcp.f32 %v5135_v20  ;;  %v525_v40 = vand.u32 2147483648, %v5135_v20  ;;  %v523_v49 = vand.u32 2147483647, %v5135_v20  ;;  %vm5190_vm8 = vmor %vm504_vm13, %vm505_vm1 }
  0xb8   : > { %v501_v35 = vsub.f32 1.0, %v500_v26  ;;  %v5167_v41 = vadd.f32 1.0, %v4782_v30  ;;  %4785 = vpow2.f32 %v4129_v28  ;;  %vm722_vm2 = vweird.f32 %v5149_v25 }
  0xb9   : > { %v718_v42 = vsub.f32 1.0, %v717_v32  ;;  %v480_v55 = vpop.f32.mrf.mxu0  ;;  %vm519_vm9 = vweird.f32 %v5135_v20  ;;  %v526_v62 = vor.u32 1.1754944e-38, %v525_v40  ;;  %vm5204_vm11 = vmor %vm721_vm14, %vm722_vm2  ;;  %vm5210_vm12 = vcmp.eq.f32.partialorder %v523_v49, 8.507059e+37 }
  0xba   : > { %v502_v47 = vmul.f32 %v5132_v19, %v501_v35  ;;  %4787 = vrcp.f32 %v5167_v41  ;;  %v742_v52 = vand.u32 2147483648, %v5167_v41  ;;  %v740_v0 = vand.u32 2147483647, %v5167_v41  ;;  %v697_v12 = vpop.f32.mrf.mxu1 }
  0xbb   : > { %v719_v50 = vmul.f32 %v5149_v25, %v718_v42  ;;  %4789 = vpow2.f32 %v4151_v46  ;;  %v5217_v9 = vadd.f32 %v5082_v38, %v480_v55  ;;  %vm736_vm13 = vweird.f32 %v5167_v41 }
  0xbc   : > { %v503_v56 = vadd.f32 %v5132_v19, %v502_v47  ;;  %v5214_v5 = vor.u32 1.1754944e-38, %v742_v52 }
  0xbd   : > { %v5186_v59 = vpop.eup %4783  ;;  %v720_v61 = vadd.f32 %v5149_v25, %v719_v50  ;;  %v613_v50 = vld [vmem:[#allocation2 + $0xc] sm:$0x1] }
  0xbe   : > { %v507_v1 = vsel %vm5190_vm8, %v5132_v19, %v503_v56  ;;  %v515_v3 = vmul.f32 %v5186_v59, %v5135_v20  ;;  %v4786_v2 = vpop.eup %4785  ;;  %vm520_vm14 = vweird.f32 %v5186_v59  ;;  %vm5261_vm8 = vmand %vm278_vm7, %vm318_vm4  ;;  %v825_v20 = vld [vmem:[#allocation2 + $0x28] sm:$0xf] }
  0xbf   : > { %v512_v13 = vsel %vm5157_vm0, %v511_v36, %v507_v1  ;;  %v724_v14 = vsel %vm5204_vm11, %v5149_v25, %v720_v61  ;;  %v5232_v21 = vadd.f32 1.0, %v4786_v2  ;;  %vm5237_vm0 = vcmp.eq.f32.partialorder %v740_v0, 8.507059e+37  ;;  %vm521_vm2 = vmor %vm519_vm9, %vm520_vm14  ;;  %v828_v61 = vld [vmem:[#allocation2 + $0x2c] sm:$0x1] }
  0xc0   : > { %v4788_v17 = vpop.eup %4787  ;;  %v559_v38 = vmul.f32 %v512_v13, %v5093_v45  ;;  %v729_v18 = vsel %vm5178_vm6, %v728_v57, %v724_v14  ;;  %v516_v19 = vsub.f32 1.0, %v515_v3  ;;  %v5242_v45 = vadd.f32 %v5087_v39, %v697_v12 }
  0xc1   : > { %v776_v22 = vmul.f32 %v729_v18, %v5100_v48  ;;  %v732_v25 = vmul.f32 %v4788_v17, %v5167_v41  ;;  %v4790_v27 = vpop.eup %4789  ;;  %vm737_vm1 = vweird.f32 %v4788_v17  ;;  %4791 = vrcp.f32 %v5232_v21 }
  0xc2   : > { %v563_v28 = vpack.c.bf16 %v559_v38, %v559_v38  ;;  %v517_v29 = vmul.f32 %v5186_v59, %v516_v19  ;;  %v538_v31 = vand.u32 2147483647, %v5232_v21  ;;  %v540_v32 = vand.u32 2147483648, %v5232_v21  ;;  %vm738_vm4 = vmor %vm736_vm13, %vm737_vm1 }
  0xc3   : > { %v780_v48 = vpack.c.bf16 %v776_v22, %v776_v22  ;;  %v733_v30 = vsub.f32 1.0, %v732_v25  ;;  %v5249_v35 = vadd.f32 1.0, %v4790_v27  ;;  %v4130_v39 = vmul.f32 -1.442695, %v5217_v9 }
  0xc4   : > { %v568_v33 = vshrl.u32 %v563_v28, 16  ;;  %v518_v34 = vadd.f32 %v5186_v59, %v517_v29  ;;  %v571_v36 = vshll.u32 %v563_v28, 16  ;;  %vm534_vm6 = vweird.f32 %v5232_v21 }
  0xc5   : > { %v785_v40 = vshrl.u32 %v780_v48, 16  ;;  %v734_v42 = vmul.f32 %v4788_v17, %v733_v30  ;;  %v788_v46 = vshll.u32 %v780_v48, 16  ;;  %4793 = vrcp.f32 %v5249_v35  ;;  %v619_v48 = vld [vmem:[#allocation2 + $0x14] sm:$0x1] }
  0xc6   : > { %v570_v43 = vrot.slane %v568_v33, 7  ;;  %v522_v47 = vsel %vm521_vm2, %v5186_v59, %v518_v34  ;;  %vm5267_vm9 = vcmp.eq.f32.partialorder %v538_v31, 8.507059e+37  ;;  %v541_v57 = vor.u32 1.1754944e-38, %v540_v32 }
  0xc7   : > { %v787_v51 = vrot.slane %v785_v40, 7  ;;  %v527_v52 = vsel %vm5210_vm12, %v526_v62, %v522_v47  ;;  %v735_v55 = vadd.f32 %v4788_v17, %v734_v42  ;;  %v4792_v58 = vpop.eup %4791  ;;  %v755_v1 = vand.u32 2147483647, %v5249_v35  ;;  %v831_v42 = vld [vmem:[#allocation2 + $0x30] sm:$0xf] }
  0xc8   : > { %v573_v59 = vor.u32 %v571_v36, %v570_v43  ;;  %v574_v60 = vrot.slane %v570_v43, 4  ;;  %v560_v0 = vmul.f32 %v527_v52, %v5105_v53  ;;  %v530_v4 = vmul.f32 %v4792_v58, %v5232_v21 }
  0xc9   : > { %v790_v63 = vor.u32 %v788_v46, %v787_v51  ;;  %v791_v62 = vrot.slane %v787_v51, 4  ;;  %v739_v3 = vsel %vm738_vm4, %v4788_v17, %v735_v55  ;;  %vm535_vm11 = vweird.f32 %v4792_v58 }
  0xca   : > { %v611_v6 = vsel %vm5261_vm8, %v573_v59, %v610_v44  ;;  %v614_v8 = vsel %vm5034_vm3, %v574_v60, %v613_v50  ;;  %v564_v12 = vpack.c.bf16 %v560_v0, %v560_v0  ;;  %v744_v53 = vsel %vm5237_vm0, %v5214_v5, %v739_v3  ;;  %v616_v5 = vld [vmem:[#allocation2 + $0x10] sm:$0xf]  ;;  %vm5300_vm14 = vmor %vm534_vm6, %vm535_vm11  ;;  %v834_v50 = vld [vmem:[#allocation2 + $0x34] sm:$0x1] }
  0xcb   : > { %612 = vst [vmem:[#allocation2 + $0x8] sm:$0xf] %v611_v6  ;;  %v826_v41 = vsel %vm5261_vm8, %v790_v63, %v825_v20  ;;  %v829_v2 = vsel %vm5034_vm3, %v791_v62, %v828_v61  ;;  %v777_v13 = vmul.f32 %v744_v53, %v5108_v54  ;;  %v531_v14 = vsub.f32 1.0, %v530_v4  ;;  %v5289_v16 = vpop.eup %4793  ;;  %v344_v54 = vld [vmem:[#allocation2 + $0x44] sm:$0x1] }
  0xcc   : > { %615 = vst [vmem:[#allocation2 + $0xc] sm:$0x1] %v614_v8  ;;  %v576_v17 = vshrl.u32 %v564_v12, 16  ;;  %v579_v38 = vshll.u32 %v564_v12, 16  ;;  %vm751_vm12 = vweird.f32 %v5249_v35  ;;  %v747_v22 = vmul.f32 %v5289_v16, %v5249_v35 }
  0xcd   : > { %827 = vst [vmem:[#allocation2 + $0x28] sm:$0xf] %v826_v41  ;;  %v781_v18 = vpack.c.bf16 %v777_v13, %v777_v13  ;;  %v532_v19 = vmul.f32 %v4792_v58, %v531_v14  ;;  %vm5294_vm13 = vcmp.eq.f32.partialorder %v755_v1, 8.507059e+37  ;;  %v757_v28 = vand.u32 2147483648, %v5249_v35 }
  0xce   : > { %830 = vst [vmem:[#allocation2 + $0x2c] sm:$0x1] %v829_v2  ;;  %v578_v26 = vrot.slane %v576_v17, 7  ;;  %4795 = vpow2.f32 %v4130_v39  ;;  %v313_v29 = vsel %vm5034_vm3, 0, %v312_v15  ;;  %v748_v32 = vsub.f32 1.0, %v747_v22 }
  0xcf   : > { %v793_v30 = vshrl.u32 %v781_v18, 16  ;;  %v533_v31 = vadd.f32 %v4792_v58, %v532_v19  ;;  %vm752_vm0 = vweird.f32 %v5289_v16  ;;  %314 = vst [vmem:[#allocation2 + $0x40] sm:$0x1] %v313_v29  ;;  %v796_v21 = vshll.u32 %v781_v18, 16  ;;  %v625_v19 = vld [vmem:[#allocation2 + $0x1c] sm:$0x1] }
  0xd0   : > { %v581_v33 = vor.u32 %v579_v38, %v578_v26  ;;  %v582_v34 = vrot.slane %v578_v26, 4  ;;  %v345_v36 = vsel %vm5045_vm5, 0, %v344_v54  ;;  %v749_v43 = vmul.f32 %v5289_v16, %v748_v32  ;;  %vm5323_vm1 = vmor %vm751_vm12, %vm752_vm0 }
  0xd1   : > { %v795_v40 = vrot.slane %v793_v30, 7  ;;  %v537_v39 = vsel %vm5300_vm14, %v4792_v58, %v533_v31  ;;  %v758_v44 = vor.u32 1.1754944e-38, %v757_v28  ;;  %346 = vst [vmem:[#allocation2 + $0x44] sm:$0x1] %v345_v36  ;;  %v4152_v52 = vmul.f32 -1.442695, %v5242_v45 }
  0xd2   : > { %v617_v46 = vsel %vm5261_vm8, %v581_v33, %v616_v5  ;;  %v620_v47 = vsel %vm5034_vm3, %v582_v34, %v619_v48  ;;  %v542_v51 = vsel %vm5267_vm9, %v541_v57, %v537_v39  ;;  %v993_v55 = vld [vmem:[#allocation2 + $0x8] sm:$0xf]  ;;  %v750_v61 = vadd.f32 %v5289_v16, %v749_v43  ;;  %v837_v30 = vld [vmem:[#allocation2 + $0x38] sm:$0xf]  ;;  %v840_v31 = vld [vmem:[#allocation2 + $0x3c] sm:$0x1] }
  0xd3   : > { %618 = vst [vmem:[#allocation2 + $0x10] sm:$0xf] %v617_v46  ;;  %v798_v58 = vor.u32 %v796_v21, %v795_v40  ;;  %v799_v59 = vrot.slane %v795_v40, 4  ;;  %v561_v60 = vmul.f32 %v542_v51, %v5128_v10  ;;  %1001 = vrot.lane.b32.xlu2 %v993_v55, %s4934_s22  ;;  %v943_v56 = vld [vmem:[#allocation2 + $0x8] sm:$0xe]  ;;  %4797 = vpow2.f32 %v4152_v52 }
  0xd4   : > { %v4796_v57 = vpop.eup %4795  ;;  %621 = vst [vmem:[#allocation2 + $0x14] sm:$0x1] %v620_v47  ;;  %v1142_v35 = vld [vmem:[#allocation2 + $0x28] sm:$0xf]  ;;  %v944_v0 = vld [vmem:[#allocation2 + $0xc] sm:$0x1]  ;;  %v754_v10 = vsel %vm5323_vm1, %v5289_v16, %v750_v61 }
  0xd5   : > { %v832_v1 = vsel %vm5261_vm8, %v798_v58, %v831_v42  ;;  %v835_v63 = vsel %vm5034_vm3, %v799_v59, %v834_v50  ;;  %v565_v62 = vpack.c.bf16 %v561_v60, %v561_v60  ;;  %1153 = vrot.lane.b32.xlu0 %v1142_v35, %s4933_s21  ;;  %v1090_v3 = vld [vmem:[#allocation2 + $0x8] sm:$0xe]  ;;  %v1091_v4 = vld [vmem:[#allocation2 + $0xc] sm:$0x1]  ;;  %v759_v6 = vsel %vm5294_vm13, %v758_v44, %v754_v10  ;;  %v622_v16 = vld [vmem:[#allocation2 + $0x18] sm:$0xf] }
  0xd6   : > { %833 = vst [vmem:[#allocation2 + $0x30] sm:$0xf] %v832_v1  ;;  %v5341_v8 = vadd.f32 1.0, %v4796_v57  ;;  %v4154_v12 = vrot.slane %v943_v56, 9  ;;  %v966_v53 = vrot.slane %v944_v0, 5  ;;  %v778_v2 = vmul.f32 %v759_v6, %v5142_v23  ;;  %v4646_v48 = vld [vmem:[%s6393_s3 + $0x88] sm:$0xff] }
  0xd7   : > { %836 = vst [vmem:[#allocation2 + $0x34] sm:$0x1] %v835_v63  ;;  %v584_v41 = vshrl.u32 %v565_v62, 16  ;;  %v1693_v13 = vld [vmem:[#allocation2 + $0x28] sm:$0xf]  ;;  %v587_v14 = vshll.u32 %v565_v62, 16  ;;  %1520 = vmatpush.bf16.msrb.mxu0 %v4646_v48 }
  0xd8   : > { %4799 = vrcp.f32 %v5341_v8  ;;  %v782_v17 = vpack.c.bf16 %v778_v2, %v778_v2  ;;  %v967_v38 = vsel %vm5145_vm15, %v4154_v12, %v966_v53  ;;  %v4157_v5 = vrot.slane %v1090_v3, 9  ;;  %v1694_v29 = vld [vmem:[#allocation2 + $0x2c] sm:$0x1]  ;;  %v1915_v43 = vld [vmem:[#allocation2 + $0x28] sm:$0xe]  ;;  %v4645_v44 = vld [vmem:[%s6393_s3 + $0x80] sm:$0xff] }
  0xd9   : > { %v586_v15 = vrot.slane %v584_v41, 7  ;;  %v4798_v18 = vpop.eup %4797  ;;  %978 = vrot.lane.b32.xlu1 %v967_v38, %s4933_s21  ;;  %v1108_v22 = vrot.slane %v1091_v4, 5  ;;  %v1714_v54 = vshrl.u32 %v1693_v13, 16  ;;  %v553_v32 = vand.u32 2147483647, %v5341_v8 }
  0xda   : > { %v994_v25 = vld [vmem:[#allocation2 + $0x10] sm:$0xf]  ;;  %v801_v27 = vshrl.u32 %v782_v17, 16  ;;  %v804_v28 = vshll.u32 %v782_v17, 16  ;;  %v5353_v33 = vadd.f32 1.0, %v4798_v18  ;;  %v1717_v21 = vshll.u32 %v1693_v13, 16 }
  0xdb   : > { %v589_v26 = vor.u32 %v587_v14, %v586_v15  ;;  %v590_v23 = vrot.slane %v586_v15, 4  ;;  %1003 = vrot.lane.b32.xlu2 %v994_v25, %s4934_s22  ;;  %v1109_v34 = vsel %vm5145_vm15, %v4157_v5, %v1108_v22  ;;  %v555_v39 = vand.u32 2147483648, %v5341_v8  ;;  %v1916_v59 = vld [vmem:[#allocation2 + $0x2c] sm:$0x1]  ;;  %v1139_v56 = vld [vmem:[#allocation2 + $0x10] sm:$0xf]  ;;  %1521 = vmatpush.bf16.msrb.mxu0 %v4645_v44 }
  0xdc   : > { %v803_v42 = vrot.slane %v801_v27, 7  ;;  %4801 = vrcp.f32 %v5353_v33  ;;  %v770_v47 = vand.u32 2147483647, %v5353_v33  ;;  %v1716_v50 = vrot.slane %v1714_v54, 4  ;;  %v5378_v57 = vld [vmem:[#allocation2 + $0x10] sm:$0xe] }
  0xdd   : > { %v623_v36 = vsel %vm5261_vm8, %v589_v26, %v622_v16  ;;  %v626_v40 = vsel %vm5034_vm3, %v590_v23, %v625_v19  ;;  %1122 = vrot.lane.b32.xlu0 %v1109_v34, %s4932_s20  ;;  %v1723_v51 = vshll.u32 %v1694_v29, 16  ;;  %v772_v58 = vand.u32 2147483648, %v5353_v33  ;;  %v1093_v62 = vld [vmem:[#allocation2 + $0x14] sm:$0x1]  ;;  %v1773_v10 = vld [vmem:[#allocation2 + $0x28] sm:$0xe] }
  0xde   : > { %v5366_v46 = vpop.eup %4799  ;;  %624 = vst [vmem:[#allocation2 + $0x18] sm:$0xf] %v623_v36  ;;  %v806_v20 = vor.u32 %v804_v28, %v803_v42  ;;  %v807_v52 = vrot.slane %v803_v42, 4  ;;  %vm549_vm2 = vweird.f32 %v5341_v8  ;;  %vm5374_vm6 = vcmp.eq.f32.partialorder %v553_v32, 8.507059e+37  ;;  %v1774_v12 = vld [vmem:[#allocation2 + $0x2c] sm:$0x1] }
  0xdf   : > { %627 = vst [vmem:[#allocation2 + $0x1c] sm:$0x1] %v626_v40  ;;  %v545_v55 = vmul.f32 %v5366_v46, %v5341_v8  ;;  %v1719_v61 = vrot.slane %v1717_v21, 5  ;;  %v4271_v63 = vrot.slane %v1915_v43, 9  ;;  %vm550_vm9 = vweird.f32 %v5366_v46  ;;  %v1243_v5 = vld [vmem:[#allocation2 + $0x10] sm:$0xe] }
  0xe0   : > { %v838_v35 = vsel %vm5261_vm8, %v806_v20, %v837_v30  ;;  %v841_v0 = vsel %vm5034_vm3, %v807_v52, %v840_v31  ;;  %v556_v3 = vor.u32 1.1754944e-38, %v555_v39  ;;  %v1933_v6 = vrot.slane %v1916_v59, 5  ;;  %v1244_v18 = vld [vmem:[#allocation2 + $0x14] sm:$0x1]  ;;  %v5403_v26 = vld [vmem:[#allocation2 + $0x30] sm:$0xe]  ;;  %vm551_vm12 = vmor %vm549_vm2, %vm550_vm9 }
  0xe1   : > { %v546_v1 = vsub.f32 1.0, %v545_v55  ;;  %839 = vst [vmem:[#allocation2 + $0x38] sm:$0xf] %v838_v35  ;;  %v1720_v4 = vor.u32 %v1719_v61, %v1716_v50  ;;  %vm5386_vm4 = vcmp.eq.f32.partialorder %v770_v47, 8.507059e+37  ;;  %v5390_v2 = vor.u32 1.1754944e-38, %v772_v58 }
  0xe2   : > { %842 = vst [vmem:[#allocation2 + $0x3c] sm:$0x1] %v841_v0  ;;  %v1725_v13 = vrot.slane %v1723_v51, 5  ;;  %v4158_v14 = vrot.slane %v5378_v57, 9  ;;  %v5394_v15 = vpop.eup %4801  ;;  %vm766_vm11 = vweird.f32 %v5353_v33  ;;  %v1934_v17 = vsel %vm5145_vm15, %v4271_v63, %v1933_v6  ;;  %v2068_v30 = vld [vmem:[#allocation2 + $0x30] sm:$0xe] }
  0xe3   : > { %v547_v53 = vmul.f32 %v5366_v46, %v546_v1  ;;  %1147 = vrot.lane.b32.xlu2 %v1139_v56, %s4933_s21  ;;  %v1721_v16 = vrot.slane %v1720_v4, 4  ;;  %v1112_v38 = vrot.slane %v1093_v62, 5  ;;  %v762_v22 = vmul.f32 %v5394_v15, %v5353_v33  ;;  %v2069_v36 = vld [vmem:[#allocation2 + $0x34] sm:$0x1]  ;;  %v1964_v40 = vld [vmem:[#allocation2 + $0x30] sm:$0xf] }
  0xe4   : > { %v4268_v25 = vrot.slane %v1773_v10, 9  ;;  %v1793_v54 = vrot.slane %v1774_v12, 5  ;;  %vm767_vm13 = vweird.f32 %v5394_v15  ;;  %v4161_v29 = vrot.slane %v1243_v5, 9  ;;  %v5416_v42 = vld [vmem:[#allocation2 + $0x34] sm:$0x1] }
  0xe5   : > { %v548_v19 = vadd.f32 %v5366_v46, %v547_v53  ;;  %1947 = vrot.lane.b32.xlu0 %v1934_v17, %s4932_s20  ;;  %v1245_v23 = vld [vmem:[#allocation2 + $0x18] sm:$0xe]  ;;  %v1726_v27 = vsel %vm5075_vm10, %v1721_v16, %v1725_v13  ;;  %v1261_v48 = vrot.slane %v1244_v18, 5  ;;  %v763_v32 = vsub.f32 1.0, %v762_v22  ;;  %v1169_v43 = vld [vmem:[#allocation2 + $0x28] sm:$0xf]  ;;  %vm5429_vm14 = vmor %vm766_vm11, %vm767_vm13 }
  0xe6   : > { %v1246_v28 = vld [vmem:[#allocation2 + $0x1c] sm:$0x1]  ;;  %1757 = vrot.lane.b32.xlu1 %v1726_v27, %s4932_s20  ;;  %v4162_v34 = vrot.slane %v1245_v23, 9  ;;  %v859_v44 = vld [vmem:[#allocation2 + $0x8] sm:$0xf]  ;;  %v4275_v20 = vrot.slane %v2068_v30, 9  ;;  %v1794_v55 = vsel %vm5145_vm15, %v4268_v25, %v1793_v54 }
  0xe7   : > { %v552_v31 = vsel %vm551_vm12, %v5366_v46, %v548_v19  ;;  %v1265_v21 = vrot.slane %v1246_v28, 5  ;;  %v1262_v39 = vsel %vm5145_vm15, %v4161_v29, %v1261_v48  ;;  %v764_v46 = vmul.f32 %v5394_v15, %v763_v32  ;;  %v1170_v57 = vld [vmem:[#allocation2 + $0x2c] sm:$0x1]  ;;  %v631_v18 = vld [vmem:[#allocation2 + $0x24] sm:$0x1] }
  0xe8   : > { %v557_v8 = vsel %vm5374_vm6, %v556_v3, %v552_v31  ;;  %1279 = vst.msk [vmem:[#allocation4 + $0x8] sm:$0xf] %vm278_vm7, %v1262_v39  ;;  %v2070_v51 = vld [vmem:[#allocation2 + $0x38] sm:$0xe]  ;;  %v4272_v58 = vrot.slane %v5403_v26, 9  ;;  %v2086_v60 = vrot.slane %v2069_v36, 5 }
  0xe9   : > { %v562_v47 = vmul.f32 %v557_v8, %v5217_v9  ;;  %v1266_v50 = vsel %vm5145_vm15, %v4162_v34, %v1265_v21  ;;  %v1113_v9 = vsel %vm5145_vm15, %v4158_v14, %v1112_v38  ;;  %v2071_v59 = vld [vmem:[#allocation2 + $0x3c] sm:$0x1]  ;;  %v765_v56 = vadd.f32 %v5394_v15, %v764_v46  ;;  %v860_v6 = vld [vmem:[#allocation2 + $0xc] sm:$0x1]  ;;  %v628_v38 = vld [vmem:[#allocation2 + $0x20] sm:$0xf] }
  0xea   : > { %1280 = vst.msk [vmem:[#allocation4 + $0x14] sm:$0xf] %vm278_vm7, %v1266_v50  ;;  %v1937_v33 = vrot.slane %v5416_v42, 5  ;;  %v1214_v35 = vshrl.u32 %v1169_v43, 16  ;;  %v4276_v0 = vrot.slane %v2070_v51, 9  ;;  %v2090_v1 = vrot.slane %v2071_v59, 5 }
  0xeb   : > { %v566_v61 = vpack.c.bf16 %v562_v47, %v562_v47  ;;  %1972 = vrot.lane.b32.xlu2 %v1964_v40, %s4933_s21  ;;  %v1217_v63 = vshll.u32 %v1169_v43, 16  ;;  %v883_v62 = vshrl.u32 %v859_v44, 16  ;;  %v769_v3 = vsel %vm5429_vm14, %v5394_v15, %v765_v56  ;;  %v1163_v29 = vld [vmem:[#allocation2 + $0x10] sm:$0xf]  ;;  %v347_v31 = vld [vmem:[#allocation2 + $0x4c] sm:$0x1] }
  0xec   : > { %vm1469_vm0 = vcmask 261120   ;;  %v2087_v4 = vsel %vm5145_vm15, %v4275_v20, %v2086_v60  ;;  %v774_v12 = vsel %vm5386_vm4, %v5390_v2, %v769_v3  ;;  %v1216_v53 = vrot.slane %v1214_v35, 4  ;;  %v945_v36 = vld [vmem:[#allocation2 + $0x10] sm:$0xe]  ;;  %v1249_v8 = vld [vmem:[#allocation2 + $0x28] sm:$0xe] }
  0xed   : > { %v592_v10 = vshrl.u32 %v566_v61, 16  ;;  %1805 = vrot.lane.b32.xlu0 %v1794_v55, %s4933_s21  ;;  %v1219_v13 = vrot.slane %v1217_v63, 5  ;;  %v1223_v14 = vshll.u32 %v1170_v57, 16  ;;  %v595_v17 = vshll.u32 %v566_v61, 16  ;;  %v1250_v40 = vld [vmem:[#allocation2 + $0x2c] sm:$0x1] }
  0xee   : > { %v779_v5 = vmul.f32 %v774_v12, %v5242_v45  ;;  %1124 = vrot.lane.b32.xlu1 %v1113_v9, %s4932_s20  ;;  %v886_v15 = vshll.u32 %v859_v44, 16  ;;  %v2091_v22 = vsel %vm5145_vm15, %v4276_v0, %v2090_v1  ;;  %v885_v54 = vrot.slane %v883_v62, 4  ;;  %v843_v42 = vld [vmem:[#allocation2 + $0x40] sm:$0xf]  ;;  %v846_v39 = vld [vmem:[#allocation2 + $0x44] sm:$0x1] }
  0xef   : > { %v594_v16 = vrot.slane %v592_v10, 7  ;;  %v4175_v19 = vld [vmem:[#allocation4 + $0x8] sm:$0xf]  ;;  %v1220_v25 = vor.u32 %v1219_v13, %v1216_v53  ;;  %v892_v41 = vshll.u32 %v860_v6, 16  ;;  %v1225_v30 = vrot.slane %v1223_v14, 5 }
  0xf0   : > { %v783_v23 = vpack.c.bf16 %v779_v5, %v779_v5  ;;  %2104 = vst.msk [vmem:[#allocation4 + $0x8] sm:$0xf] %vm278_vm7, %v2087_v4  ;;  %v888_v28 = vrot.slane %v886_v15, 5  ;;  %v1938_v43 = vsel %vm5145_vm15, %v4272_v58, %v1937_v33  ;;  %v946_v50 = vld [vmem:[#allocation2 + $0x14] sm:$0x1]  ;;  %v348_v52 = vsel %vm5045_vm5, 0, %v347_v31 }
  0xf1   : > { %v597_v2 = vor.u32 %v595_v17, %v594_v16  ;;  %v598_v26 = vrot.slane %v594_v16, 4  ;;  %v4625_v27 = vld [vmem:[#allocation4 + $0x10] sm:$0xf0]  ;;  %v1221_v48 = vrot.slane %v1220_v25, 4  ;;  %v894_v46 = vrot.slane %v892_v41, 5 }
  0xf2   : > { %v4176_v45 = vor.u32 %v4625_v27, %v4175_v19  ;;  %2105 = vst.msk [vmem:[#allocation4 + $0x14] sm:$0xf] %vm278_vm7, %v2091_v22  ;;  %v809_v21 = vshrl.u32 %v783_v23, 16  ;;  %v889_v47 = vor.u32 %v888_v28, %v885_v54  ;;  %v812_v20 = vshll.u32 %v783_v23, 16  ;;  %v2074_v62 = vld [vmem:[#allocation2 + $0x48] sm:$0xe] }
  0xf3   : > { %v629_v32 = vsel %vm5261_vm8, %v597_v2, %v628_v38  ;;  %v632_v34 = vsel %vm5034_vm3, %v598_v26, %v631_v18  ;;  %v1226_v44 = vsel %vm5075_vm10, %v1221_v48, %v1225_v30  ;;  %v4164_v9 = vrot.slane %v1249_v8, 9  ;;  %349 = vst [vmem:[#allocation2 + $0x4c] sm:$0x1] %v348_v52  ;;  %v1164_v10 = vld [vmem:[#allocation2 + $0x14] sm:$0x1] }
  0xf4   : > { %630 = vst [vmem:[#allocation2 + $0x20] sm:$0xf] %v629_v32  ;;  %4261 = vmatmul.msk.bf16.vlgmr.msrb.gmra.mxu0 %vm1469_vm0, %v4176_v45  ;;  %v811_v51 = vrot.slane %v809_v21, 7  ;;  %1233 = vrot.lane.b32.xlu2 %v1226_v44, %s4934_s22  ;;  %v890_v55 = vrot.slane %v889_v47, 4  ;;  %v1172_v59 = vshrl.u32 %v1163_v29, 16  ;;  %v1175_v58 = vshll.u32 %v1163_v29, 16 }
  0xf5   : > { %633 = vst [vmem:[#allocation2 + $0x24] sm:$0x1] %v632_v34  ;;  %v1273_v60 = vrot.slane %v1250_v40, 5  ;;  %v4155_v57 = vrot.slane %v945_v36, 9  ;;  %v970_v35 = vrot.slane %v946_v50, 5  ;;  %v4278_v16 = vrot.slane %v2074_v62, 9 }
  0xf6   : > { %v814_v61 = vor.u32 %v812_v20, %v811_v51  ;;  %v815_v56 = vrot.slane %v811_v51, 4  ;;  %1949 = vrot.lane.b32.xlu1 %v1938_v43, %s4932_s20  ;;  %v895_v33 = vsel %vm5075_vm10, %v890_v55, %v894_v46  ;;  %v1174_v3 = vrot.slane %v1172_v59, 4  ;;  %v1988_v12 = vld [vmem:[#allocation2 + $0x30] sm:$0xf]  ;;  %v995_v18 = vld [vmem:[#allocation2 + $0x18] sm:$0xf] }
  0xf7   : > { %v1274_v0 = vsel %vm5145_vm15, %v4164_v9, %v1273_v60  ;;  %926 = vrot.lane.b32.xlu0 %v895_v33, %s4932_s20  ;;  %v1177_v4 = vrot.slane %v1175_v58, 5  ;;  %v971_v53 = vsel %vm5145_vm15, %v4155_v57, %v970_v35  ;;  %v1181_v17 = vshll.u32 %v1164_v10, 16  ;;  %v861_v15 = vld [vmem:[#allocation2 + $0x10] sm:$0xf]  ;;  %v1140_v41 = vld [vmem:[#allocation2 + $0x18] sm:$0xf] }
  0xf8   : > { %v844_v1 = vsel %vm5261_vm8, %v814_v61, %v843_v42  ;;  %v847_v63 = vsel %vm5034_vm3, %v815_v56, %v846_v39  ;;  %1282 = vst.msk [vmem:[#allocation4 + $0x2c] sm:$0xf] %vm278_vm7, %v1274_v0  ;;  %v1997_v25 = vshrl.u32 %v1988_v12, 16  ;;  %v2000_v54 = vshll.u32 %v1988_v12, 16  ;;  %v1989_v31 = vld [vmem:[#allocation2 + $0x34] sm:$0x1] }
  0xf9   : > { %845 = vst [vmem:[#allocation2 + $0x40] sm:$0xf] %v844_v1  ;;  %v1178_v19 = vor.u32 %v1177_v4, %v1174_v3  ;;  %v897_v27 = vshrl.u32 %v861_v15, 16  ;;  %v900_v28 = vshll.u32 %v861_v15, 16  ;;  %v1183_v48 = vrot.slane %v1181_v17, 5 }
  0xfa   : > { %848 = vst [vmem:[#allocation2 + $0x44] sm:$0x1] %v847_v63  ;;  %v2075_v5 = vld [vmem:[#allocation2 + $0x4c] sm:$0x1]  ;;  %v1999_v32 = vrot.slane %v1997_v25, 4  ;;  %v2002_v34 = vrot.slane %v2000_v54, 5 }
  0xfb   : > { %v1247_v6 = vld [vmem:[#allocation2 + $0x20] sm:$0xe]  ;;  %v2098_v22 = vrot.slane %v2075_v5, 5  ;;  %v1179_v45 = vrot.slane %v1178_v19, 4  ;;  %v863_v8 = vld [vmem:[#allocation2 + $0x18] sm:$0xf] }
  0xfc   : > { %v1248_v13 = vld [vmem:[#allocation2 + $0x24] sm:$0x1]  ;;  %v4163_v14 = vrot.slane %v1247_v6, 9  ;;  %980 = vrot.lane.b32.xlu2 %v971_v53, %s4933_s21  ;;  %v1165_v40 = vld [vmem:[#allocation2 + $0x18] sm:$0xf]  ;;  %v899_v39 = vrot.slane %v897_v27, 4  ;;  %v2003_v50 = vor.u32 %v2002_v34, %v1999_v32 }
  0xfd   : > { %v1269_v38 = vrot.slane %v1248_v13, 5  ;;  %v2099_v23 = vsel %vm5145_vm15, %v4278_v16, %v2098_v22  ;;  %v996_v42 = vld [vmem:[#allocation2 + $0x20] sm:$0xf]  ;;  %v902_v43 = vrot.slane %v900_v28, 5  ;;  %v1186_v44 = vshrl.u32 %v1165_v40, 16 }
  0xfe   : > { %1005 = vrot.lane.b32.xlu1 %v995_v18, %s4934_s22  ;;  %v1189_v47 = vshll.u32 %v1165_v40, 16  ;;  %v1184_v46 = vsel %vm5075_vm10, %v1179_v45, %v1183_v48  ;;  %v911_v51 = vshrl.u32 %v863_v8, 16  ;;  %v914_v20 = vshll.u32 %v863_v8, 16  ;;  %v862_v59 = vld [vmem:[#allocation2 + $0x14] sm:$0x1] }
  0xff   : > { %v1270_v2 = vsel %vm5145_vm15, %v4163_v14, %v1269_v38  ;;  %v4628_v26 = vld [vmem:[#allocation4 + $0x28] sm:$0xf0]  ;;  %1149 = vrot.lane.b32.xlu0 %v1140_v41, %s4933_s21  ;;  %v2006_v55 = vshll.u32 %v1989_v31, 16  ;;  %v1965_v60 = vld [vmem:[#allocation2 + $0x38] sm:$0xf]  ;;  %v903_v61 = vor.u32 %v902_v43, %v899_v39  ;;  %v1188_v56 = vrot.slane %v1186_v44, 4 }
 0x100   : > { %1281 = vst.msk [vmem:[#allocation4 + $0x20] sm:$0xf] %vm278_vm7, %v1270_v2  ;;  %v2072_v29 = vld [vmem:[#allocation2 + $0x40] sm:$0xe]  ;;  %v1191_v33 = vrot.slane %v1189_v47, 5  ;;  %v2004_v35 = vrot.slane %v2003_v50, 4 }
 0x101   : > { %2107 = vst.msk [vmem:[#allocation4 + $0x2c] sm:$0xf] %vm278_vm7, %v2099_v23  ;;  %v2073_v30 = vld [vmem:[#allocation2 + $0x44] sm:$0x1]  ;;  %v4277_v21 = vrot.slane %v2072_v29, 9  ;;  %v906_v0 = vshll.u32 %v862_v59, 16 }
 0x102   : > { %v2094_v36 = vrot.slane %v2073_v30, 5  ;;  %v1990_v57 = vld [vmem:[#allocation2 + $0x38] sm:$0xf]  ;;  %v913_v1 = vrot.slane %v911_v51, 4  ;;  %v916_v63 = vrot.slane %v914_v20, 5  ;;  %v2008_v62 = vrot.slane %v2006_v55, 5 }
 0x103   : > { %v1141_v10 = vld [vmem:[#allocation2 + $0x20] sm:$0xf]  ;;  %v1166_v3 = vld [vmem:[#allocation2 + $0x1c] sm:$0x1]  ;;  %v904_v4 = vrot.slane %v903_v61, 4  ;;  %v1192_v12 = vor.u32 %v1191_v33, %v1188_v56  ;;  %v2011_v53 = vshrl.u32 %v1990_v57, 16 }
 0x104   : > { %1007 = vrot.lane.b32.xlu2 %v996_v42, %s4934_s22  ;;  %v2095_v9 = vsel %vm5145_vm15, %v4277_v21, %v2094_v36  ;;  %v864_v6 = vld [vmem:[#allocation2 + $0x1c] sm:$0x1]  ;;  %v2014_v13 = vshll.u32 %v1990_v57, 16  ;;  %v2009_v14 = vsel %vm5075_vm10, %v2004_v35, %v2008_v62  ;;  %v908_v16 = vrot.slane %v906_v0, 5  ;;  %v947_v15 = vld [vmem:[#allocation2 + $0x18] sm:$0xe] }
 0x105   : > { %v917_v17 = vor.u32 %v916_v63, %v913_v1  ;;  %v1195_v38 = vshll.u32 %v1166_v3, 16  ;;  %v920_v5 = vshll.u32 %v864_v6, 16  ;;  %vm936_vm1 = vcmask 519424   ;;  %v849_v54 = vld [vmem:[#allocation2] sm:$0xf] }
 0x106   : > { %1227 = vrot.lane.b32.xlu1 %v1184_v46, %s4934_s22  ;;  %v909_v18 = vsel %vm5075_vm10, %v904_v4, %v908_v16  ;;  %v1193_v19 = vrot.slane %v1192_v12, 4  ;;  %v2013_v22 = vrot.slane %v2011_v53, 4  ;;  %v2016_v25 = vrot.slane %v2014_v13, 5  ;;  %v948_v41 = vld [vmem:[#allocation2 + $0x1c] sm:$0x1] }
 0x107   : > { %v4187_v52 = vld [vmem:[#allocation4 + $0x20] sm:$0xf]  ;;  %1974 = vrot.lane.b32.xlu0 %v1965_v60, %s4933_s21  ;;  %v1991_v2 = vld [vmem:[#allocation2 + $0x3c] sm:$0x1]  ;;  %853 = vst.msk [vmem:[#allocation4] sm:$0xf] %vm278_vm7, %v849_v54 }
 0x108   : > { %v4188_v58 = vor.u32 %v4628_v26, %v4187_v52  ;;  %2106 = vst.msk [vmem:[#allocation4 + $0x20] sm:$0xf] %vm278_vm7, %v2095_v9  ;;  %v925_v26 = vpop.permute.xlu0 %924  ;;  %v918_v23 = vrot.slane %v917_v17, 4  ;;  %v1197_v27 = vrot.slane %v1195_v38, 5  ;;  %v922_v28 = vrot.slane %v920_v5, 5 }
 0x109   : > { %937 = vst.msk [vmem:[#allocation4] sm:$0xf] %vm936_vm1, %v925_v26  ;;  %v4156_v29 = vrot.slane %v947_v15, 9  ;;  %v1167_v45 = vld [vmem:[#allocation2 + $0x20] sm:$0xf]  ;;  %v974_v30 = vrot.slane %v948_v41, 5  ;;  %v2017_v31 = vor.u32 %v2016_v25, %v2013_v22 }
 0x10a   : > { %4262 = vmatmul.msk.bf16.gmra.mxu0 %vm1469_vm0, %v4188_v58  ;;  %v1198_v48 = vsel %vm5075_vm10, %v1193_v19, %v1197_v27  ;;  %v2020_v32 = vshll.u32 %v1991_v2, 16  ;;  %v923_v34 = vsel %vm5075_vm10, %v918_v23, %v922_v28  ;;  %v1200_v21 = vshrl.u32 %v1167_v45, 16  ;;  %v1096_v8 = vld [vmem:[#allocation2 + $0x20] sm:$0xe]  ;;  %v1097_v40 = vld [vmem:[#allocation2 + $0x24] sm:$0x1] }
 0x10b   : > { %v1203_v36 = vshll.u32 %v1167_v45, 16  ;;  %v315_v42 = vld [vmem:[#allocation2 + $0x48] sm:$0x1]  ;;  %v975_v39 = vsel %vm5145_vm15, %v4156_v29, %v974_v30  ;;  %v2018_v43 = vrot.slane %v2017_v31, 4  ;;  %v1094_v47 = vld [vmem:[#allocation2 + $0x18] sm:$0xe] }
 0x10c   : > { %1151 = vrot.lane.b32.xlu2 %v1141_v10, %s4933_s21  ;;  %v2022_v44 = vrot.slane %v2020_v32, 5  ;;  %v316_v46 = vsel %vm5034_vm3, 0, %v315_v42  ;;  %v1095_v50 = vld [vmem:[#allocation2 + $0x1c] sm:$0x1]  ;;  %v1168_v51 = vld [vmem:[#allocation2 + $0x24] sm:$0x1] }
 0x10d   : > { %317 = vst [vmem:[#allocation2 + $0x48] sm:$0x1] %v316_v46  ;;  %v4160_v20 = vrot.slane %v1096_v8, 9  ;;  %v1120_v52 = vrot.slane %v1097_v40, 5  ;;  %v1202_v9 = vrot.slane %v1200_v21, 4  ;;  %v1205_v55 = vrot.slane %v1203_v36, 5 }
 0x10e   : > { %2052 = vrot.lane.b32.xlu1 %v2009_v14, %s4934_s22  ;;  %v1771_v59 = vld [vmem:[#allocation2 + $0x20] sm:$0xe]  ;;  %v1772_v58 = vld [vmem:[#allocation2 + $0x24] sm:$0x1]  ;;  %v2023_v60 = vsel %vm5075_vm10, %v2018_v43, %v2022_v44  ;;  %v4159_v61 = vrot.slane %v1094_v47, 9  ;;  %v1116_v56 = vrot.slane %v1095_v50, 5 }
 0x10f   : > { %928 = vrot.lane.b32.xlu0 %v909_v18, %s4932_s20  ;;  %v1209_v33 = vshll.u32 %v1168_v51, 16  ;;  %v1691_v57 = vld [vmem:[#allocation2 + $0x20] sm:$0xf]  ;;  %v1121_v35 = vsel %vm5145_vm15, %v4160_v20, %v1120_v52  ;;  %v1206_v0 = vor.u32 %v1205_v55, %v1202_v9  ;;  %v4267_v1 = vrot.slane %v1771_v59, 9  ;;  %v1919_v62 = vld [vmem:[#allocation2 + $0x38] sm:$0xe]  ;;  %v977_v51 = vpop.permute.xlu1 %976 }
 0x110   : > { %v1789_v63 = vrot.slane %v1772_v58, 5  ;;  %v1920_v10 = vld [vmem:[#allocation2 + $0x3c] sm:$0x1]  ;;  %v1700_v3 = vshrl.u32 %v1691_v57, 16  ;;  %v1018_v4 = vld [vmem:[#allocation2 + $0x8] sm:$0xf]  ;;  %v1117_v6 = vsel %vm5145_vm15, %v4159_v61, %v1116_v56 }
 0x111   : > { %v1211_v12 = vrot.slane %v1209_v33, 5  ;;  %v1692_v53 = vld [vmem:[#allocation2 + $0x24] sm:$0x1]  ;;  %v1703_v13 = vshll.u32 %v1691_v57, 16  ;;  %v4273_v14 = vrot.slane %v1919_v62, 9  ;;  %v1941_v16 = vrot.slane %v1920_v10, 5 }
 0x112   : > { %v1019_v17 = vld [vmem:[#allocation2 + $0xc] sm:$0x1]  ;;  %v1020_v38 = vld [vmem:[#allocation2 + $0x10] sm:$0xf]  ;;  %v1207_v5 = vrot.slane %v1206_v0, 4  ;;  %v1790_v15 = vsel %vm5145_vm15, %v4267_v1, %v1789_v63  ;;  %v1027_v18 = vshrl.u32 %v1018_v4, 16 }
 0x113   : > { %v1030_v19 = vshll.u32 %v1018_v4, 16  ;;  %v1021_v22 = vld [vmem:[#allocation2 + $0x14] sm:$0x1]  ;;  %v1702_v25 = vrot.slane %v1700_v3, 4  ;;  %v1709_v54 = vshll.u32 %v1692_v53, 16  ;;  %v1041_v2 = vshrl.u32 %v1020_v38, 16 }
 0x114   : > { %1229 = vrot.lane.b32.xlu2 %v1198_v48, %s4934_s22  ;;  %v5531_v41 = vld [vmem:[#allocation2 + $0x40] sm:$0xe]  ;;  %v1044_v26 = vshll.u32 %v1020_v38, 16  ;;  %v1705_v23 = vrot.slane %v1703_v13, 5  ;;  %v1036_v27 = vshll.u32 %v1019_v17, 16  ;;  %v1029_v28 = vrot.slane %v1027_v18, 4 }
 0x115   : > { %v1032_v29 = vrot.slane %v1030_v19, 5  ;;  %v850_v45 = vld [vmem:[#allocation2 + $0x8] sm:$0xf]  ;;  %v1043_v48 = vrot.slane %v1041_v2, 4  ;;  %v1050_v31 = vshll.u32 %v1021_v22, 16  ;;  %v1212_v32 = vsel %vm5075_vm10, %v1207_v5, %v1211_v12 }
 0x116   : > { %930 = vrot.lane.b32.xlu1 %v923_v34, %s4932_s20  ;;  %v1046_v30 = vrot.slane %v1044_v26, 5  ;;  %854 = vst.msk [vmem:[#allocation4 + $0xc] sm:$0xf] %vm278_vm7, %v850_v45  ;;  %v1942_v34 = vsel %vm5145_vm15, %v4273_v14, %v1941_v16  ;;  %v5539_v21 = vld [vmem:[#allocation2 + $0x44] sm:$0x1]  ;;  %v1711_v40 = vrot.slane %v1709_v54, 5  ;;  %v1706_v43 = vor.u32 %v1705_v23, %v1702_v25 }
 0x117   : > { %982 = vrot.lane.b32.xlu0 %v975_v39, %s4933_s21  ;;  %v1697_v36 = vld [vmem:[#allocation2 + $0x38] sm:$0xf]  ;;  %v1033_v8 = vor.u32 %v1032_v29, %v1029_v28  ;;  %vm988_vm2 = vcmask 781824   ;;  %vm1013_vm6 = vcmask 1044224   ;;  %v1994_v42 = vld [vmem:[#allocation2 + $0x48] sm:$0xf] }
 0x118   : > { %v1047_v39 = vor.u32 %v1046_v30, %v1043_v48  ;;  %v4274_v44 = vrot.slane %v5531_v41, 9  ;;  %v1038_v47 = vrot.slane %v1036_v27, 5  ;;  %v851_v50 = vld [vmem:[#allocation2 + $0x10] sm:$0xf]  ;;  %v1945_v20 = vrot.slane %v5539_v21, 5 }
 0x119   : > { %v1034_v46 = vrot.slane %v1033_v8, 4  ;;  %v1742_v52 = vshrl.u32 %v1697_v36, 16  ;;  %v1052_v55 = vrot.slane %v1050_v31, 5  ;;  %855 = vst.msk [vmem:[#allocation4 + $0x18] sm:$0xf] %vm278_vm7, %v851_v50  ;;  %v2039_v58 = vshrl.u32 %v1994_v42, 16 }
 0x11a   : > { %v1048_v9 = vrot.slane %v1047_v39, 4  ;;  %v1820_v59 = vld [vmem:[#allocation2 + $0x30] sm:$0xf]  ;;  %989 = vst.msk [vmem:[#allocation4] sm:$0xf] %vm988_vm2, %v977_v51  ;;  %v1707_v1 = vrot.slane %v1706_v43, 4  ;;  %v1946_v30 = vsel %vm5145_vm15, %v4274_v44, %v1945_v20 }
 0x11b   : > { %v1039_v61 = vsel %vm5075_vm10, %v1034_v46, %v1038_v47  ;;  %v852_v56 = vld [vmem:[#allocation2 + $0x18] sm:$0xf]  ;;  %v1695_v33 = vld [vmem:[#allocation2 + $0x30] sm:$0xf]  ;;  %v1819_v0 = vld [vmem:[#allocation2 + $0x28] sm:$0xf] }
 0x11c   : > { %2054 = vrot.lane.b32.xlu2 %v2023_v60, %s4934_s22  ;;  %v2042_v60 = vshll.u32 %v1994_v42, 16  ;;  %1086 = vst.msk [vmem:[#allocation4 + $0x4] sm:$0xf] %vm278_vm7, %v1039_v61  ;;  %v1053_v57 = vsel %vm5075_vm10, %v1048_v9, %v1052_v55  ;;  %v1745_v63 = vshll.u32 %v1697_v36, 16  ;;  %v1025_v62 = vld [vmem:[#allocation2 + $0x24] sm:$0x1] }
 0x11d   : > { %1087 = vst.msk [vmem:[#allocation4 + $0x10] sm:$0xf] %vm278_vm7, %v1053_v57  ;;  %v1995_v3 = vld [vmem:[#allocation2 + $0x4c] sm:$0x1]  ;;  %v2041_v12 = vrot.slane %v2039_v58, 4  ;;  %v1728_v14 = vshrl.u32 %v1695_v33, 16 }
 0x11e   : > { %1128 = vrot.lane.b32.xlu1 %v1121_v35, %s4932_s20  ;;  %v1024_v35 = vld [vmem:[#allocation2 + $0x20] sm:$0xf]  ;;  %856 = vst.msk [vmem:[#allocation4 + $0x24] sm:$0xf] %vm278_vm7, %v852_v56  ;;  %v2044_v53 = vrot.slane %v2042_v60, 5  ;;  %v1078_v38 = vshll.u32 %v1025_v62, 16 }
 0x11f   : > { %1126 = vrot.lane.b32.xlu0 %v1117_v6, %s4932_s20  ;;  %v1069_v4 = vshrl.u32 %v1024_v35, 16  ;;  %v1072_v6 = vshll.u32 %v1024_v35, 16  ;;  %v1022_v13 = vld [vmem:[#allocation2 + $0x18] sm:$0xf]  ;;  %v1023_v5 = vld [vmem:[#allocation2 + $0x1c] sm:$0x1] }
 0x120   : > { %v1731_v18 = vshll.u32 %v1695_v33, 16  ;;  %v1055_v19 = vshrl.u32 %v1022_v13, 16  ;;  %v1058_v22 = vshll.u32 %v1022_v13, 16  ;;  %v1698_v25 = vld [vmem:[#allocation2 + $0x3c] sm:$0x1]  ;;  %v1744_v54 = vrot.slane %v1742_v52, 4 }
 0x121   : > { %v1071_v16 = vrot.slane %v1069_v4, 4  ;;  %v1074_v17 = vrot.slane %v1072_v6, 5  ;;  %v1747_v41 = vrot.slane %v1745_v63, 5  ;;  %v2048_v2 = vshll.u32 %v1995_v3, 16  ;;  %v1992_v27 = vld [vmem:[#allocation2 + $0x40] sm:$0xf] }
 0x122   : > { %v2045_v23 = vor.u32 %v2044_v53, %v2041_v12  ;;  %v1057_v28 = vrot.slane %v1055_v19, 4  ;;  %v1060_v29 = vrot.slane %v1058_v22, 5  ;;  %v1064_v45 = vshll.u32 %v1023_v5, 16  ;;  %v1683_v48 = vld [vmem:[#allocation2 + $0x20] sm:$0xf]  ;;  %v4636_v56 = vld [vmem:[%s6393_s3 + $0x38] sm:$0xff] }
 0x123   : > { %v1075_v26 = vor.u32 %v1074_v17, %v1071_v16  ;;  %v1966_v31 = vld [vmem:[#allocation2 + $0x40] sm:$0xf]  ;;  %v1751_v21 = vshll.u32 %v1698_v25, 16  ;;  %v1696_v36 = vld [vmem:[#allocation2 + $0x34] sm:$0x1]  ;;  %v1730_v8 = vrot.slane %v1728_v14, 4  ;;  %v1748_v46 = vor.u32 %v1747_v41, %v1744_v54  ;;  %1476 = vmatpush.bf16.msra.mxu2 %v4636_v56 }
 0x124   : > { %1803 = vrot.lane.b32.xlu2 %v1790_v15, %s4933_s21  ;;  %v1712_v15 = vsel %vm5075_vm10, %v1707_v1, %v1711_v40  ;;  %v1733_v40 = vrot.slane %v1731_v18, 5  ;;  %v1061_v42 = vor.u32 %v1060_v29, %v1057_v28  ;;  %v1967_v43 = vld [vmem:[#allocation2 + $0x48] sm:$0xf]  ;;  %v2025_v50 = vshrl.u32 %v1992_v27, 16  ;;  %v4635_v1 = vld [vmem:[%s6393_s3 + $0x30] sm:$0xff]  ;;  %v4644_v19 = vld [vmem:[%s6393_s3 + $0x78] sm:$0xff] }
 0x125   : > { %v2028_v51 = vshll.u32 %v1992_v27, 16  ;;  %v2046_v20 = vrot.slane %v2045_v23, 4  ;;  %v2050_v52 = vrot.slane %v2048_v2, 5  ;;  %v1066_v55 = vrot.slane %v1064_v45, 5  ;;  %v1775_v3 = vld [vmem:[#allocation2 + $0x30] sm:$0xe]  ;;  %1495 = vmatpush.bf16.msra.mxu3 %v4644_v19 }
 0x126   : > { %1231 = vrot.lane.b32.xlu1 %v1212_v32, %s4934_s22  ;;  %v1076_v32 = vrot.slane %v1075_v26, 4  ;;  %v1062_v9 = vrot.slane %v1061_v42, 4  ;;  %v1753_v60 = vrot.slane %v1751_v21, 5  ;;  %v1737_v61 = vshll.u32 %v1696_v36, 16  ;;  %v1776_v4 = vld [vmem:[#allocation2 + $0x34] sm:$0x1] }
 0x127   : > { %1951 = vrot.lane.b32.xlu0 %v1942_v34, %s4932_s20  ;;  %v1080_v34 = vrot.slane %v1078_v38, 5  ;;  %v1749_v33 = vrot.slane %v1748_v46, 4  ;;  %v2051_v57 = vsel %vm5075_vm10, %v2046_v20, %v2050_v52  ;;  %v2027_v35 = vrot.slane %v2025_v50, 4  ;;  %1477 = vmatpush.bf16.msra.mxu2 %v4635_v1  ;;  %v1777_v38 = vld [vmem:[#allocation2 + $0x38] sm:$0xe]  ;;  %v4634_v18 = vld [vmem:[%s6393_s3 + $0x28] sm:$0xff] }
 0x128   : > { %v1067_v58 = vsel %vm5075_vm10, %v1062_v9, %v1066_v55  ;;  %v1739_v12 = vrot.slane %v1737_v61, 5  ;;  %v4269_v16 = vrot.slane %v1775_v3, 9  ;;  %v1797_v17 = vrot.slane %v1776_v4, 5  ;;  %v1778_v5 = vld [vmem:[#allocation2 + $0x3c] sm:$0x1]  ;;  %v4633_v2 = vld [vmem:[%s6393_s3 + $0x20] sm:$0xff] }
 0x129   : > { %v1081_v44 = vsel %vm5075_vm10, %v1076_v32, %v1080_v34  ;;  %1088 = vst.msk [vmem:[#allocation4 + $0x1c] sm:$0xf] %vm278_vm7, %v1067_v58  ;;  %v1754_v6 = vsel %vm5075_vm10, %v1749_v33, %v1753_v60  ;;  %v4270_v54 = vrot.slane %v1777_v38, 9  ;;  %v1801_v41 = vrot.slane %v1778_v5, 5  ;;  %v4643_v26 = vld [vmem:[%s6393_s3 + $0x70] sm:$0xff]  ;;  %v4632_v45 = vld [vmem:[%s6393_s3 + $0x18] sm:$0xff] }
 0x12a   : > { %1089 = vst.msk [vmem:[#allocation4 + $0x28] sm:$0xf] %vm278_vm7, %v1081_v44  ;;  %v1798_v25 = vsel %vm5145_vm15, %v4269_v16, %v1797_v17  ;;  %1496 = vmatpush.bf16.msra.mxu3 %v4643_v26  ;;  %v4641_v42 = vld [vmem:[%s6393_s3 + $0x60] sm:$0xff]  ;;  %v4630_v46 = vld [vmem:[%s6393_s3 + $0x8] sm:$0xff]  ;;  %v4640_v50 = vld [vmem:[%s6393_s3 + $0x58] sm:$0xff] }
 0x12b   : > { %1478 = vmatpush.bf16.msra.mxu2 %v4634_v18  ;;  %v1802_v29 = vsel %vm5145_vm15, %v4270_v54, %v1801_v41  ;;  %v4639_v44 = vld [vmem:[%s6393_s3 + $0x50] sm:$0xff]  ;;  %v4638_v55 = vld [vmem:[%s6393_s3 + $0x48] sm:$0xff]  ;;  %v4668_v1 = vld [vmem:[%s6393_s3 + $0x78] sm:$0xff] }
 0x12c   : > { %1829 = vrot.lane.b32.xlu2 %v1820_v59, %s4934_s22  ;;  %v1734_v59 = vor.u32 %v1733_v40, %v1730_v8  ;;  %v4631_v40 = vld [vmem:[%s6393_s3 + $0x10] sm:$0xff]  ;;  %v1844_v19 = vld [vmem:[#allocation2 + $0x2c] sm:$0x1]  ;;  %v4660_v26 = vld [vmem:[%s6393_s3 + $0x38] sm:$0xff] }
 0x12d   : > { %v1002_v10 = vpop.permute.xlu2 %1001  ;;  %v1845_v61 = vld [vmem:[#allocation2 + $0x30] sm:$0xf]  ;;  %v1861_v41 = vshll.u32 %v1844_v19, 16  ;;  %2300 = vmatpush.bf16.msrb.mxu1 %v4660_v26 }
 0x12e   : > { %1014 = vst.msk [vmem:[#allocation4] sm:$0xf] %vm1013_vm6, %v1002_v10  ;;  %1827 = vrot.lane.b32.xlu1 %v1819_v0, %s4934_s22  ;;  %v2030_v0 = vrot.slane %v2028_v51, 5  ;;  %v1735_v63 = vrot.slane %v1734_v59, 4  ;;  %v1993_v10 = vld [vmem:[#allocation2 + $0x44] sm:$0x1] }
 0x12f   : > { %1755 = vrot.lane.b32.xlu0 %v1712_v15, %s4932_s20  ;;  %v2034_v14 = vshll.u32 %v1993_v10, 16  ;;  %1479 = vmatpush.bf16.msra.mxu2 %v4633_v2  ;;  %v4629_v51 = vld [vmem:[%s6393_s3] sm:$0xff]  ;;  %v1866_v33 = vshrl.u32 %v1845_v61, 16 }
 0x130   : > { %v2031_v53 = vor.u32 %v2030_v0, %v2027_v35  ;;  %v1740_v13 = vsel %vm5075_vm10, %v1735_v63, %v1739_v12  ;;  %v4637_v59 = vld [vmem:[%s6393_s3 + $0x40] sm:$0xff]  ;;  %v1843_v35 = vld [vmem:[#allocation2 + $0x28] sm:$0xf] }
 0x131   : > { %v2036_v22 = vrot.slane %v2034_v14, 5  ;;  %v1868_v63 = vrot.slane %v1866_v33, 4  ;;  %v1852_v3 = vshrl.u32 %v1843_v35, 16  ;;  %v1855_v4 = vshll.u32 %v1843_v35, 16  ;;  %v4661_v33 = vld [vmem:[%s6393_s3 + $0x40] sm:$0xff] }
 0x132   : > { %v2032_v15 = vrot.slane %v2031_v53, 4  ;;  %v1684_v53 = vld [vmem:[#allocation2 + $0x28] sm:$0xf]  ;;  %v4669_v35 = vld [vmem:[%s6393_s3 + $0x80] sm:$0xff] }
 0x133   : > { %1480 = vmatpush.bf16.msra.mxu2 %v4632_v45  ;;  %v1854_v16 = vrot.slane %v1852_v3, 4  ;;  %v1857_v17 = vrot.slane %v1855_v4, 5 }
 0x134   : > { %1976 = vrot.lane.b32.xlu2 %v1966_v31, %s4933_s21  ;;  %v2037_v27 = vsel %vm5075_vm10, %v2032_v15, %v2036_v22  ;;  %v1821_v31 = vld [vmem:[#allocation2 + $0x38] sm:$0xf] }
 0x135   : > { %v5562_v39 = vld [vmem:[#allocation4] sm:$0xf]  ;;  %v5565_v47 = vpop.permute.xlu2 %1003  ;;  %v1858_v22 = vor.u32 %v1857_v17, %v1854_v16 }
 0x136   : > { %1687 = vst.msk [vmem:[#allocation4] sm:$0xf] %vm278_vm7, %v1683_v48  ;;  %1953 = vrot.lane.b32.xlu1 %v1946_v30, %s4932_s20  ;;  %v4642_v48 = vld [vmem:[%s6393_s3 + $0x68] sm:$0xff]  ;;  %v1822_v30 = vld [vmem:[#allocation2 + $0x40] sm:$0xf] }
 0x137   : > { %1978 = vrot.lane.b32.xlu0 %v1967_v43, %s4933_s21  ;;  %1497 = vmatpush.bf16.msra.mxu3 %v4642_v48  ;;  %v1859_v45 = vrot.slane %v1858_v22, 4  ;;  %v4665_v48 = vld [vmem:[%s6393_s3 + $0x60] sm:$0xff] }
 0x138   : > { %1481 = vmatpush.bf16.msra.mxu2 %v4631_v40 }
 0x13b   : > { %1498 = vmatpush.bf16.msra.mxu3 %v4641_v42 }
 0x13c   : > { %2058 = vrot.lane.b32.xlu2 %v2051_v57, %s4934_s22  ;;  %1482 = vmatpush.bf16.msra.mxu2 %v4630_v46  ;;  %v1869_v57 = vshll.u32 %v1845_v61, 16  ;;  %v4664_v46 = vld [vmem:[%s6393_s3 + $0x58] sm:$0xff] }
 0x13d   : > { %v1148_v62 = vpop.permute.xlu2 %1147 }
 0x13e   : > { %1761 = vrot.lane.b32.xlu1 %v1754_v6, %s4932_s20  ;;  %v1846_v6 = vld [vmem:[#allocation2 + $0x34] sm:$0x1] }
 0x13f   : > { %1759 = vrot.lane.b32.xlu0 %v1740_v13, %s4932_s20  ;;  %1499 = vmatpush.bf16.msra.mxu3 %v4640_v50  ;;  %v1875_v38 = vshll.u32 %v1846_v6, 16  ;;  %v4658_v50 = vld [vmem:[%s6393_s3 + $0x28] sm:$0xff] }
 0x140   : > { %1483 = vmatpush.bf16.msra.mxu2 %v4629_v51  ;;  %v4654_v6 = vld [vmem:[%s6393_s3 + $0x8] sm:$0xff] }
 0x141   : > { %v1877_v54 = vrot.slane %v1875_v38, 5 }
 0x143   : > { %1500 = vmatpush.bf16.msra.mxu3 %v4639_v44  ;;  %v4663_v44 = vld [vmem:[%s6393_s3 + $0x50] sm:$0xff] }
 0x144   : > { %1807 = vrot.lane.b32.xlu2 %v1798_v25, %s4933_s21  ;;  %2319 = vmatpush.bf16.msrb.mxu2 %v4668_v1 }
 0x145   : > { %v5606_v23 = vpop.permute.xlu2 %1972 }
 0x146   : > { %2056 = vrot.lane.b32.xlu1 %v2037_v27, %s4934_s22 }
 0x147   : > { %v5611_v28 = vpop.permute.xlu0 %1153  ;;  %1809 = vrot.lane.b32.xlu0 %v1802_v29, %s4933_s21  ;;  %1501 = vmatpush.bf16.msra.mxu3 %v4638_v55 }
 0x14b   : > { %v979_v32 = vpop.permute.xlu1 %978  ;;  %1502 = vmatpush.bf16.msra.mxu3 %v4637_v59  ;;  %v4662_v59 = vld [vmem:[%s6393_s3 + $0x48] sm:$0xff] }
 0x14c   : > { %1833 = vrot.lane.b32.xlu2 %v1822_v30, %s4934_s22  ;;  %v4659_v30 = vld [vmem:[%s6393_s3 + $0x30] sm:$0xff] }
 0x14d   : > { %2301 = vmatpush.bf16.msrb.mxu1 %v4659_v30 }
 0x14e   : > { %1831 = vrot.lane.b32.xlu1 %v1821_v31, %s4934_s22  ;;  %v5624_v21 = vpop.permute.xlu2 %1233  ;;  %v1863_v31 = vrot.slane %v1861_v41, 5 }
 0x14f   : > { %v1123_v34 = vpop.permute.xlu0 %1122 }
 0x150   : > { %1134 = vst.msk [vmem:[#allocation4 + $0x4] sm:$0xf] %vm936_vm1, %v1123_v34  ;;  %v1864_v34 = vsel %vm5075_vm10, %v1859_v45, %v1863_v31 }
 0x151   : > { %1159 = vst.msk [vmem:[#allocation4 + $0x4] sm:$0xf] %vm988_vm2, %v1148_v62  ;;  %v1871_v62 = vrot.slane %v1869_v57, 5  ;;  %2302 = vmatpush.bf16.msrb.mxu1 %v4658_v50  ;;  %v4655_v57 = vld [vmem:[%s6393_s3 + $0x10] sm:$0xff] }
 0x153   : > { %v1872_v13 = vor.u32 %v1871_v62, %v1868_v63 }
 0x155   : > { %v1873_v18 = vrot.slane %v1872_v13, 4 }
 0x156   : > { %v5630_v8 = vpop.permute.xlu2 %980 }
 0x157   : > { %v5628_v36 = vpop.permute.xlu0 %1947  ;;  %v1878_v27 = vsel %vm5075_vm10, %v1873_v18, %v1877_v54 }
 0x158   : > { %v1758_v43 = vpop.permute.xlu1 %1757 }
 0x15e   : > { %v5650_v20 = vpop.permute.xlu2 %1007 }
 0x15f   : > { %v1806_v9 = vpop.permute.xlu0 %1805 }
 0x160   : > { %v1125_v52 = vpop.permute.xlu1 %1124 }
 0x161   : > { %1135 = vst.msk [vmem:[#allocation4 + $0x10] sm:$0xf] %vm936_vm1, %v1125_v52  ;;  %v4657_v52 = vld [vmem:[%s6393_s3 + $0x20] sm:$0xff] }
 0x162   : > { %2303 = vmatpush.bf16.msrb.mxu1 %v4657_v52  ;;  %v4649_v52 = vld [vmem:[#allocation4 + $0x10] sm:$0xf0] }
 0x166   : > { %v5659_v58 = vpop.permute.xlu2 %1151 }
 0x168   : > { %v1950_v60 = vpop.permute.xlu1 %1949 }
 0x169   : > { %v927_v56 = vpop.permute.xlu0 %926 }
 0x16a   : > { %938 = vst.msk [vmem:[#allocation4 + $0xc] sm:$0xf] %vm936_vm1, %v927_v56 }
 0x16b   : > { %990 = vst.msk [vmem:[#allocation4 + $0xc] sm:$0xf] %vm988_vm2, %v979_v32 }
 0x16c   : > { %1015 = vst.msk [vmem:[#allocation4 + $0xc] sm:$0xf] %vm1013_vm6, %v5565_v47  ;;  %v4667_v47 = vld [vmem:[%s6393_s3 + $0x70] sm:$0xff] }
 0x16d   : > { %2320 = vmatpush.bf16.msrb.mxu2 %v4667_v47 }
 0x16e   : > { %v1230_v0 = vpop.permute.xlu2 %1229 }
 0x170   : > { %v5668_v10 = vpop.permute.xlu1 %1005 }
 0x171   : > { %v1150_v12 = vpop.permute.xlu0 %1149 }
 0x172   : > { %1160 = vst.msk [vmem:[#allocation4 + $0x10] sm:$0xf] %vm988_vm2, %v1150_v12  ;;  %v1850_v12 = vld [vmem:[#allocation2 + $0x44] sm:$0x1] }
 0x173   : > { %v4624_v14 = vld [vmem:[#allocation4 + $0x8] sm:$0xf0]  ;;  %1240 = vst.msk [vmem:[#allocation4 + $0x10] sm:$0xf] %vm1013_vm6, %v1230_v0  ;;  %v1847_v0 = vld [vmem:[#allocation2 + $0x38] sm:$0xf] }
 0x174   : > { %1688 = vst.msk [vmem:[#allocation4 + $0xc] sm:$0xf] %vm278_vm7, %v1684_v53  ;;  %v4168_v5 = vor.u32 %v4624_v14, %v5562_v39  ;;  %v4666_v39 = vld [vmem:[%s6393_s3 + $0x68] sm:$0xff]  ;;  %v1880_v3 = vshrl.u32 %v1847_v0, 16  ;;  %v1883_v4 = vshll.u32 %v1847_v0, 16  ;;  %v1903_v38 = vshll.u32 %v1850_v12, 16 }
 0x175   : > { %1768 = vst.msk [vmem:[#allocation4 + $0xc] sm:$0xf] %vm936_vm1, %v1758_v43  ;;  %2321 = vmatpush.bf16.msrb.mxu2 %v4666_v39  ;;  %v5796_v12 = vld [vmem:[%s6394_s4] ss:$0 sm:$0xff] }
 0x176   : > { %v2055_v15 = vpop.permute.xlu2 %2054  ;;  %1816 = vst.msk [vmem:[#allocation4 + $0xc] sm:$0xf] %vm988_vm2, %v1806_v9  ;;  %1484 = vmatmul.bf16.vlgmr.msra.gmra.mxu2 %v4168_v5  ;;  %v1849_v9 = vld [vmem:[#allocation2 + $0x40] sm:$0xf]  ;;  %v1882_v14 = vrot.slane %v1880_v3, 4  ;;  %v1885_v16 = vrot.slane %v1883_v4, 5 }
 0x177   : > { %v1894_v61 = vshrl.u32 %v1849_v9, 16  ;;  %v1897_v56 = vshll.u32 %v1849_v9, 16  ;;  %v4653_v5 = vld [vmem:[%s6393_s3] sm:$0xff]  ;;  %v388_v3 = vld [vmem:[#allocation3 + $0xc] sm:$0x1] }
 0x178   : > { %v1228_v25 = vpop.permute.xlu1 %1227 }
 0x179   : > { %1239 = vst.msk [vmem:[#allocation4 + $0x4] sm:$0xf] %vm1013_vm6, %v1228_v25  ;;  %v1975_v2 = vpop.permute.xlu0 %1974  ;;  %2322 = vmatpush.bf16.msrb.mxu2 %v4665_v48  ;;  %v1896_v63 = vrot.slane %v1894_v61, 4  ;;  %v1899_v62 = vrot.slane %v1897_v56, 5  ;;  %v1905_v25 = vrot.slane %v1903_v38, 5 }
 0x17a   : > { %v4169_v29 = vld [vmem:[#allocation4 + $0xc] sm:$0xf0]  ;;  %v4301_v56 = vld [vmem:[#allocation4 + $0x20] sm:$0xf] }
 0x17b   : > { %1912 = vst.msk [vmem:[#allocation4 + $0x10] sm:$0xf] %vm278_vm7, %v1878_v27  ;;  %v1900_v13 = vor.u32 %v1899_v62, %v1896_v63 }
 0x17c   : > { %1960 = vst.msk [vmem:[#allocation4 + $0x10] sm:$0xf] %vm936_vm1, %v1950_v60  ;;  %v4656_v60 = vld [vmem:[%s6393_s3 + $0x18] sm:$0xff] }
 0x17d   : > { %1985 = vst.msk [vmem:[#allocation4 + $0x10] sm:$0xf] %vm988_vm2, %v1975_v2  ;;  %2323 = vmatpush.bf16.msrb.mxu2 %v4664_v46  ;;  %2304 = vmatpush.bf16.msrb.mxu1 %v4656_v60  ;;  %v1901_v18 = vrot.slane %v1900_v13, 4 }
 0x17e   : > { %v5697_v32 = vpop.permute.xlu2 %1803  ;;  %2065 = vst.msk [vmem:[#allocation4 + $0x10] sm:$0xf] %vm1013_vm6, %v2055_v15  ;;  %v1686_v15 = vld [vmem:[#allocation2 + $0x38] sm:$0xf] }
 0x17f   : > { %v1906_v2 = vsel %vm5075_vm10, %v1901_v18, %v1905_v25  ;;  %v361_v18 = vld [vmem:[#allocation3 + $0x10] sm:$0x1] }
 0x180   : > { %v4623_v40 = vld [vmem:[#allocation4 + $0x4] sm:$0xf]  ;;  %v2053_v42 = vpop.permute.xlu1 %2052  ;;  %v362_v25 = vsel %vm5034_vm3, 0, %v361_v18  ;;  %v397_v18 = vld [vmem:[#allocation3 + $0x24] sm:$0x1] }
 0x181   : > { %1911 = vst.msk [vmem:[#allocation4 + $0x4] sm:$0xf] %vm278_vm7, %v1864_v34  ;;  %v4172_v43 = vor.u32 %v4623_v40, %v4169_v29  ;;  %v929_v51 = vpop.permute.xlu0 %928  ;;  %2324 = vmatpush.bf16.msrb.mxu2 %v4663_v44  ;;  %2305 = vmatpush.bf16.msrb.mxu1 %v4655_v57 }
 0x182   : > { %1959 = vst.msk [vmem:[#allocation4 + $0x4] sm:$0xf] %vm936_vm1, %v5628_v36  ;;  %v4670_v36 = vld [vmem:[%s6393_s3 + $0x88] sm:$0xff] }
 0x183   : > { %1984 = vst.msk [vmem:[#allocation4 + $0x4] sm:$0xf] %vm988_vm2, %v5606_v23  ;;  %1503 = vmatmul.bf16.vlgmr.msra.gmra.mxu3 %v4172_v43 }
 0x184   : > { %2064 = vst.msk [vmem:[#allocation4 + $0x4] sm:$0xf] %vm1013_vm6, %v2053_v42  ;;  %2344 = vmatpush.bf16.msrb.mxu3 %v4670_v36 }
 0x185   : > { %939 = vst.msk [vmem:[#allocation4 + $0x18] sm:$0xf] %vm936_vm1, %v929_v51  ;;  %2325 = vmatpush.bf16.msrb.mxu2 %v4662_v59  ;;  %2306 = vmatpush.bf16.msrb.mxu1 %v4654_v6  ;;  %v4283_v34 = vld [vmem:[#allocation4 + $0xc] sm:$0xf0]  ;;  %v389_v6 = vsel %vm5045_vm5, 0, %v388_v3 }
 0x186   : > { %991 = vst.msk [vmem:[#allocation4 + $0x18] sm:$0xf] %vm988_vm2, %v5630_v8  ;;  %v1830_v23 = vpop.permute.xlu2 %1829 }
 0x187   : > { %1016 = vst.msk [vmem:[#allocation4 + $0x18] sm:$0xf] %vm1013_vm6, %v5668_v10 }
 0x188   : > { %v931_v55 = vpop.permute.xlu1 %930  ;;  %1840 = vst.msk [vmem:[#allocation4 + $0xc] sm:$0xf] %vm1013_vm6, %v1830_v23  ;;  %2345 = vmatpush.bf16.msrb.mxu3 %v4669_v35  ;;  %v4289_v23 = vld [vmem:[#allocation4 + $0x8] sm:$0xf] }
 0x189   : > { %940 = vst.msk [vmem:[#allocation4 + $0x24] sm:$0xf] %vm936_vm1, %v931_v55  ;;  %v983_v8 = vpop.permute.xlu0 %982  ;;  %2326 = vmatpush.bf16.msrb.mxu2 %v4661_v33  ;;  %2307 = vmatpush.bf16.msrb.mxu1 %v4653_v5  ;;  %v4290_v9 = vor.u32 %v4649_v52, %v4289_v23  ;;  %v4652_v33 = vld [vmem:[#allocation4 + $0x28] sm:$0xf0] }
 0x18a   : > { %992 = vst.msk [vmem:[#allocation4 + $0x24] sm:$0xf] %vm988_vm2, %v983_v8 }
 0x18b   : > { %1017 = vst.msk [vmem:[#allocation4 + $0x24] sm:$0xf] %vm1013_vm6, %v5650_v20  ;;  %v1685_v20 = vld [vmem:[#allocation2 + $0x30] sm:$0xf]  ;;  %v4647_v30 = vld [vmem:[#allocation4 + $0x4] sm:$0xf] }
 0x18c   : > { %v4286_v40 = vor.u32 %v4647_v30, %v4283_v34  ;;  %390 = vst [vmem:[#allocation3 + $0xc] sm:$0x1] %v389_v6  ;;  %v364_v34 = vld [vmem:[#allocation3 + $0x18] sm:$0x1] }
 0x18d   : > { %363 = vst [vmem:[#allocation3 + $0x10] sm:$0x1] %v362_v25 }
 0x18e   : > { %v4179_v1 = vld [vmem:[#allocation4 + $0x18] sm:$0xf]  ;;  %v1977_v26 = vpop.permute.xlu2 %1976 }
 0x18f   : > { %1689 = vst.msk [vmem:[#allocation4 + $0x18] sm:$0xf] %vm278_vm7, %v1685_v20  ;;  %v4648_v51 = vld [vmem:[#allocation4 + $0x8] sm:$0xf0] }
 0x190   : > { %v1129_v10 = vpop.permute.xlu1 %1128 }
 0x191   : > { %1137 = vst.msk [vmem:[#allocation4 + $0x28] sm:$0xf] %vm936_vm1, %v1129_v10  ;;  %v1127_v53 = vpop.permute.xlu0 %1126  ;;  %v358_v10 = vld [vmem:[#allocation3 + $0x8] sm:$0x1] }
 0x192   : > { %1162 = vst.msk [vmem:[#allocation4 + $0x28] sm:$0xf] %vm988_vm2, %v5611_v28  ;;  %v4627_v47 = vld [vmem:[#allocation4 + $0x20] sm:$0xf0]  ;;  %v1848_v28 = vld [vmem:[#allocation2 + $0x3c] sm:$0x1] }
 0x193   : > { %1242 = vst.msk [vmem:[#allocation4 + $0x28] sm:$0xf] %vm1013_vm6, %v5624_v21  ;;  %v4180_v17 = vor.u32 %v4627_v47, %v4179_v1  ;;  %v1886_v21 = vor.u32 %v1885_v16, %v1882_v14  ;;  %v1889_v19 = vshll.u32 %v1848_v28, 16  ;;  %v4302_v1 = vor.u32 %v4652_v33, %v4301_v56  ;;  %v1523_v16 = vpop.f32.mrf.mxu0 }
 0x194   : > { %1136 = vst.msk [vmem:[#allocation4 + $0x1c] sm:$0xf] %vm936_vm1, %v1127_v53  ;;  %v359_v4 = vsel %vm5034_vm3, 0, %v358_v10 }
 0x195   : > { %1161 = vst.msk [vmem:[#allocation4 + $0x1c] sm:$0xf] %vm988_vm2, %v5659_v58  ;;  %1489 = vmatmul.bf16.gmra.mxu2 %v4180_v17  ;;  %v1887_v58 = vrot.slane %v1886_v21, 4  ;;  %v1891_v39 = vrot.slane %v1889_v19, 5  ;;  %v391_v21 = vld [vmem:[#allocation3 + $0x14] sm:$0x1] }
 0x196   : > { %1690 = vst.msk [vmem:[#allocation4 + $0x24] sm:$0xf] %vm278_vm7, %v1686_v15  ;;  %v2059_v42 = vpop.permute.xlu2 %2058 }
 0x197   : > { %v1892_v27 = vsel %vm5075_vm10, %v1887_v58, %v1891_v39  ;;  %360 = vst [vmem:[#allocation3 + $0x8] sm:$0x1] %v359_v4 }
 0x198   : > { %v1232_v22 = vpop.permute.xlu1 %1231 }
 0x199   : > { %1241 = vst.msk [vmem:[#allocation4 + $0x1c] sm:$0xf] %vm1013_vm6, %v1232_v22  ;;  %v1952_v41 = vpop.permute.xlu0 %1951 }
 0x19a   : > { %v4181_v54 = vld [vmem:[#allocation4 + $0x24] sm:$0xf0] }
 0x19b   : > { %1914 = vst.msk [vmem:[#allocation4 + $0x28] sm:$0xf] %vm278_vm7, %v1906_v2  ;;  %v1525_v2 = vpop.f32.mrf.mxu0 }
 0x1a0   : > { %v4626_v29 = vld [vmem:[#allocation4 + $0x1c] sm:$0xf]  ;;  %v1828_v45 = vpop.permute.xlu1 %1827 }
 0x1a1   : > { %1913 = vst.msk [vmem:[#allocation4 + $0x1c] sm:$0xf] %vm278_vm7, %v1892_v27  ;;  %v4184_v48 = vor.u32 %v4626_v29, %v4181_v54  ;;  %v1756_v31 = vpop.permute.xlu0 %1755  ;;  %v392_v54 = vsel %vm5045_vm5, 0, %v391_v21 }
 0x1a2   : > { %1961 = vst.msk [vmem:[#allocation4 + $0x1c] sm:$0xf] %vm936_vm1, %v1952_v41 }
 0x1a3   : > { %1986 = vst.msk [vmem:[#allocation4 + $0x1c] sm:$0xf] %vm988_vm2, %v1977_v26  ;;  %1508 = vmatmul.bf16.gmra.mxu3 %v4184_v48 }
 0x1a4   : > { %1767 = vst.msk [vmem:[#allocation4] sm:$0xf] %vm936_vm1, %v1756_v31 }
 0x1a5   : > { %1815 = vst.msk [vmem:[#allocation4] sm:$0xf] %vm988_vm2, %v5697_v32  ;;  %2327 = vmatmul.bf16.vlgmr.msrb.gmra.mxu2 %v4286_v40  ;;  %v1808_v32 = vpop.permute.xlu2 %1807  ;;  %v394_v40 = vld [vmem:[#allocation3 + $0x1c] sm:$0x1] }
 0x1a6   : > { %1839 = vst.msk [vmem:[#allocation4] sm:$0xf] %vm1013_vm6, %v1828_v45 }
 0x1a7   : > { %393 = vst [vmem:[#allocation3 + $0x14] sm:$0x1] %v392_v54  ;;  %v398_v54 = vsel %vm5045_vm5, 0, %v397_v18 }
 0x1a8   : > { %v1954_v43 = vpop.permute.xlu1 %1953  ;;  %399 = vst [vmem:[#allocation3 + $0x24] sm:$0x1] %v398_v54 }
 0x1a9   : > { %1962 = vst.msk [vmem:[#allocation4 + $0x28] sm:$0xf] %vm936_vm1, %v1954_v43  ;;  %v1979_v46 = vpop.permute.xlu0 %1978 }
 0x1aa   : > { %1987 = vst.msk [vmem:[#allocation4 + $0x28] sm:$0xf] %vm988_vm2, %v1979_v46  ;;  %v365_v46 = vsel %vm5034_vm3, 0, %v364_v34 }
 0x1ab   : > { %2067 = vst.msk [vmem:[#allocation4 + $0x28] sm:$0xf] %vm1013_vm6, %v2059_v42 }
 0x1ac   : > { %366 = vst [vmem:[#allocation3 + $0x18] sm:$0x1] %v365_v46 }
 0x1ad   : > { %v4281_v50 = vld [vmem:[#allocation4] sm:$0xf]  ;;  %v1834_v8 = vpop.permute.xlu2 %1833 }
 0x1ae   : > { %v4282_v44 = vor.u32 %v4648_v51, %v4281_v50  ;;  %v395_v50 = vsel %vm5045_vm5, 0, %v394_v40 }
 0x1af   : > { %396 = vst [vmem:[#allocation3 + $0x1c] sm:$0x1] %v395_v50 }
 0x1b0   : > { %v1762_v36 = vpop.permute.xlu1 %1761  ;;  %2308 = vmatmul.bf16.vlgmr.msrb.gmra.mxu1 %v4282_v44 }
 0x1b1   : > { %1770 = vst.msk [vmem:[#allocation4 + $0x24] sm:$0xf] %vm936_vm1, %v1762_v36  ;;  %v1760_v55 = vpop.permute.xlu0 %1759 }
 0x1b2   : > { %1769 = vst.msk [vmem:[#allocation4 + $0x18] sm:$0xf] %vm936_vm1, %v1760_v55  ;;  %v4295_v61 = vld [vmem:[#allocation4 + $0x24] sm:$0xf0] }
 0x1b3   : > { %4375 = vmatmul.msk.bf16.vlgmr.msrb.gmra.mxu3 %vm1469_vm0, %v4290_v9  ;;  %1817 = vst.msk [vmem:[#allocation4 + $0x18] sm:$0xf] %vm988_vm2, %v1808_v32 }
 0x1b8   : > { %v2057_v59 = vpop.permute.xlu1 %2056 }
 0x1b9   : > { %2066 = vst.msk [vmem:[#allocation4 + $0x1c] sm:$0xf] %vm1013_vm6, %v2057_v59  ;;  %v1810_v60 = vpop.permute.xlu0 %1809  ;;  %v1528_v59 = vpop.f32.mrf.mxu0 }
 0x1ba   : > { %1818 = vst.msk [vmem:[#allocation4 + $0x24] sm:$0xf] %vm988_vm2, %v1810_v60 }
 0x1bb   : > { %1842 = vst.msk [vmem:[#allocation4 + $0x24] sm:$0xf] %vm1013_vm6, %v1834_v8 }
 0x1c0   : > { %v1832_v57 = vpop.permute.xlu1 %1831  ;;  %v4650_v35 = vld [vmem:[#allocation4 + $0x1c] sm:$0xf] }
 0x1c1   : > { %1841 = vst.msk [vmem:[#allocation4 + $0x18] sm:$0xf] %vm1013_vm6, %v1832_v57  ;;  %v4298_v0 = vor.u32 %v4650_v35, %v4295_v61 }
 0x1c2   : > { %v4651_v62 = vld [vmem:[#allocation4 + $0x20] sm:$0xf0] }
 0x1c3   : > { %2332 = vmatmul.bf16.gmra.mxu2 %v4298_v0  ;;  %4376 = vmatmul.msk.bf16.gmra.mxu3 %vm1469_vm0, %v4302_v1  ;;  %v1658_v1 = vld [vmem:[#allocation3 + $0x8] sm:$0xf] }
 0x1c8   : > { %v4293_v63 = vld [vmem:[#allocation4 + $0x18] sm:$0xf] }
 0x1c9   : > { %v4294_v20 = vor.u32 %v4651_v62, %v4293_v63  ;;  %v1661_v62 = vld [vmem:[#allocation3 + $0xc] sm:$0x1] }
 0x1cb   : > { %2313 = vmatmul.bf16.gmra.mxu1 %v4294_v20 }
 0x1f9   : > { %v1485_v53 = vpop.f32.mrf.mxu2 }
 0x1fa   : > { %v1486_v13 = vadd.f32 %v5796_v12, %v1485_v53 }
 0x201   : > { %v1487_v5 = vpop.f32.mrf.mxu2 }
 0x202   : > { %v1488_v28 = vadd.f32 %v5796_v12, %v1487_v5 }
 0x206   : > { %v1504_v47 = vpop.f32.mrf.mxu3 }
 0x207   : > { %v1505_v14 = vadd.f32 %v1504_v47, %v1486_v13 }
 0x209   : > { %v1524_v17 = vadd.f32 %v1523_v16, %v1505_v14 }
 0x20b   : > { %v4263_v38 = vmul.f32 -1.442695, %v1524_v17 }
 0x20d   : > { %4803 = vpow2.f32 %v4263_v38 }
 0x20e   : > { %v1506_v19 = vpop.f32.mrf.mxu3 }
 0x20f   : > { %v1507_v41 = vadd.f32 %v1506_v19, %v1488_v28 }
 0x211   : > { %v5804_v58 = vadd.f32 %v1525_v2, %v1507_v41  ;;  %v1530_v2 = vpop.f32.mrf.mxu0 }
 0x213   : > { %v4804_v15 = vpop.eup %4803  ;;  %v4264_v39 = vmul.f32 -1.442695, %v5804_v58 }
 0x214   : > { %v1545_v22 = vadd.f32 1.0, %v4804_v15  ;;  %v367_v15 = vld [vmem:[#allocation3 + $0x20] sm:$0x1] }
 0x215   : > { %v368_v25 = vsel %vm5034_vm3, 0, %v367_v15 }
 0x216   : > { %4805 = vrcp.f32 %v1545_v22  ;;  %v1560_v45 = vand.u32 2147483648, %v1545_v22  ;;  %v1558_v31 = vand.u32 2147483647, %v1545_v22  ;;  %vm1554_vm4 = vweird.f32 %v1545_v22  ;;  %369 = vst [vmem:[#allocation3 + $0x20] sm:$0x1] %v368_v25 }
 0x217   : > { %4807 = vpow2.f32 %v4264_v39 }
 0x218   : > { %v1490_v43 = vpop.f32.mrf.mxu2  ;;  %v1561_v44 = vor.u32 1.1754944e-38, %v1560_v45  ;;  %vm1559_vm12 = vcmp.eq.f32.partialorder %v1558_v31, 8.507059e+37  ;;  %v1664_v45 = vld [vmem:[#allocation3 + $0x10] sm:$0xf] }
 0x219   : > { %v1491_v36 = vadd.f32 %v5796_v12, %v1490_v43 }
 0x21c   : > { %v4806_v26 = vpop.eup %4805 }
 0x21d   : > { %v1550_v27 = vmul.f32 %v4806_v26, %v1545_v22  ;;  %v4808_v48 = vpop.eup %4807  ;;  %vm1555_vm9 = vweird.f32 %v4806_v26 }
 0x21e   : > { %v1546_v42 = vadd.f32 1.0, %v4808_v48  ;;  %vm1556_vm11 = vmor %vm1554_vm4, %vm1555_vm9  ;;  %v1667_v48 = vld [vmem:[#allocation3 + $0x14] sm:$0x1] }
 0x21f   : > { %v1551_v29 = vsub.f32 1.0, %v1550_v27 }
 0x220   : > { %4809 = vrcp.f32 %v1546_v42  ;;  %v1573_v20 = vand.u32 2147483647, %v1546_v42  ;;  %v1575_v10 = vand.u32 2147483648, %v1546_v42  ;;  %vm1569_vm14 = vweird.f32 %v1546_v42  ;;  %v1492_v14 = vpop.f32.mrf.mxu2 }
 0x221   : > { %v1552_v30 = vmul.f32 %v4806_v26, %v1551_v29  ;;  %v1493_v28 = vadd.f32 %v5796_v12, %v1492_v14 }
 0x222   : > { %v1576_v16 = vor.u32 1.1754944e-38, %v1575_v10  ;;  %vm1574_vm4 = vcmp.eq.f32.partialorder %v1573_v20, 8.507059e+37 }
 0x223   : > { %v1553_v51 = vadd.f32 %v4806_v26, %v1552_v30 }
 0x225   : > { %v1557_v52 = vsel %vm1556_vm11, %v4806_v26, %v1553_v51 }
 0x226   : > { %v1562_v23 = vsel %vm1559_vm12, %v1561_v44, %v1557_v52  ;;  %v1509_v32 = vpop.f32.mrf.mxu3  ;;  %v4810_v61 = vpop.eup %4809 }
 0x227   : > { %v1609_v9 = vmul.f32 %v1562_v23, %v1524_v17  ;;  %v1510_v55 = vadd.f32 %v1509_v32, %v1491_v36  ;;  %v1565_v33 = vmul.f32 %v4810_v61, %v1546_v42  ;;  %vm1570_vm13 = vweird.f32 %v4810_v61  ;;  %v5835_v36 = vld [vmem:[%s6394_s4] ss:$0 sm:$0xff]  ;;  %v355_v32 = vld [vmem:[#allocation3] sm:$0x1] }
 0x228   : > { %vm1571_vm9 = vmor %vm1569_vm14, %vm1570_vm13 }
 0x229   : > { %v1613_v60 = vpack.c.bf16 %v1609_v9, %v1609_v9  ;;  %v5812_v8 = vadd.f32 %v1528_v59, %v1510_v55  ;;  %v1566_v63 = vsub.f32 1.0, %v1565_v33  ;;  %v385_v9 = vld [vmem:[#allocation3 + $0x4] sm:$0x1]  ;;  %v356_v59 = vsel %vm5034_vm3, 0, %v355_v32 }
 0x22a   : > { %357 = vst [vmem:[#allocation3] sm:$0x1] %v356_v59 }
 0x22b   : > { %v1618_v56 = vshrl.u32 %v1613_v60, 16  ;;  %v4265_v57 = vmul.f32 -1.442695, %v5812_v8  ;;  %v1621_v0 = vshll.u32 %v1613_v60, 16  ;;  %v1567_v6 = vmul.f32 %v4810_v61, %v1566_v63 }
 0x22c   : > { %v386_v60 = vsel %vm5045_vm5, 0, %v385_v9 }
 0x22d   : > { %v1620_v35 = vrot.slane %v1618_v56, 7  ;;  %4811 = vpow2.f32 %v4265_v57  ;;  %v1568_v47 = vadd.f32 %v4810_v61, %v1567_v6  ;;  %v2309_v23 = vpop.f32.mrf.mxu1  ;;  %387 = vst [vmem:[#allocation3 + $0x4] sm:$0x1] %v386_v60 }
 0x22e   : > { %v1511_v21 = vpop.f32.mrf.mxu3  ;;  %v2310_v33 = vadd.f32 %v5835_v36, %v2309_v23 }
 0x22f   : > { %v1623_v3 = vor.u32 %v1621_v0, %v1620_v35  ;;  %v1624_v4 = vrot.slane %v1620_v35, 4  ;;  %v1572_v17 = vsel %vm1571_vm9, %v4810_v61, %v1568_v47  ;;  %v1512_v41 = vadd.f32 %v1511_v21, %v1493_v28  ;;  %v370_v61 = vld [vmem:[#allocation3 + $0x28] sm:$0x1]  ;;  %v400_v35 = vld [vmem:[#allocation3 + $0x2c] sm:$0x1] }
 0x230   : > { %v1577_v5 = vsel %vm1574_vm4, %v1576_v16, %v1572_v17  ;;  %v371_v57 = vsel %vm5034_vm3, 0, %v370_v61  ;;  %v401_v20 = vsel %vm5045_vm5, 0, %v400_v35 }
 0x231   : > { %v1659_v53 = vsel %vm5261_vm8, %v1623_v3, %v1658_v1  ;;  %v1662_v13 = vsel %vm5034_vm3, %v1624_v4, %v1661_v62  ;;  %v1610_v19 = vmul.f32 %v1577_v5, %v5804_v58  ;;  %v5825_v26 = vadd.f32 %v1530_v2, %v1512_v41  ;;  %v2328_v1 = vpop.f32.mrf.mxu2  ;;  %372 = vst [vmem:[#allocation3 + $0x28] sm:$0x1] %v371_v57  ;;  %v2514_v14 = vld [vmem:[#allocation3] sm:$0xf]  ;;  %v1670_v5 = vld [vmem:[#allocation3 + $0x18] sm:$0xf] }
 0x232   : > { %1660 = vst [vmem:[#allocation3 + $0x8] sm:$0xf] %v1659_v53  ;;  %v2329_v10 = vadd.f32 %v2328_v1, %v2310_v33  ;;  %v2523_v28 = vshrl.u32 %v2514_v14, 16  ;;  %v2526_v15 = vshll.u32 %v2514_v14, 16 }
 0x233   : > { %1663 = vst [vmem:[#allocation3 + $0xc] sm:$0x1] %v1662_v13  ;;  %v4812_v38 = vpop.eup %4811  ;;  %v1614_v39 = vpack.c.bf16 %v1610_v19, %v1610_v19  ;;  %v4266_v27 = vmul.f32 -1.442695, %v5825_v26 }
 0x234   : > { %v1547_v22 = vadd.f32 1.0, %v4812_v38  ;;  %402 = vst [vmem:[#allocation3 + $0x2c] sm:$0x1] %v401_v20  ;;  %v2515_v38 = vld [vmem:[#allocation3 + $0x4] sm:$0x1]  ;;  %v2525_v41 = vrot.slane %v2523_v28, 4 }
 0x235   : > { %v1626_v12 = vshrl.u32 %v1614_v39, 16  ;;  %v1629_v58 = vshll.u32 %v1614_v39, 16  ;;  %v2532_v18 = vshll.u32 %v2515_v38, 16  ;;  %v2528_v2 = vrot.slane %v2526_v15, 5 }
 0x236   : > { %4813 = vrcp.f32 %v1547_v22  ;;  %v1588_v50 = vand.u32 2147483647, %v1547_v22  ;;  %v1590_v51 = vand.u32 2147483648, %v1547_v22  ;;  %vm1584_vm12 = vweird.f32 %v1547_v22  ;;  %v2347_v63 = vpop.f32.mrf.mxu3 }
 0x237   : > { %v1628_v29 = vrot.slane %v1626_v12, 7  ;;  %4815 = vpow2.f32 %v4266_v27  ;;  %v5848_v6 = vadd.f32 %v2347_v63, %v2329_v10 }
 0x238   : > { %v1591_v0 = vor.u32 1.1754944e-38, %v1590_v51  ;;  %vm1589_vm14 = vcmp.eq.f32.partialorder %v1588_v50, 8.507059e+37  ;;  %v2595_v51 = vld [vmem:[#allocation3 + $0x4] sm:$0x1] }
 0x239   : > { %v1631_v31 = vor.u32 %v1629_v58, %v1628_v29  ;;  %v1632_v34 = vrot.slane %v1628_v29, 4  ;;  %v4377_v13 = vmul.f32 -1.442695, %v5848_v6  ;;  %v2529_v29 = vor.u32 %v2528_v2, %v2525_v41  ;;  %v2596_v59 = vld [vmem:[#allocation3 + $0x8] sm:$0xe]  ;;  %v2330_v63 = vpop.f32.mrf.mxu2 }
 0x23a   : > { %v2534_v58 = vrot.slane %v2532_v18, 5  ;;  %v2612_v9 = vrot.slane %v2595_v51, 5  ;;  %v2597_v61 = vld [vmem:[#allocation3 + $0xc] sm:$0x1]  ;;  %v4382_v57 = vrot.slane %v2596_v59, 9 }
 0x23b   : > { %v1665_v42 = vsel %vm5261_vm8, %v1631_v31, %v1664_v45  ;;  %v1668_v43 = vsel %vm5034_vm3, %v1632_v34, %v1667_v48  ;;  %v2616_v35 = vrot.slane %v2597_v61, 5  ;;  %v2507_v59 = vld [vmem:[#allocation3 + $0x8] sm:$0xf] }
 0x23c   : > { %v4814_v30 = vpop.eup %4813  ;;  %1666 = vst [vmem:[#allocation3 + $0x10] sm:$0xf] %v1665_v42  ;;  %v2311_v42 = vpop.f32.mrf.mxu1 }
 0x23d   : > { %v1580_v40 = vmul.f32 %v4814_v30, %v1547_v22  ;;  %1669 = vst [vmem:[#allocation3 + $0x14] sm:$0x1] %v1668_v43  ;;  %v4816_v44 = vpop.eup %4815  ;;  %vm1585_vm11 = vweird.f32 %v4814_v30  ;;  %v2594_v43 = vld [vmem:[#allocation3] sm:$0xe]  ;;  %v2312_v32 = vadd.f32 %v5835_v36, %v2311_v42  ;;  %v2739_v42 = vld [vmem:[#allocation3 + $0xc] sm:$0x1] }
 0x23e   : > { %v1548_v55 = vadd.f32 1.0, %v4816_v44  ;;  %vm1586_vm13 = vmor %vm1584_vm12, %vm1585_vm11  ;;  %v4381_v44 = vrot.slane %v2594_v43, 9  ;;  %v2349_v20 = vpop.f32.mrf.mxu3  ;;  %v376_v43 = vld [vmem:[#allocation3 + $0x38] sm:$0x1]  ;;  %2511 = vst.msk [vmem:[#allocation4 + $0xc] sm:$0xf] %vm278_vm7, %v2507_v59 }
 0x23f   : > { %v1581_v46 = vsub.f32 1.0, %v1580_v40  ;;  %v2530_v40 = vrot.slane %v2529_v29, 4  ;;  %v2331_v10 = vadd.f32 %v2330_v63, %v2312_v32 }
 0x240   : > { %4817 = vrcp.f32 %v1548_v55  ;;  %v1603_v25 = vand.u32 2147483647, %v1548_v55  ;;  %v1605_v54 = vand.u32 2147483648, %v1548_v55  ;;  %vm1599_vm4 = vweird.f32 %v1548_v55 }
 0x241   : > { %v1582_v52 = vmul.f32 %v4814_v30, %v1581_v46  ;;  %4819 = vpow2.f32 %v4377_v13  ;;  %v2535_v23 = vsel %vm5075_vm10, %v2530_v40, %v2534_v58  ;;  %v2613_v33 = vsel %vm5145_vm15, %v4381_v44, %v2612_v9  ;;  %v2517_v40 = vld [vmem:[#allocation3 + $0xc] sm:$0x1] }
 0x242   : > { %vm1604_vm11 = vcmp.eq.f32.partialorder %v1603_v25, 8.507059e+37  ;;  %v1606_v34 = vor.u32 1.1754944e-38, %v1605_v54  ;;  %2578 = vrot.lane.b32.xlu0 %v2535_v23, %s4932_s20  ;;  %2626 = vrot.lane.b32.xlu2 %v2613_v33, %s4933_s21  ;;  %v2546_v32 = vshll.u32 %v2517_v40, 16  ;;  %v2756_v9 = vrot.slane %v2739_v42, 5 }
 0x243   : > { %v1583_v56 = vadd.f32 %v4814_v30, %v1582_v52 }
 0x245   : > { %v1587_v62 = vsel %vm1586_vm13, %v4814_v30, %v1583_v56  ;;  %v373_v56 = vld [vmem:[#allocation3 + $0x30] sm:$0x1] }
 0x246   : > { %v1592_v3 = vsel %vm1589_vm14, %v1591_v0, %v1587_v62  ;;  %v4818_v47 = vpop.eup %4817  ;;  %v403_v0 = vld [vmem:[#allocation3 + $0x34] sm:$0x1]  ;;  %v2333_v61 = vpop.f32.mrf.mxu2 }
 0x247   : > { %v1611_v4 = vmul.f32 %v1592_v3, %v5812_v8  ;;  %v1595_v17 = vmul.f32 %v4818_v47, %v1548_v55  ;;  %v1673_v8 = vld [vmem:[#allocation3 + $0x1c] sm:$0x1]  ;;  %vm1600_vm9 = vweird.f32 %v4818_v47  ;;  %v4820_v31 = vpop.eup %4819  ;;  %v2642_v55 = vld [vmem:[#allocation3 + $0x8] sm:$0xf]  ;;  %v404_v62 = vsel %vm5045_vm5, 0, %v403_v0 }
 0x248   : > { %vm1601_vm12 = vmor %vm1599_vm4, %vm1600_vm9  ;;  %v2369_v50 = vadd.f32 1.0, %v4820_v31  ;;  %2650 = vrot.lane.b32.xlu1 %v2642_v55, %s4934_s22  ;;  %405 = vst [vmem:[#allocation3 + $0x34] sm:$0x1] %v404_v62  ;;  %v2314_v31 = vpop.f32.mrf.mxu1  ;;  %v377_v55 = vsel %vm5034_vm3, 0, %v376_v43  ;;  %v2352_v62 = vpop.f32.mrf.mxu3 }
 0x249   : > { %v1615_v53 = vpack.c.bf16 %v1611_v4, %v1611_v4  ;;  %v1596_v22 = vsub.f32 1.0, %v1595_v17  ;;  %v2617_v4 = vsel %vm5145_vm15, %v4382_v57, %v2616_v35  ;;  %v1679_v17 = vld [vmem:[#allocation3 + $0x24] sm:$0x1]  ;;  %v2315_v51 = vadd.f32 %v5835_v36, %v2314_v31  ;;  %378 = vst [vmem:[#allocation3 + $0x38] sm:$0x1] %v377_v55 }
 0x24a   : > { %4821 = vrcp.f32 %v2369_v50  ;;  %2628 = vrot.lane.b32.xlu0 %v2617_v4, %s4933_s21  ;;  %vm2378_vm14 = vweird.f32 %v2369_v50  ;;  %v2482_v57 = vld [vmem:[#allocation3 + $0x28] sm:$0xf]  ;;  %v2485_v4 = vld [vmem:[#allocation3 + $0x2c] sm:$0x1] }
 0x24b   : > { %v1634_v16 = vshrl.u32 %v1615_v53, 16  ;;  %v1637_v19 = vshll.u32 %v1615_v53, 16  ;;  %v1597_v27 = vmul.f32 %v4818_v47, %v1596_v22  ;;  %v5870_v53 = vadd.f32 %v2349_v20, %v2331_v10 }
 0x24c   : > { %v2384_v22 = vand.u32 2147483648, %v2369_v50  ;;  %v2334_v0 = vadd.f32 %v2333_v61, %v2315_v51 }
 0x24d   : > { %v1636_v21 = vrot.slane %v1634_v16, 7  ;;  %v1598_v30 = vadd.f32 %v4818_v47, %v1597_v27  ;;  %v1676_v16 = vld [vmem:[#allocation3 + $0x20] sm:$0xf]  ;;  %v2516_v27 = vld [vmem:[#allocation3 + $0x8] sm:$0xf] }
 0x24e   : > { %v2385_v41 = vor.u32 1.1754944e-38, %v2384_v22 }
 0x24f   : > { %v1639_v39 = vor.u32 %v1637_v19, %v1636_v21  ;;  %v1640_v12 = vrot.slane %v1636_v21, 4  ;;  %v1602_v46 = vsel %vm1601_vm12, %v4818_v47, %v1598_v30  ;;  %v2738_v30 = vld [vmem:[#allocation3 + $0x8] sm:$0xe] }
 0x250   : > { %v1607_v52 = vsel %vm1604_vm11, %v1606_v34, %v1602_v46  ;;  %v4822_v13 = vpop.eup %4821  ;;  %v4385_v46 = vrot.slane %v2738_v30, 9 }
 0x251   : > { %v1671_v45 = vsel %vm5261_vm8, %v1639_v39, %v1670_v5  ;;  %v1674_v48 = vsel %vm5034_vm3, %v1640_v12, %v1673_v8  ;;  %v1612_v60 = vmul.f32 %v1607_v52, %v5825_v26  ;;  %v374_v26 = vsel %vm5034_vm3, 0, %v373_v56  ;;  %v2643_v12 = vld [vmem:[#allocation3 + $0x10] sm:$0xf] }
 0x252   : > { %1672 = vst [vmem:[#allocation3 + $0x18] sm:$0xf] %v1671_v45  ;;  %v2374_v38 = vmul.f32 %v4822_v13, %v2369_v50  ;;  %v4378_v5 = vmul.f32 -1.442695, %v5870_v53  ;;  %vm2379_vm13 = vweird.f32 %v4822_v13  ;;  %v2382_v8 = vand.u32 2147483647, %v2369_v50  ;;  %2652 = vrot.lane.b32.xlu2 %v2643_v12, %s4934_s22 }
 0x253   : > { %1675 = vst [vmem:[#allocation3 + $0x1c] sm:$0x1] %v1674_v48  ;;  %v1616_v1 = vpack.c.bf16 %v1612_v60, %v1612_v60  ;;  %vm2380_vm9 = vmor %vm2378_vm14, %vm2379_vm13  ;;  %v2537_v45 = vshrl.u32 %v2516_v27, 16  ;;  %v2540_v48 = vshll.u32 %v2516_v27, 16  ;;  %v406_v50 = vld [vmem:[#allocation3 + $0x3c] sm:$0x1]  ;;  %v2757_v35 = vsel %vm5145_vm15, %v4385_v46, %v2756_v9 }
 0x254   : > { %375 = vst [vmem:[#allocation3 + $0x30] sm:$0x1] %v374_v26  ;;  %v2375_v18 = vsub.f32 1.0, %v2374_v38  ;;  %4823 = vpow2.f32 %v4378_v5  ;;  %vm2383_vm4 = vcmp.eq.f32.partialorder %v2382_v8, 8.507059e+37  ;;  %v407_v56 = vsel %vm5045_vm5, 0, %v406_v50  ;;  %2770 = vrot.lane.b32.xlu0 %v2757_v35, %s4932_s20 }
 0x255   : > { %v1642_v3 = vshrl.u32 %v1616_v1, 16  ;;  %v1645_v14 = vshll.u32 %v1616_v1, 16  ;;  %v2539_v52 = vrot.slane %v2537_v45, 4  ;;  %v2542_v23 = vrot.slane %v2540_v48, 5  ;;  %408 = vst [vmem:[#allocation3 + $0x3c] sm:$0x1] %v407_v56 }
 0x256   : > { %v2376_v25 = vmul.f32 %v4822_v13, %v2375_v18  ;;  %v2666_v1 = vld [vmem:[#allocation3 + $0x8] sm:$0xf]  ;;  %v2741_v27 = vld [vmem:[#allocation3 + $0x14] sm:$0x1]  ;;  %v2598_v48 = vld [vmem:[#allocation3 + $0x10] sm:$0xe] }
 0x257   : > { %v1644_v47 = vrot.slane %v1642_v3, 7  ;;  %v2675_v20 = vshrl.u32 %v2666_v1, 16  ;;  %v2678_v10 = vshll.u32 %v2666_v1, 16  ;;  %v2760_v45 = vrot.slane %v2741_v27, 5  ;;  %v2811_v35 = vld [vmem:[#allocation3 + $0x10] sm:$0xf] }
 0x258   : > { %v2377_v54 = vadd.f32 %v4822_v13, %v2376_v25  ;;  %v4383_v42 = vrot.slane %v2598_v48, 9  ;;  %v2891_v1 = vld [vmem:[#allocation3 + $0x10] sm:$0xe] }
 0x259   : > { %v1647_v28 = vor.u32 %v1645_v14, %v1644_v47  ;;  %v1648_v15 = vrot.slane %v1644_v47, 4  ;;  %v5892_v47 = vadd.f32 %v2352_v62, %v2334_v0  ;;  %v2667_v14 = vld [vmem:[#allocation3 + $0xc] sm:$0x1]  ;;  %v2677_v18 = vrot.slane %v2675_v20, 4  ;;  %v2354_v62 = vpop.f32.mrf.mxu3 }
 0x25a   : > { %v4824_v2 = vpop.eup %4823  ;;  %v2381_v39 = vsel %vm2380_vm9, %v4822_v13, %v2377_v54  ;;  %v2548_v13 = vrot.slane %v2546_v32, 5  ;;  %v2684_v8 = vshll.u32 %v2667_v14, 16  ;;  %v2787_v54 = vld [vmem:[#allocation3 + $0x10] sm:$0xf]  ;;  %v409_v32 = vld [vmem:[#allocation3 + $0x44] sm:$0x1] }
 0x25b   : > { %v1677_v21 = vsel %vm5261_vm8, %v1647_v28, %v1676_v16  ;;  %v1680_v19 = vsel %vm5034_vm3, %v1648_v15, %v1679_v17  ;;  %v2386_v29 = vsel %vm2383_vm4, %v2385_v41, %v2381_v39  ;;  %v5878_v58 = vadd.f32 1.0, %v4824_v2  ;;  %v2740_v41 = vld [vmem:[#allocation3 + $0x10] sm:$0xe]  ;;  %2795 = vrot.lane.b32.xlu2 %v2787_v54, %s4933_s21 }
 0x25c   : > { %1678 = vst [vmem:[#allocation3 + $0x20] sm:$0xf] %v1677_v21  ;;  %v2433_v34 = vmul.f32 %v2386_v29, %v5848_v6  ;;  %v2543_v6 = vor.u32 %v2542_v23, %v2539_v52  ;;  %v4379_v15 = vmul.f32 -1.442695, %v5892_v47  ;;  %v2680_v21 = vrot.slane %v2678_v10, 5 }
 0x25d   : > { %1681 = vst [vmem:[#allocation3 + $0x24] sm:$0x1] %v1680_v19  ;;  %4825 = vrcp.f32 %v5878_v58  ;;  %v2399_v5 = vand.u32 2147483648, %v5878_v58  ;;  %v2397_v12 = vand.u32 2147483647, %v5878_v58  ;;  %v4386_v29 = vrot.slane %v2740_v41, 9 }
 0x25e   : > { %v2437_v44 = vpack.c.bf16 %v2433_v34, %v2433_v34  ;;  %v2544_v26 = vrot.slane %v2543_v6, 4  ;;  %4827 = vpow2.f32 %v4379_v15  ;;  %v2681_v2 = vor.u32 %v2680_v21, %v2677_v18  ;;  %v2599_v34 = vld [vmem:[#allocation3 + $0x14] sm:$0x1]  ;;  %v379_v23 = vld [vmem:[#allocation3 + $0x40] sm:$0x1]  ;;  %v2316_v6 = vpop.f32.mrf.mxu1 }
 0x25f   : > { %vm2393_vm12 = vweird.f32 %v5878_v58  ;;  %v2400_v40 = vor.u32 1.1754944e-38, %v2399_v5  ;;  %v2620_v43 = vrot.slane %v2599_v34, 5  ;;  %v2686_v46 = vrot.slane %v2684_v8, 5  ;;  %v2491_v5 = vld [vmem:[#allocation3 + $0x34] sm:$0x1] }
 0x260   : > { %v2442_v60 = vshrl.u32 %v2437_v44, 16  ;;  %v2445_v33 = vshll.u32 %v2437_v44, 16  ;;  %v2549_v28 = vsel %vm5075_vm10, %v2544_v26, %v2548_v13  ;;  %v2682_v30 = vrot.slane %v2681_v2, 4  ;;  %v2519_v2 = vld [vmem:[#allocation3 + $0x14] sm:$0x1] }
 0x261   : > { %2580 = vrot.lane.b32.xlu1 %v2549_v28, %s4932_s20  ;;  %vm2398_vm14 = vcmp.eq.f32.partialorder %v2397_v12, 8.507059e+37  ;;  %v2761_v52 = vsel %vm5145_vm15, %v4386_v29, %v2760_v45  ;;  %v380_v59 = vsel %vm5034_vm3, 0, %v379_v23  ;;  %v2317_v61 = vadd.f32 %v5835_v36, %v2316_v6  ;;  %v2894_v6 = vld [vmem:[#allocation3 + $0x1c] sm:$0x1] }
 0x262   : > { %v2444_v63 = vrot.slane %v2442_v60, 7  ;;  %v2687_v9 = vsel %vm5075_vm10, %v2682_v30, %v2686_v46  ;;  %v410_v60 = vsel %vm5045_vm5, 0, %v409_v32  ;;  %381 = vst [vmem:[#allocation3 + $0x40] sm:$0x1] %v380_v59  ;;  %v2621_v56 = vsel %vm5145_vm15, %v4383_v42, %v2620_v43 }
 0x263   : > { %v4826_v3 = vpop.eup %4825  ;;  %411 = vst [vmem:[#allocation3 + $0x44] sm:$0x1] %v410_v60  ;;  %2630 = vrot.lane.b32.xlu2 %v2621_v56, %s4933_s21  ;;  %v2823_v14 = vshll.u32 %v2811_v35, 16  ;;  %v2560_v30 = vshll.u32 %v2519_v2, 16  ;;  %v2645_v32 = vld [vmem:[#allocation3 + $0x20] sm:$0xf] }
 0x264   : > { %v2447_v16 = vor.u32 %v2445_v33, %v2444_v63  ;;  %v2448_v17 = vrot.slane %v2444_v63, 4  ;;  %v2389_v38 = vmul.f32 %v4826_v3, %v5878_v58  ;;  %vm2394_vm11 = vweird.f32 %v4826_v3  ;;  %v4828_v51 = vpop.eup %4827  ;;  %v2518_v33 = vld [vmem:[#allocation3 + $0x10] sm:$0xf]  ;;  %v2892_v63 = vld [vmem:[#allocation3 + $0x14] sm:$0x1] }
 0x265   : > { %vm2395_vm13 = vmor %vm2393_vm12, %vm2394_vm11  ;;  %v5912_v55 = vadd.f32 1.0, %v4828_v51  ;;  %2734 = vst.msk [vmem:[#allocation4 + $0x4] sm:$0xf] %vm278_vm7, %v2687_v9  ;;  %v2551_v36 = vshrl.u32 %v2518_v33, 16  ;;  %v2825_v12 = vrot.slane %v2823_v14, 5  ;;  %v2562_v59 = vrot.slane %v2560_v30, 5 }
 0x266   : > { %v2483_v19 = vsel %vm5261_vm8, %v2447_v16, %v2482_v57  ;;  %v2486_v22 = vsel %vm5034_vm3, %v2448_v17, %v2485_v4  ;;  %v2390_v25 = vsub.f32 1.0, %v2389_v38  ;;  %v2820_v4 = vshrl.u32 %v2811_v35, 16  ;;  %v2488_v38 = vld [vmem:[#allocation3 + $0x30] sm:$0xf]  ;;  %v2644_v51 = vld [vmem:[#allocation3 + $0x18] sm:$0xf] }
 0x267   : > { %2484 = vst [vmem:[#allocation3 + $0x28] sm:$0xf] %v2483_v19  ;;  %4829 = vrcp.f32 %v5912_v55  ;;  %v4389_v16 = vrot.slane %v2891_v1, 9  ;;  %v2909_v17 = vrot.slane %v2892_v63, 5  ;;  %v2414_v29 = vand.u32 2147483648, %v5912_v55  ;;  %v4693_v60 = vld [vmem:[%s6395_s5 + $0x80] sm:$0xff] }
 0x268   : > { %2487 = vst [vmem:[#allocation3 + $0x2c] sm:$0x1] %v2486_v22  ;;  %v2391_v39 = vmul.f32 %v4826_v3, %v2390_v25  ;;  %v2553_v25 = vrot.slane %v2551_v36, 4  ;;  %v2412_v48 = vand.u32 2147483647, %v5912_v55  ;;  %vm2408_vm4 = vweird.f32 %v5912_v55 }
 0x269   : > { %2772 = vrot.lane.b32.xlu1 %v2761_v52, %s4932_s20  ;;  %v2910_v19 = vsel %vm5145_vm15, %v4389_v16, %v2909_v17  ;;  %v2415_v46 = vor.u32 1.1754944e-38, %v2414_v29  ;;  %v2913_v1 = vrot.slane %v2894_v6, 5  ;;  %v2600_v14 = vld [vmem:[#allocation3 + $0x18] sm:$0xe]  ;;  %v2521_v17 = vld [vmem:[#allocation3 + $0x1c] sm:$0x1] }
 0x26a   : > { %v2392_v31 = vadd.f32 %v4826_v3, %v2391_v39  ;;  %2927 = vst.msk [vmem:[#allocation4 + $0x8] sm:$0xf] %vm278_vm7, %v2910_v19  ;;  %v2822_v39 = vrot.slane %v2820_v4, 4  ;;  %vm2413_vm12 = vcmp.eq.f32.partialorder %v2412_v48, 8.507059e+37  ;;  %v2520_v16 = vld [vmem:[#allocation3 + $0x18] sm:$0xf] }
 0x26b   : > { %2656 = vrot.lane.b32.xlu2 %v2645_v32, %s4934_s22  ;;  %v2813_v2 = vld [vmem:[#allocation3 + $0x18] sm:$0xf]  ;;  %v4384_v30 = vrot.slane %v2600_v14, 9 }
 0x26c   : > { %v2396_v50 = vsel %vm2395_vm13, %v4826_v3, %v2392_v31  ;;  %v2554_v3 = vshll.u32 %v2518_v33, 16  ;;  %v2812_v31 = vld [vmem:[#allocation3 + $0x14] sm:$0x1]  ;;  %v2494_v29 = vld [vmem:[#allocation3 + $0x38] sm:$0xf] }
 0x26d   : > { %v2401_v44 = vsel %vm2398_vm14, %v2400_v40, %v2396_v50  ;;  %v4830_v15 = vpop.eup %4829  ;;  %v2826_v40 = vor.u32 %v2825_v12, %v2822_v39  ;;  %v2788_v50 = vld [vmem:[#allocation3 + $0x18] sm:$0xf]  ;;  %v2829_v9 = vshll.u32 %v2812_v31, 16  ;;  %v2814_v39 = vld [vmem:[#allocation3 + $0x1c] sm:$0x1] }
 0x26e   : > { %v2434_v58 = vmul.f32 %v2401_v44, %v5870_v53  ;;  %v2335_v53 = vpop.f32.mrf.mxu2  ;;  %v2404_v22 = vmul.f32 %v4830_v15, %v5912_v55  ;;  %v2556_v8 = vrot.slane %v2554_v3, 5  ;;  %vm2409_vm9 = vweird.f32 %v4830_v15  ;;  %v4694_v44 = vld [vmem:[%s6395_s5 + $0x88] sm:$0xff]  ;;  %2797 = vrot.lane.b32.xlu0 %v2788_v50, %s4933_s21  ;;  %v3402_v49 = vld [vmem:[#allocation3 + $0x28] sm:$0xf] }
 0x26f   : > { %v2336_v0 = vadd.f32 %v2335_v53, %v2317_v61  ;;  %vm5942_vm11 = vmor %vm2408_vm4, %vm2409_vm9  ;;  %3167 = vmatpush.bf16.msra.mxu2 %v4694_v44  ;;  %v2831_v36 = vrot.slane %v2829_v9, 5  ;;  %v2497_v31 = vld [vmem:[#allocation3 + $0x3c] sm:$0x1]  ;;  %v2843_v44 = vshll.u32 %v2814_v39, 16 }
 0x270   : > { %v2438_v57 = vpack.c.bf16 %v2434_v58, %v2434_v58  ;;  %v2405_v27 = vsub.f32 1.0, %v2404_v22  ;;  %v2557_v34 = vor.u32 %v2556_v8, %v2553_v25  ;;  %v2893_v58 = vld [vmem:[#allocation3 + $0x18] sm:$0xe]  ;;  %v2574_v25 = vshll.u32 %v2521_v17, 16 }
 0x271   : > { %v5925_v10 = vadd.f32 %v2354_v62, %v2336_v0  ;;  %2654 = vrot.lane.b32.xlu1 %v2644_v51, %s4934_s22  ;;  %v4390_v61 = vrot.slane %v2893_v58, 9 }
 0x272   : > { %v2450_v26 = vshrl.u32 %v2438_v57, 16  ;;  %v2453_v20 = vshll.u32 %v2438_v57, 16  ;;  %v2406_v45 = vmul.f32 %v4830_v15, %v2405_v27  ;;  %v2558_v33 = vrot.slane %v2557_v34, 4 }
 0x273   : > { %v4380_v28 = vmul.f32 -1.442695, %v5925_v10  ;;  %v2827_v57 = vrot.slane %v2826_v40, 4  ;;  %3168 = vmatpush.bf16.msra.mxu2 %v4693_v60  ;;  %v2576_v32 = vrot.slane %v2574_v25, 5 }
 0x274   : > { %v2452_v13 = vrot.slane %v2450_v26, 7  ;;  %v2407_v43 = vadd.f32 %v4830_v15, %v2406_v45 }
 0x275   : > { %4831 = vpow2.f32 %v4380_v28  ;;  %v2601_v28 = vld [vmem:[#allocation3 + $0x1c] sm:$0x1]  ;;  %v2832_v22 = vsel %vm5075_vm10, %v2827_v57, %v2831_v36 }
 0x276   : > { %v2455_v18 = vor.u32 %v2453_v20, %v2452_v13  ;;  %v2456_v21 = vrot.slane %v2452_v13, 4  ;;  %v2411_v55 = vsel %vm5942_vm11, %v4830_v15, %v2407_v43  ;;  %v5960_v20 = vld [vmem:[#allocation4 + $0x8] sm:$0xf]  ;;  %v2914_v13 = vsel %vm5145_vm15, %v4390_v61, %v2913_v1 }
 0x277   : > { %v2416_v56 = vsel %vm2413_vm12, %v2415_v46, %v2411_v55  ;;  %2928 = vst.msk [vmem:[#allocation4 + $0x14] sm:$0xf] %vm278_vm7, %v2914_v13  ;;  %v2565_v15 = vshrl.u32 %v2520_v16, 16  ;;  %v2624_v34 = vrot.slane %v2601_v28, 5  ;;  %v2837_v43 = vshll.u32 %v2813_v2, 16 }
 0x278   : > { %v2489_v54 = vsel %vm5261_vm8, %v2455_v18, %v2488_v38  ;;  %v2492_v41 = vsel %vm5034_vm3, %v2456_v21, %v2491_v5  ;;  %v2435_v35 = vmul.f32 %v2416_v56, %v5892_v47  ;;  %v2563_v47 = vsel %vm5075_vm10, %v2558_v33, %v2562_v59  ;;  %v2789_v5 = vld [vmem:[#allocation3 + $0x20] sm:$0xf]  ;;  %v412_v55 = vld [vmem:[#allocation3 + $0x4c] sm:$0x1]  ;;  %v2742_v56 = vld [vmem:[#allocation3 + $0x18] sm:$0xe] }
 0x279   : > { %2490 = vst [vmem:[#allocation3 + $0x30] sm:$0xf] %v2489_v54  ;;  %v2568_v18 = vshll.u32 %v2520_v16, 16  ;;  %2582 = vrot.lane.b32.xlu0 %v2563_v47, %s4932_s20  ;;  %2875 = vrot.lane.b32.xlu1 %v2832_v22, %s4934_s22  ;;  %v2567_v54 = vrot.slane %v2565_v15, 4  ;;  %v2839_v58 = vrot.slane %v2837_v43, 5  ;;  %v413_v36 = vsel %vm5045_vm5, 0, %v412_v55 }
 0x27a   : > { %2493 = vst [vmem:[#allocation3 + $0x34] sm:$0x1] %v2492_v41  ;;  %v2439_v4 = vpack.c.bf16 %v2435_v35, %v2435_v35  ;;  %2799 = vrot.lane.b32.xlu2 %v2789_v5, %s4933_s21  ;;  %v2895_v33 = vld [vmem:[#allocation3 + $0x20] sm:$0xe]  ;;  %v2743_v35 = vld [vmem:[#allocation3 + $0x1c] sm:$0x1] }
 0x27b   : > { %v4832_v42 = vpop.eup %4831  ;;  %v2570_v41 = vrot.slane %v2568_v18, 5  ;;  %414 = vst [vmem:[#allocation3 + $0x4c] sm:$0x1] %v413_v36  ;;  %v4391_v13 = vrot.slane %v2895_v33, 9  ;;  %v4387_v11 = vrot.slane %v2742_v56, 9  ;;  %v2764_v28 = vrot.slane %v2743_v35, 5 }
 0x27c   : > { %v5946_v23 = vadd.f32 1.0, %v4832_v42  ;;  %v2458_v21 = vshrl.u32 %v2439_v4, 16  ;;  %v2461_v27 = vshll.u32 %v2439_v4, 16  ;;  %v2834_v42 = vshrl.u32 %v2813_v2, 16  ;;  %v2898_v4 = vld [vmem:[#allocation3 + $0x2c] sm:$0x1] }
 0x27d   : > { %v2571_v40 = vor.u32 %v2570_v41, %v2567_v54  ;;  %v2745_v16 = vld [vmem:[#allocation3 + $0x24] sm:$0x1]  ;;  %v2921_v15 = vrot.slane %v2898_v4, 5  ;;  %v3657_v18 = vld [vmem:[#allocation3 + $0x48] sm:$0xe]  ;;  %v2765_v48 = vsel %vm5145_vm15, %v4387_v11, %v2764_v28 }
 0x27e   : > { %4833 = vrcp.f32 %v5946_v23  ;;  %v2429_v0 = vand.u32 2147483648, %v5946_v23  ;;  %v2427_v62 = vand.u32 2147483647, %v5946_v23  ;;  %v2460_v12 = vrot.slane %v2458_v21, 7  ;;  %v4673_v61 = vld [vmem:[#allocation4 + $0x10] sm:$0xf0] }
 0x27f   : > { %v2572_v52 = vrot.slane %v2571_v40, 4  ;;  %v2836_v9 = vrot.slane %v2834_v42, 4  ;;  %vm2423_vm9 = vweird.f32 %v5946_v23  ;;  %v4404_v57 = vor.u32 %v4673_v61, %v5960_v20  ;;  %v3354_v21 = vld [vmem:[#allocation3 + $0x20] sm:$0xe]  ;;  %v3276_v36 = vld [vmem:[#allocation3 + $0x28] sm:$0xf] }
 0x280   : > { %v3651_v53 = vld [vmem:[#allocation3 + $0x30] sm:$0xe]  ;;  %v5969_v19 = vor.u32 1.1754944e-38, %v2429_v0  ;;  %vm5980_vm13 = vcmp.eq.f32.partialorder %v2427_v62, 8.507059e+37  ;;  %v2463_v46 = vor.u32 %v2461_v27, %v2460_v12  ;;  %v2464_v50 = vrot.slane %v2460_v12, 4 }
 0x281   : > { %v3652_v63 = vld [vmem:[#allocation3 + $0x34] sm:$0x1]  ;;  %v4503_v26 = vrot.slane %v3651_v53, 9  ;;  %v2840_v53 = vor.u32 %v2839_v58, %v2836_v9  ;;  %v2896_v0 = vld [vmem:[#allocation3 + $0x24] sm:$0x1]  ;;  %4489 = vmatmul.msk.bf16.vlgmr.msra.gmra.mxu2 %vm1469_vm0, %v4404_v57  ;;  %v2768_v41 = vrot.slane %v2745_v16, 5 }
 0x282   : > { %v3669_v3 = vrot.slane %v3652_v63, 5  ;;  %v2495_v59 = vsel %vm5261_vm8, %v2463_v46, %v2494_v29  ;;  %v2498_v60 = vsel %vm5034_vm3, %v2464_v50, %v2497_v31  ;;  %v2625_v63 = vsel %vm5145_vm15, %v4384_v30, %v2624_v34  ;;  %v2744_v62 = vld [vmem:[#allocation3 + $0x20] sm:$0xe]  ;;  %v3658_v42 = vld [vmem:[#allocation3 + $0x4c] sm:$0x1] }
 0x283   : > { %2496 = vst [vmem:[#allocation3 + $0x38] sm:$0xf] %v2495_v59  ;;  %2632 = vrot.lane.b32.xlu0 %v2625_v63, %s4933_s21  ;;  %v2841_v20 = vrot.slane %v2840_v53, 4  ;;  %v2917_v17 = vrot.slane %v2896_v0, 5  ;;  %v4388_v54 = vrot.slane %v2744_v62, 9  ;;  %v4506_v27 = vrot.slane %v3657_v18, 9 }
 0x284   : > { %v3670_v38 = vsel %vm5145_vm15, %v4503_v26, %v3669_v3  ;;  %v5974_v8 = vpop.eup %4833  ;;  %2499 = vst [vmem:[#allocation3 + $0x3c] sm:$0x1] %v2498_v60  ;;  %v2845_v26 = vrot.slane %v2843_v44, 5  ;;  %v2897_v3 = vld [vmem:[#allocation3 + $0x28] sm:$0xe]  ;;  %v3297_v16 = vshrl.u32 %v3276_v36, 16 }
 0x285   : > { %3687 = vst.msk [vmem:[#allocation4 + $0x8] sm:$0xf] %vm278_vm7, %v3670_v38  ;;  %v2419_v45 = vmul.f32 %v5974_v8, %v5946_v23  ;;  %vm2424_vm14 = vweird.f32 %v5974_v8  ;;  %v2577_v23 = vsel %vm5075_vm10, %v2572_v52, %v2576_v32  ;;  %v4392_v47 = vrot.slane %v2897_v3, 9  ;;  %v3274_v2 = vld [vmem:[#allocation3 + $0x20] sm:$0xf] }
 0x286   : > { %vm2425_vm4 = vmor %vm2423_vm9, %vm2424_vm14  ;;  %2584 = vrot.lane.b32.xlu1 %v2577_v23, %s4932_s20  ;;  %v2846_v5 = vsel %vm5075_vm10, %v2841_v20, %v2845_v26  ;;  %v2918_v25 = vsel %vm5145_vm15, %v4391_v13, %v2917_v17  ;;  %v2815_v31 = vld [vmem:[#allocation3 + $0x20] sm:$0xf]  ;;  %v3283_v43 = vshrl.u32 %v3274_v2, 16  ;;  %v3286_v46 = vshll.u32 %v3274_v2, 16  ;;  %v2503_v59 = vld [vmem:[#allocation3 + $0x44] sm:$0x1] }
 0x287   : > { %v2420_v51 = vsub.f32 1.0, %v2419_v45  ;;  %2877 = vrot.lane.b32.xlu2 %v2846_v5, %s4934_s22  ;;  %2929 = vst.msk [vmem:[#allocation4 + $0x20] sm:$0xf] %vm278_vm7, %v2918_v25  ;;  %v2769_v50 = vsel %vm5145_vm15, %v4388_v54, %v2768_v41  ;;  %v2848_v44 = vshrl.u32 %v2815_v31, 16  ;;  %v2851_v58 = vshll.u32 %v2815_v31, 16 }
 0x288   : > { %v2500_v55 = vld [vmem:[#allocation3 + $0x40] sm:$0xf]  ;;  %v3285_v33 = vrot.slane %v3283_v43, 4  ;;  %v3288_v57 = vrot.slane %v3286_v46, 5  ;;  %v2790_v23 = vld [vmem:[#allocation3 + $0x28] sm:$0xf] }
 0x289   : > { %v2421_v6 = vmul.f32 %v5974_v8, %v2420_v51  ;;  %v3681_v51 = vrot.slane %v3658_v42, 5  ;;  %v2850_v35 = vrot.slane %v2848_v44, 4  ;;  %v2853_v0 = vrot.slane %v2851_v58, 5  ;;  %v3275_v20 = vld [vmem:[#allocation3 + $0x24] sm:$0x1] }
 0x28a   : > { %v3653_v12 = vld [vmem:[#allocation3 + $0x38] sm:$0xe]  ;;  %v3289_v4 = vor.u32 %v3288_v57, %v3285_v33  ;;  %v2816_v13 = vld [vmem:[#allocation3 + $0x24] sm:$0x1]  ;;  %v3300_v17 = vshll.u32 %v3276_v36, 16 }
 0x28b   : > { %v2422_v1 = vadd.f32 %v5974_v8, %v2421_v6  ;;  %v3654_v29 = vld [vmem:[#allocation3 + $0x3c] sm:$0x1]  ;;  %v4504_v45 = vrot.slane %v3653_v12, 9  ;;  %2774 = vrot.lane.b32.xlu0 %v2765_v48, %s4932_s20  ;;  %v3682_v60 = vsel %vm5145_vm15, %v4506_v27, %v3681_v51  ;;  %v2854_v11 = vor.u32 %v2853_v0, %v2850_v35  ;;  %v3403_v28 = vld [vmem:[#allocation3 + $0x30] sm:$0xf]  ;;  %v4684_v51 = vld [vmem:[%s6395_s5 + $0x38] sm:$0xff] }
 0x28c   : > { %v3673_v40 = vrot.slane %v3654_v29, 5  ;;  %v3302_v54 = vrot.slane %v3300_v17, 5  ;;  %v3277_v31 = vld [vmem:[#allocation3 + $0x2c] sm:$0x1]  ;;  %v2669_v44 = vld [vmem:[#allocation3 + $0x14] sm:$0x1]  ;;  %3123 = vmatpush.bf16.msra.mxu0 %v4684_v51 }
 0x28d   : > { %v2426_v14 = vsel %vm2425_vm4, %v5974_v8, %v2422_v1  ;;  %v3355_v8 = vld [vmem:[#allocation3 + $0x24] sm:$0x1]  ;;  %v2668_v1 = vld [vmem:[#allocation3 + $0x10] sm:$0xf]  ;;  %v2855_v25 = vrot.slane %v2854_v11, 4  ;;  %v2698_v33 = vshll.u32 %v2669_v44, 16 }
 0x28e   : > { %v2431_v38 = vsel %vm5980_vm13, %v5969_v19, %v2426_v14  ;;  %v2922_v19 = vsel %vm5145_vm15, %v4392_v47, %v2921_v15  ;;  %v3372_v30 = vrot.slane %v3355_v8, 5  ;;  %v3674_v9 = vsel %vm5145_vm15, %v4504_v45, %v3673_v40  ;;  %2776 = vrot.lane.b32.xlu1 %v2769_v50, %s4932_s20  ;;  %v4415_v62 = vld [vmem:[#allocation4 + $0x20] sm:$0xf]  ;;  %v2817_v14 = vld [vmem:[#allocation3 + $0x28] sm:$0xf] }
 0x28f   : > { %v2436_v22 = vmul.f32 %v2431_v38, %v5925_v10  ;;  %2930 = vst.msk [vmem:[#allocation4 + $0x2c] sm:$0xf] %vm278_vm7, %v2922_v19  ;;  %v4495_v10 = vrot.slane %v3354_v21, 9  ;;  %v3292_v47 = vshll.u32 %v3275_v20, 16  ;;  %v2689_v38 = vshrl.u32 %v2668_v1, 16 }
 0x290   : > { %3688 = vst.msk [vmem:[#allocation4 + $0x14] sm:$0xf] %vm278_vm7, %v3674_v9  ;;  %v2692_v5 = vshll.u32 %v2668_v1, 16  ;;  %v2857_v15 = vshll.u32 %v2816_v13, 16  ;;  %v2862_v18 = vshrl.u32 %v2817_v14, 16  ;;  %v2865_v21 = vshll.u32 %v2817_v14, 16 }
 0x291   : > { %v2440_v39 = vpack.c.bf16 %v2436_v22, %v2436_v22  ;;  %v3373_v6 = vsel %vm5145_vm15, %v4495_v10, %v3372_v30  ;;  %v3290_v22 = vrot.slane %v3289_v4, 4  ;;  %v3299_v8 = vrot.slane %v3297_v16, 4  ;;  %v3356_v40 = vld [vmem:[#allocation3 + $0x28] sm:$0xe]  ;;  %v3357_v42 = vld [vmem:[#allocation3 + $0x2c] sm:$0x1] }
 0x292   : > { %3386 = vrot.lane.b32.xlu2 %v3373_v6, %s4933_s21  ;;  %v3294_v19 = vrot.slane %v3292_v47, 5  ;;  %v2691_v2 = vrot.slane %v2689_v38, 4  ;;  %v2859_v10 = vrot.slane %v2857_v15, 5  ;;  %v2864_v29 = vrot.slane %v2862_v18, 4  ;;  %v2818_v50 = vld [vmem:[#allocation3 + $0x2c] sm:$0x1] }
 0x293   : > { %v2466_v34 = vshrl.u32 %v2440_v39, 16  ;;  %v2469_v32 = vshll.u32 %v2440_v39, 16  ;;  %2801 = vrot.lane.b32.xlu0 %v2790_v23, %s4933_s21  ;;  %v2694_v39 = vrot.slane %v2692_v5, 5  ;;  %v2867_v45 = vrot.slane %v2865_v21, 5  ;;  %v2506_v6 = vld [vmem:[#allocation3] sm:$0xf] }
 0x294   : > { %v3295_v30 = vsel %vm5075_vm10, %v3290_v22, %v3294_v19  ;;  %v3303_v43 = vor.u32 %v3302_v54, %v3299_v8  ;;  %2510 = vst.msk [vmem:[#allocation4] sm:$0xf] %vm278_vm7, %v2506_v6  ;;  %v3498_v1 = vld [vmem:[#allocation3 + $0x28] sm:$0xe]  ;;  %v3278_v36 = vld [vmem:[#allocation3 + $0x30] sm:$0xf] }
 0x295   : > { %v2468_v52 = vrot.slane %v2466_v34, 7  ;;  %v2860_v34 = vsel %vm5075_vm10, %v2855_v25, %v2859_v10  ;;  %v2868_v9 = vor.u32 %v2867_v45, %v2864_v29  ;;  %v2695_v58 = vor.u32 %v2694_v39, %v2691_v2  ;;  %v3500_v23 = vld [vmem:[#allocation3 + $0x30] sm:$0xe]  ;;  %v3501_v20 = vld [vmem:[#allocation3 + $0x34] sm:$0x1]  ;;  %v4682_v4 = vld [vmem:[%s6395_s5 + $0x28] sm:$0xff] }
 0x296   : > { %v4676_v53 = vld [vmem:[#allocation4 + $0x28] sm:$0xf0]  ;;  %3410 = vrot.lane.b32.xlu1 %v3402_v49, %s4934_s22  ;;  %v4499_v14 = vrot.slane %v3498_v1, 9  ;;  %v3358_v16 = vld [vmem:[#allocation3 + $0x30] sm:$0xe]  ;;  %v3311_v47 = vshrl.u32 %v3278_v36, 16 }
 0x297   : > { %v2471_v61 = vor.u32 %v2469_v32, %v2468_v52  ;;  %v2472_v56 = vrot.slane %v2468_v52, 4  ;;  %3690 = vst.msk [vmem:[#allocation4 + $0x2c] sm:$0xf] %vm278_vm7, %v3682_v60  ;;  %v4416_v3 = vor.u32 %v4676_v53, %v4415_v62  ;;  %v3547_v52 = vld [vmem:[#allocation3 + $0x30] sm:$0xf]  ;;  %v3306_v32 = vshll.u32 %v3277_v31, 16 }
 0x298   : > { %v4683_v60 = vld [vmem:[%s6395_s5 + $0x30] sm:$0xff]  ;;  %v2869_v53 = vrot.slane %v2868_v9, 4  ;;  %v2696_v35 = vrot.slane %v2695_v58, 4  ;;  %v3359_v17 = vld [vmem:[#allocation3 + $0x34] sm:$0x1]  ;;  %v4500_v5 = vrot.slane %v3500_v23, 9 }
 0x299   : > { %v2501_v63 = vsel %vm5261_vm8, %v2471_v61, %v2500_v55  ;;  %v2504_v26 = vsel %vm5034_vm3, %v2472_v56, %v2503_v59  ;;  %4490 = vmatmul.msk.bf16.gmra.mxu2 %vm1469_vm0, %v4416_v3  ;;  %v4496_v55 = vrot.slane %v3356_v40, 9  ;;  %v3376_v59 = vrot.slane %v3357_v42, 5  ;;  %3124 = vmatpush.bf16.msra.mxu0 %v4683_v60  ;;  %v4681_v38 = vld [vmem:[%s6395_s5 + $0x20] sm:$0xff]  ;;  %v3573_v8 = vld [vmem:[#allocation3 + $0x38] sm:$0xf]  ;;  %v4679_v60 = vld [vmem:[%s6395_s5 + $0x10] sm:$0xff] }
 0x29a   : > { %2502 = vst [vmem:[#allocation3 + $0x40] sm:$0xf] %v2501_v63  ;;  %3412 = vrot.lane.b32.xlu2 %v3403_v28, %s4934_s22  ;;  %v3304_v61 = vrot.slane %v3303_v43, 4  ;;  %v2871_v56 = vshll.u32 %v2818_v50, 16  ;;  %v3308_v57 = vrot.slane %v3306_v32, 5  ;;  %v2700_v3 = vrot.slane %v2698_v33, 5 }
 0x29b   : > { %2505 = vst [vmem:[#allocation3 + $0x44] sm:$0x1] %v2504_v26  ;;  %3338 = vrot.lane.b32.xlu0 %v3295_v30, %s4932_s20  ;;  %v3377_v0 = vsel %vm5145_vm15, %v4496_v55, %v3376_v59  ;;  %v3499_v63 = vld [vmem:[#allocation3 + $0x2c] sm:$0x1]  ;;  %v3520_v28 = vrot.slane %v3501_v20, 5  ;;  %v3314_v18 = vshll.u32 %v3278_v36, 16 }
 0x29c   : > { %v3309_v26 = vsel %vm5075_vm10, %v3304_v61, %v3308_v57  ;;  %v2873_v62 = vrot.slane %v2871_v56, 5  ;;  %v3516_v49 = vrot.slane %v3499_v63, 5  ;;  %v2701_v11 = vsel %vm5075_vm10, %v2696_v35, %v2700_v3  ;;  %v6076_v15 = vpop.permute.xlu2 %2626  ;;  %v3571_v21 = vld [vmem:[#allocation3 + $0x30] sm:$0xf]  ;;  %v2509_v39 = vld [vmem:[#allocation3 + $0x18] sm:$0xf] }
 0x29d   : > { %3125 = vmatpush.bf16.msra.mxu0 %v4682_v4  ;;  %2735 = vst.msk [vmem:[#allocation4 + $0x10] sm:$0xf] %vm278_vm7, %v2701_v11  ;;  %v4497_v22 = vrot.slane %v3358_v16, 9  ;;  %v3380_v25 = vrot.slane %v3359_v17, 5  ;;  %v2508_v54 = vld [vmem:[#allocation3 + $0x10] sm:$0xf] }
 0x29e   : > { %2879 = vrot.lane.b32.xlu1 %v2860_v34, %s4934_s22  ;;  %v2874_v13 = vsel %vm5075_vm10, %v2869_v53, %v2873_v62  ;;  %v6081_v19 = vrot.slane %v3311_v47, 4  ;;  %v3580_v2 = vshrl.u32 %v3571_v21, 16  ;;  %2512 = vst.msk [vmem:[#allocation4 + $0x18] sm:$0xf] %vm278_vm7, %v2508_v54  ;;  %v3583_v10 = vshll.u32 %v3571_v21, 16  ;;  %v4678_v17 = vld [vmem:[%s6395_s5 + $0x8] sm:$0xff] }
 0x29f   : > { %2513 = vst.msk [vmem:[#allocation4 + $0x24] sm:$0xf] %vm278_vm7, %v2509_v39  ;;  %v2670_v29 = vld [vmem:[#allocation3 + $0x18] sm:$0xf]  ;;  %v3594_v45 = vshrl.u32 %v3573_v8, 16  ;;  %v3381_v40 = vsel %vm5145_vm15, %v4497_v22, %v3380_v25  ;;  %v3597_v42 = vshll.u32 %v3573_v8, 16 }
 0x2a0   : > { %v2671_v30 = vld [vmem:[#allocation3 + $0x1c] sm:$0x1]  ;;  %v2703_v31 = vshrl.u32 %v2670_v29, 16  ;;  %v2706_v34 = vshll.u32 %v2670_v29, 16  ;;  %v2673_v50 = vld [vmem:[#allocation3 + $0x24] sm:$0x1] }
 0x2a1   : > { %v3655_v41 = vld [vmem:[#allocation3 + $0x40] sm:$0xe]  ;;  %3126 = vmatpush.bf16.msra.mxu0 %v4681_v38  ;;  %v2712_v43 = vshll.u32 %v2671_v30, 16  ;;  %v3582_v9 = vrot.slane %v3580_v2, 4  ;;  %v3585_v58 = vrot.slane %v3583_v10, 5  ;;  %v2726_v57 = vshll.u32 %v2673_v50, 16 }
 0x2a2   : > { %v3656_v12 = vld [vmem:[#allocation3 + $0x44] sm:$0x1]  ;;  %v4505_v27 = vrot.slane %v3655_v41, 9  ;;  %3555 = vrot.lane.b32.xlu2 %v3547_v52, %s4933_s21  ;;  %v3517_v41 = vsel %vm5145_vm15, %v4499_v14, %v3516_v49  ;;  %v2705_v51 = vrot.slane %v2703_v31, 4  ;;  %v2708_v44 = vrot.slane %v2706_v34, 5  ;;  %v4692_v25 = vld [vmem:[%s6395_s5 + $0x78] sm:$0xff] }
 0x2a3   : > { %v3677_v48 = vrot.slane %v3656_v12, 5  ;;  %3388 = vrot.lane.b32.xlu0 %v3377_v0, %s4933_s21  ;;  %v3521_v12 = vsel %vm5145_vm15, %v4500_v5, %v3520_v28  ;;  %v3280_v55 = vld [vmem:[#allocation3 + $0x38] sm:$0xf]  ;;  %v382_v6 = vld [vmem:[#allocation3 + $0x48] sm:$0x1]  ;;  %v3596_v1 = vrot.slane %v3594_v45, 4  ;;  %v3586_v14 = vor.u32 %v3585_v58, %v3582_v9  ;;  %3142 = vmatpush.bf16.msra.mxu1 %v4692_v25 }
 0x2a4   : > { %v3548_v59 = vld [vmem:[#allocation3 + $0x38] sm:$0xf]  ;;  %v2709_v61 = vor.u32 %v2708_v44, %v2705_v51  ;;  %v3279_v0 = vld [vmem:[#allocation3 + $0x34] sm:$0x1]  ;;  %v3599_v63 = vrot.slane %v3597_v42, 5  ;;  %v2714_v4 = vrot.slane %v2712_v43, 5 }
 0x2a5   : > { %v3678_v46 = vsel %vm5145_vm15, %v4505_v27, %v3677_v48  ;;  %v6087_v27 = vrot.slane %v3314_v18, 5  ;;  %v4680_v48 = vld [vmem:[%s6395_s5 + $0x18] sm:$0xff]  ;;  %v3404_v53 = vld [vmem:[#allocation3 + $0x38] sm:$0xf]  ;;  %v3572_v36 = vld [vmem:[#allocation3 + $0x34] sm:$0x1] }
 0x2a6   : > { %3689 = vst.msk [vmem:[#allocation4 + $0x20] sm:$0xf] %vm278_vm7, %v3678_v46  ;;  %3340 = vrot.lane.b32.xlu1 %v3309_v26, %s4932_s20  ;;  %v2672_v46 = vld [vmem:[#allocation3 + $0x20] sm:$0xf]  ;;  %3127 = vmatpush.bf16.msra.mxu0 %v4680_v48  ;;  %v383_v26 = vsel %vm5034_vm3, 0, %v382_v6  ;;  %v2710_v20 = vrot.slane %v2709_v61, 4  ;;  %v3600_v21 = vor.u32 %v3599_v63, %v3596_v1 }
 0x2a7   : > { %v2717_v52 = vshrl.u32 %v2672_v46, 16  ;;  %v2720_v32 = vshll.u32 %v2672_v46, 16  ;;  %v3317_v62 = vor.u32 %v6087_v27, %v6081_v19  ;;  %384 = vst [vmem:[#allocation3 + $0x48] sm:$0x1] %v383_v26  ;;  %v3574_v49 = vld [vmem:[#allocation3 + $0x3c] sm:$0x1] }
 0x2a8   : > { %v3325_v11 = vshrl.u32 %v3280_v55, 16  ;;  %v3328_v7 = vshll.u32 %v3280_v55, 16  ;;  %v3320_v16 = vshll.u32 %v3279_v0, 16  ;;  %v2715_v47 = vsel %vm5075_vm10, %v2710_v20, %v2714_v4  ;;  %v3405_v28 = vld [vmem:[#allocation3 + $0x40] sm:$0xf]  ;;  %v4690_v46 = vld [vmem:[%s6395_s5 + $0x68] sm:$0xff] }
 0x2a9   : > { %v2719_v56 = vrot.slane %v2717_v52, 4  ;;  %v2722_v33 = vrot.slane %v2720_v32, 5  ;;  %v2728_v5 = vrot.slane %v2726_v57, 5  ;;  %v3589_v18 = vshll.u32 %v3572_v36, 16  ;;  %2736 = vst.msk [vmem:[#allocation4 + $0x1c] sm:$0xf] %vm278_vm7, %v2715_v47 }
 0x2aa   : > { %2881 = vrot.lane.b32.xlu2 %v2874_v13, %s4934_s22  ;;  %3128 = vmatpush.bf16.msra.mxu0 %v4679_v60  ;;  %v3318_v22 = vrot.slane %v3317_v62, 4  ;;  %v3587_v54 = vrot.slane %v3586_v14, 4  ;;  %v3327_v19 = vrot.slane %v3325_v11, 4  ;;  %v3330_v2 = vrot.slane %v3328_v7, 5  ;;  %v3281_v29 = vld [vmem:[#allocation3 + $0x3c] sm:$0x1] }
 0x2ab   : > { %3530 = vrot.lane.b32.xlu0 %v3517_v41, %s4932_s20  ;;  %v2723_v13 = vor.u32 %v2722_v33, %v2719_v56  ;;  %v3603_v41 = vshll.u32 %v3574_v49, 16  ;;  %v3322_v39 = vrot.slane %v3320_v16, 5  ;;  %v3601_v27 = vrot.slane %v3600_v21, 4  ;;  %v4691_v45 = vld [vmem:[%s6395_s5 + $0x70] sm:$0xff]  ;;  %v3360_v31 = vld [vmem:[#allocation3 + $0x38] sm:$0xe] }
 0x2ac   : > { %v6100_v35 = vpop.permute.xlu2 %2652  ;;  %v3361_v34 = vld [vmem:[#allocation3 + $0x3c] sm:$0x1]  ;;  %3143 = vmatpush.bf16.msra.mxu1 %v4691_v45  ;;  %v3266_v50 = vld [vmem:[#allocation3 + $0x20] sm:$0xf]  ;;  %v3334_v44 = vshll.u32 %v3281_v29, 16  ;;  %v4498_v52 = vrot.slane %v3360_v31, 9 }
 0x2ad   : > { %v2724_v38 = vrot.slane %v2723_v13, 4  ;;  %v3323_v10 = vsel %vm5075_vm10, %v3318_v22, %v3322_v39  ;;  %v3605_v30 = vrot.slane %v3603_v41, 5  ;;  %v3384_v32 = vrot.slane %v3361_v34, 5  ;;  %v3575_v55 = vld [vmem:[#allocation3 + $0x40] sm:$0xf]  ;;  %v4688_v13 = vld [vmem:[%s6395_s5 + $0x58] sm:$0xff] }
 0x2ae   : > { %3532 = vrot.lane.b32.xlu1 %v3521_v12, %s4932_s20  ;;  %3129 = vmatpush.bf16.msra.mxu0 %v4678_v17  ;;  %v3591_v12 = vrot.slane %v3589_v18, 5  ;;  %v3336_v60 = vrot.slane %v3334_v44, 5  ;;  %v3502_v61 = vld [vmem:[#allocation3 + $0x38] sm:$0xe]  ;;  %v3503_v56 = vld [vmem:[#allocation3 + $0x3c] sm:$0x1] }
 0x2af   : > { %v2729_v8 = vsel %vm5075_vm10, %v2724_v38, %v2728_v5  ;;  %v3606_v51 = vsel %vm5075_vm10, %v3601_v27, %v3605_v30  ;;  %v3385_v6 = vsel %vm5145_vm15, %v4498_v52, %v3384_v32  ;;  %v3608_v33 = vshrl.u32 %v3575_v55, 16  ;;  %v3505_v0 = vld [vmem:[#allocation3 + $0x44] sm:$0x1]  ;;  %v3549_v63 = vld [vmem:[#allocation3 + $0x40] sm:$0xf]  ;;  %v4686_v27 = vld [vmem:[%s6395_s5 + $0x48] sm:$0xff] }
 0x2b0   : > { %2737 = vst.msk [vmem:[#allocation4 + $0x28] sm:$0xf] %vm278_vm7, %v2729_v8  ;;  %v3592_v48 = vsel %vm5075_vm10, %v3587_v54, %v3591_v12  ;;  %3144 = vmatpush.bf16.msra.mxu1 %v4690_v46  ;;  %v3611_v1 = vshll.u32 %v3575_v55, 16  ;;  %v4501_v26 = vrot.slane %v3502_v61, 9  ;;  %v3524_v36 = vrot.slane %v3503_v56, 5  ;;  %v4687_v47 = vld [vmem:[%s6395_s5 + $0x50] sm:$0xff] }
 0x2b1   : > { %v3610_v20 = vrot.slane %v3608_v33, 4  ;;  %v3577_v14 = vld [vmem:[#allocation3 + $0x48] sm:$0xf]  ;;  %v3578_v49 = vld [vmem:[#allocation3 + $0x4c] sm:$0x1] }
 0x2b2   : > { %3390 = vrot.lane.b32.xlu2 %v3381_v40, %s4933_s21  ;;  %v3331_v40 = vor.u32 %v3330_v2, %v3327_v19  ;;  %v3613_v4 = vrot.slane %v3611_v1, 5  ;;  %v3622_v11 = vshrl.u32 %v3577_v14, 16  ;;  %v3625_v7 = vshll.u32 %v3577_v14, 16  ;;  %v3576_v5 = vld [vmem:[#allocation3 + $0x44] sm:$0x1]  ;;  %v4708_v32 = vld [vmem:[%s6395_s5 + $0x38] sm:$0xff] }
 0x2b3   : > { %3557 = vrot.lane.b32.xlu0 %v3548_v59, %s4933_s21  ;;  %v4689_v59 = vld [vmem:[%s6395_s5 + $0x60] sm:$0xff]  ;;  %v3631_v16 = vshll.u32 %v3578_v49, 16  ;;  %v3525_v38 = vsel %vm5145_vm15, %v4501_v26, %v3524_v36  ;;  %v3617_v54 = vshll.u32 %v3576_v5, 16  ;;  %v3550_v24 = vld [vmem:[#allocation3 + $0x48] sm:$0xf]  ;;  %3883 = vmatpush.bf16.msra.mxu3 %v4708_v32  ;;  %v4703_v5 = vld [vmem:[%s6395_s5 + $0x10] sm:$0xff] }
 0x2b4   : > { %v2579_v3 = vpop.permute.xlu0 %2578  ;;  %v3332_v9 = vrot.slane %v3331_v40, 4  ;;  %3145 = vmatpush.bf16.msra.mxu1 %v4689_v59  ;;  %v3627_v18 = vrot.slane %v3625_v7, 5  ;;  %v3614_v22 = vor.u32 %v3613_v4, %v3610_v20  ;;  %v3267_v30 = vld [vmem:[#allocation3 + $0x28] sm:$0xf]  ;;  %v3428_v34 = vld [vmem:[#allocation3 + $0x30] sm:$0xf] }
 0x2b5   : > { %2590 = vst.msk [vmem:[#allocation4] sm:$0xf] %vm936_vm1, %v2579_v3  ;;  %v2796_v42 = vpop.permute.xlu2 %2795  ;;  %v3633_v25 = vrot.slane %v3631_v16, 5  ;;  %v3619_v12 = vrot.slane %v3617_v54, 5  ;;  %v3452_v46 = vshll.u32 %v3428_v34, 16  ;;  %v4704_v49 = vld [vmem:[%s6395_s5 + $0x18] sm:$0xff] }
 0x2b6   : > { %3414 = vrot.lane.b32.xlu1 %v3404_v53, %s4934_s22  ;;  %2638 = vst.msk [vmem:[#allocation4] sm:$0xf] %vm988_vm2, %v6076_v15  ;;  %v4677_v15 = vld [vmem:[%s6395_s5] sm:$0xff]  ;;  %v3337_v57 = vsel %vm5075_vm10, %v3332_v9, %v3336_v60  ;;  %v3504_v53 = vld [vmem:[#allocation3 + $0x40] sm:$0xe]  ;;  %v3615_v2 = vrot.slane %v3614_v22, 4 }
 0x2b7   : > { %3130 = vmatpush.bf16.msra.mxu0 %v4677_v15  ;;  %v4502_v3 = vrot.slane %v3504_v53, 9  ;;  %v3454_v52 = vrot.slane %v3452_v46, 5  ;;  %v3429_v55 = vld [vmem:[#allocation3 + $0x34] sm:$0x1]  ;;  %v4706_v53 = vld [vmem:[%s6395_s5 + $0x28] sm:$0xff]  ;;  %v4715_v54 = vld [vmem:[%s6395_s5 + $0x70] sm:$0xff] }
 0x2b8   : > { %3146 = vmatpush.bf16.msra.mxu1 %v4688_v13  ;;  %v3458_v61 = vshll.u32 %v3429_v55, 16 }
 0x2ba   : > { %v2651_v23 = vpop.permute.xlu1 %2650  ;;  %3416 = vrot.lane.b32.xlu2 %v3405_v28, %s4934_s22  ;;  %v3624_v28 = vrot.slane %v3622_v11, 4  ;;  %v3460_v26 = vrot.slane %v3458_v61, 5 }
 0x2bb   : > { %2662 = vst.msk [vmem:[#allocation4] sm:$0xf] %vm1013_vm6, %v2651_v23  ;;  %3342 = vrot.lane.b32.xlu0 %v3323_v10, %s4932_s20  ;;  %v3528_v23 = vrot.slane %v3505_v0, 5  ;;  %v3620_v10 = vsel %vm5075_vm10, %v3615_v2, %v3619_v12  ;;  %v4701_v2 = vld [vmem:[%s6395_s5] sm:$0xff] }
 0x2bc   : > { %v2629_v58 = vpop.permute.xlu0 %2628  ;;  %v3628_v15 = vor.u32 %v3627_v18, %v3624_v28  ;;  %3147 = vmatpush.bf16.msra.mxu1 %v4687_v47 }
 0x2bd   : > { %v6155_v62 = vpop.permute.xlu2 %2630  ;;  %v3529_v21 = vsel %vm5145_vm15, %v4502_v3, %v3528_v23  ;;  %v4705_v3 = vld [vmem:[%s6395_s5 + $0x20] sm:$0xff]  ;;  %v3427_v23 = vld [vmem:[#allocation3 + $0x2c] sm:$0x1]  ;;  %vm3260_vm15 = vcmask 523264  }
 0x2be   : > { %3635 = vrot.lane.b32.xlu1 %v3592_v48, %s4934_s22  ;;  %v3629_v19 = vrot.slane %v3628_v15, 4 }
 0x2c0   : > { %v3634_v39 = vsel %vm5075_vm10, %v3629_v19, %v3633_v25  ;;  %3148 = vmatpush.bf16.msra.mxu1 %v4686_v27  ;;  %v3432_v25 = vld [vmem:[#allocation3 + $0x40] sm:$0xf]  ;;  %v4714_v27 = vld [vmem:[%s6395_s5 + $0x68] sm:$0xff] }
 0x2c1   : > { %v3480_v12 = vshll.u32 %v3432_v25, 16 }
 0x2c2   : > { %v6137_v43 = vld [vmem:[#allocation4] sm:$0xf]  ;;  %3637 = vrot.lane.b32.xlu2 %v3606_v51, %s4934_s22 }
 0x2c3   : > { %3270 = vst.msk [vmem:[#allocation4] sm:$0xf] %vm278_vm7, %v3266_v50  ;;  %3392 = vrot.lane.b32.xlu0 %v3385_v6, %s4933_s21 }
 0x2c5   : > { %v6173_v41 = vpop.permute.xlu2 %2656 }
 0x2c6   : > { %3344 = vrot.lane.b32.xlu1 %v3337_v57, %s4932_s20  ;;  %v2771_v17 = vpop.permute.xlu0 %2770 }
 0x2c7   : > { %2782 = vst.msk [vmem:[#allocation4 + $0x4] sm:$0xf] %vm936_vm1, %v2771_v17 }
 0x2c8   : > { %2807 = vst.msk [vmem:[#allocation4 + $0x4] sm:$0xf] %vm988_vm2, %v2796_v42  ;;  %v3449_v42 = vshrl.u32 %v3428_v34, 16 }
 0x2ca   : > { %3559 = vrot.lane.b32.xlu2 %v3549_v63, %s4933_s21  ;;  %v3451_v44 = vrot.slane %v3449_v42, 4  ;;  %v3433_v42 = vld [vmem:[#allocation3 + $0x44] sm:$0x1] }
 0x2cb   : > { %3534 = vrot.lane.b32.xlu0 %v3525_v38, %s4932_s20  ;;  %v3268_v38 = vld [vmem:[#allocation3 + $0x30] sm:$0xf] }
 0x2cc   : > { %v3455_v59 = vor.u32 %v3454_v52, %v3451_v44  ;;  %v3486_v44 = vshll.u32 %v3433_v42, 16  ;;  %v4712_v52 = vld [vmem:[%s6395_s5 + $0x58] sm:$0xff] }
 0x2ce   : > { %3536 = vrot.lane.b32.xlu1 %v3529_v21, %s4932_s20  ;;  %v3456_v57 = vrot.slane %v3455_v59, 4  ;;  %v4716_v21 = vld [vmem:[%s6395_s5 + $0x78] sm:$0xff]  ;;  %v4711_v59 = vld [vmem:[%s6395_s5 + $0x50] sm:$0xff]  ;;  %v3488_v61 = vrot.slane %v3486_v44, 5  ;;  %s269_s20 = sand.u32 1, %s4921_s25  }
 0x2cf   : > { %3902 = vmatpush.bf16.msrb.mxu0 %v4716_v21  ;;  %s4106_s18 = sshll.u32 %s269_s20, 6  ;;  %s4025_s14 = scalar_lea.sflag [#allocation6], %s269_s20 }
 0x2d0   : > { %v3461_v20 = vsel %vm5075_vm10, %v3456_v57, %v3460_v26  ;;  %v4709_v26 = vld [vmem:[%s6395_s5 + $0x40] sm:$0xff]  ;;  %s6328_s19 = scalar_lea.vmem [#allocation5], %s4106_s18 }
 0x2d1   : > { %s4037_s13 = sshll.u32 %s6328_s19, 4  ;;  %s4038_s13 = int_to_ptr.vmem [resolvable:$true] %s4037_s13 }
 0x2d2   : > { %3641 = vrot.lane.b32.xlu2 %v3634_v39, %s4934_s22  ;;  %v3477_v39 = vshrl.u32 %v3432_v25, 16  ;;  %v4700_v25 = vld [vmem:[#allocation4 + $0x28] sm:$0xf0] }
 0x2d3   : > { %v2581_v8 = vpop.permute.xlu1 %2580  ;;  %3561 = vrot.lane.b32.xlu0 %v3550_v24, %s4933_s21  ;;  %3903 = vmatpush.bf16.msrb.mxu0 %v4715_v54 }
 0x2d4   : > { %2591 = vst.msk [vmem:[#allocation4 + $0xc] sm:$0xf] %vm936_vm1, %v2581_v8  ;;  %v6192_v45 = vpop.permute.xlu2 %2799  ;;  %v4702_v8 = vld [vmem:[%s6395_s5 + $0x8] sm:$0xff] }
 0x2d5   : > { %2639 = vst.msk [vmem:[#allocation4 + $0xc] sm:$0xf] %vm988_vm2, %v2629_v58  ;;  %v4707_v58 = vld [vmem:[%s6395_s5 + $0x30] sm:$0xff] }
 0x2d6   : > { %2663 = vst.msk [vmem:[#allocation4 + $0xc] sm:$0xf] %vm1013_vm6, %v6100_v35  ;;  %v4685_v35 = vld [vmem:[%s6395_s5 + $0x40] sm:$0xff]  ;;  %3639 = vrot.lane.b32.xlu1 %v3620_v10, %s4934_s22  ;;  %3884 = vmatpush.bf16.msra.mxu3 %v4707_v58  ;;  %v4718_v10 = vld [vmem:[%s6395_s5 + $0x88] sm:$0xff]  ;;  %s4719_s22 = sshll.u32 %s4998_s28, 6 }
 0x2d7   : > { %3149 = vmatpush.bf16.msra.mxu1 %v4685_v35  ;;  %v4717_v35 = vld [vmem:[%s6395_s5 + $0x80] sm:$0xff]  ;;  %3904 = vmatpush.bf16.msrb.mxu0 %v4714_v27  ;;  %s4036_s9 = scalar_lea.hbm %s6397_s7, %s4719_s22 }
 0x2d8   : > { %s4039_s28 = sshll.u32 %s4036_s9, 4  ;;  %s4040_s28 = int_to_ptr.hbm [resolvable:$true] %s4039_s28 }
 0x2d9   : > { %s4881_s15 = sshra.s32 %s4040_s28, 4  ;;  %s4882_s15 = int_to_ptr.hbm [resolvable:$true] %s4881_s15 }
 0x2da   : > { %3885 = vmatpush.bf16.msra.mxu3 %v4706_v53  ;;  %v4710_v53 = vld [vmem:[%s6395_s5 + $0x48] sm:$0xff]  ;;  %s4883_s16 = scalar_lea.hbm %s4882_s15, 64  ;;  %p4888_p0 = scmp.lt.s32.totalorder %s4882_s15, %s6397_s7 }
 0x2db   : > { %v2773_v29 = vpop.permute.xlu1 %2772  ;;  %3927 = vmatpush.bf16.msrb.mxu1 %v4718_v10  ;;  %p4884_p11 = scmp.ne.s32.totalorder %s4882_s15, %s4883_s16  ;;  %p4889_p1 = scmp.lt.s32.totalorder %s4887_s23, %s4883_s16 }
 0x2dc   : > { %2783 = vst.msk [vmem:[#allocation4 + $0x10] sm:$0xf] %vm936_vm1, %v2773_v29 }
 0x2dd   : > { %v4672_v48 = vld [vmem:[#allocation4 + $0x8] sm:$0xf0]  ;;  %p4885_p12 = pnand %p4884_p11, %p5015_p5  ;;  %p4890_p2 = por %p4889_p1, %p4888_p0 }
 0x2de   : > { %v4396_v31 = vor.u32 %v4672_v48, %v6137_v43  ;;  %3271 = vst.msk [vmem:[#allocation4 + $0xc] sm:$0xf] %vm278_vm7, %v3267_v30  ;;  %v3426_v43 = vld [vmem:[#allocation3 + $0x28] sm:$0xf]  ;;  %3886 = vmatpush.bf16.msra.mxu3 %v4705_v3  ;;  %v3479_v48 = vrot.slane %v3477_v39, 4  ;;  %v3482_v30 = vrot.slane %v3480_v12, 5 }
 0x2df   : > { %v3435_v60 = vshrl.u32 %v3426_v43, 16  ;;  %v3438_v6 = vshll.u32 %v3426_v43, 16  ;;  %3928 = vmatpush.bf16.msrb.mxu1 %v4717_v35  ;;  %p4886_p13 = pneg %p4885_p12 }
 0x2e0   : > { %3131 = vmatmul.bf16.vlgmr.msra.gmra.mxu0 %v4396_v31  ;;  %v2798_v50 = vpop.permute.xlu0 %2797  ;;  %v4713_v31 = vld [vmem:[%s6395_s5 + $0x60] sm:$0xff] }
 0x2e1   : > { %v2878_v40 = vpop.permute.xlu2 %2877  ;;  %2808 = vst.msk [vmem:[#allocation4 + $0x10] sm:$0xf] %vm988_vm2, %v2798_v50  ;;  %v3437_v0 = vrot.slane %v3435_v60, 4  ;;  %v3440_v1 = vrot.slane %v3438_v6, 5  ;;  %3905 = vmatpush.bf16.msrb.mxu0 %v4713_v31  ;;  %p4891_p3 = pnand %p4890_p2, %p4886_p13 }
 0x2e2   : > { %2888 = vst.msk [vmem:[#allocation4 + $0x10] sm:$0xf] %vm1013_vm6, %v2878_v40  ;;  %3887 = vmatpush.bf16.msra.mxu3 %v4704_v49  ;;  %v3430_v40 = vld [vmem:[#allocation3 + $0x38] sm:$0xf] }
 0x2e3   : > { %v2655_v51 = vpop.permute.xlu1 %2654  ;;  %v3441_v4 = vor.u32 %v3440_v1, %v3437_v0  ;;  %v3463_v46 = vshrl.u32 %v3430_v40, 16  ;;  %v3466_v50 = vshll.u32 %v3430_v40, 16  ;;  %v6320_v40 = vld [vmem:[%s6396_s6] ss:$0 sm:$0xff] }
 0x2e5   : > { %v3442_v11 = vrot.slane %v3441_v4, 4  ;;  %v3465_v43 = vrot.slane %v3463_v46, 4  ;;  %v3468_v58 = vrot.slane %v3466_v50, 5  ;;  %3906 = vmatpush.bf16.msrb.mxu0 %v4712_v52 }
 0x2e6   : > { %3888 = vmatpush.bf16.msra.mxu3 %v4703_v5 }
 0x2e9   : > { %v4397_v63 = vld [vmem:[#allocation4 + $0xc] sm:$0xf0]  ;;  %3907 = vmatpush.bf16.msrb.mxu0 %v4711_v59 }
 0x2ea   : > { %3495 = vst.msk [vmem:[#allocation4 + $0x10] sm:$0xf] %vm278_vm7, %v3461_v20  ;;  %3889 = vmatpush.bf16.msra.mxu3 %v4702_v8 }
 0x2eb   : > { %v2583_v56 = vpop.permute.xlu0 %2582  ;;  %v2876_v33 = vpop.permute.xlu1 %2875 }
 0x2ec   : > { %v6201_v9 = vpop.permute.xlu2 %3386  ;;  %2592 = vst.msk [vmem:[#allocation4 + $0x18] sm:$0xf] %vm936_vm1, %v2583_v56  ;;  %v3431_v56 = vld [vmem:[#allocation3 + $0x3c] sm:$0x1] }
 0x2ed   : > { %2640 = vst.msk [vmem:[#allocation4 + $0x18] sm:$0xf] %vm988_vm2, %v6155_v62  ;;  %v3444_v62 = vshll.u32 %v3427_v23, 16  ;;  %3908 = vmatpush.bf16.msrb.mxu0 %v4710_v53 }
 0x2ee   : > { %2664 = vst.msk [vmem:[#allocation4 + $0x18] sm:$0xf] %vm1013_vm6, %v2655_v51  ;;  %3890 = vmatpush.bf16.msra.mxu3 %v4701_v2  ;;  %v3483_v51 = vor.u32 %v3482_v30, %v3479_v48 }
 0x2ef   : > { %2887 = vst.msk [vmem:[#allocation4 + $0x4] sm:$0xf] %vm1013_vm6, %v2876_v33  ;;  %v3446_v17 = vrot.slane %v3444_v62, 5  ;;  %v3469_v33 = vor.u32 %v3468_v58, %v3465_v43 }
 0x2f0   : > { %v3484_v55 = vrot.slane %v3483_v51, 4 }
 0x2f1   : > { %v3447_v18 = vsel %vm5075_vm10, %v3442_v11, %v3446_v17  ;;  %3909 = vmatpush.bf16.msrb.mxu0 %v4709_v26 }
 0x2f2   : > { %v3489_v57 = vsel %vm5075_vm10, %v3484_v55, %v3488_v61 }
 0x2f4   : > { %v6213_v36 = vpop.permute.xlu2 %3412 }
 0x2f5   : > { %v2633_v13 = vpop.permute.xlu0 %2632  ;;  %v4407_v7 = vld [vmem:[#allocation4 + $0x18] sm:$0xf] }
 0x2f6   : > { %v4671_v16 = vld [vmem:[#allocation4 + $0x4] sm:$0xf]  ;;  %3272 = vst.msk [vmem:[#allocation4 + $0x18] sm:$0xf] %vm278_vm7, %v3268_v38  ;;  %v4517_v38 = vld [vmem:[#allocation4 + $0x8] sm:$0xf] }
 0x2f7   : > { %v4400_v47 = vor.u32 %v4671_v16, %v4397_v63  ;;  %3494 = vst.msk [vmem:[#allocation4 + $0x4] sm:$0xf] %vm278_vm7, %v3447_v18  ;;  %v3470_v63 = vrot.slane %v3469_v33, 4 }
 0x2f8   : > { %v2585_v14 = vpop.permute.xlu1 %2584 }
 0x2f9   : > { %2593 = vst.msk [vmem:[#allocation4 + $0x24] sm:$0xf] %vm936_vm1, %v2585_v14  ;;  %3150 = vmatmul.bf16.vlgmr.msra.gmra.mxu1 %v4400_v47  ;;  %v4697_v47 = vld [vmem:[#allocation4 + $0x10] sm:$0xf0] }
 0x2fa   : > { %2641 = vst.msk [vmem:[#allocation4 + $0x24] sm:$0xf] %vm988_vm2, %v2633_v13  ;;  %v4518_v5 = vor.u32 %v4697_v47, %v4517_v38 }
 0x2fb   : > { %2665 = vst.msk [vmem:[#allocation4 + $0x24] sm:$0xf] %vm1013_vm6, %v6173_v41  ;;  %v3269_v41 = vld [vmem:[#allocation3 + $0x38] sm:$0xf] }
 0x2fc   : > { %v6232_v28 = vpop.permute.xlu2 %3555 }
 0x2fd   : > { %v2775_v22 = vpop.permute.xlu0 %2774 }
 0x2fe   : > { %2784 = vst.msk [vmem:[#allocation4 + $0x1c] sm:$0xf] %vm936_vm1, %v2775_v22 }
 0x2ff   : > { %2809 = vst.msk [vmem:[#allocation4 + $0x1c] sm:$0xf] %vm988_vm2, %v6192_v45 }
 0x300   : > { %v2777_v15 = vpop.permute.xlu1 %2776 }
 0x301   : > { %2785 = vst.msk [vmem:[#allocation4 + $0x28] sm:$0xf] %vm936_vm1, %v2777_v15  ;;  %v4529_v15 = vld [vmem:[#allocation4 + $0x20] sm:$0xf] }
 0x302   : > { %v4675_v19 = vld [vmem:[#allocation4 + $0x20] sm:$0xf0] }
 0x303   : > { %v4408_v24 = vor.u32 %v4675_v19, %v4407_v7  ;;  %3273 = vst.msk [vmem:[#allocation4 + $0x24] sm:$0xf] %vm278_vm7, %v3269_v41  ;;  %v4530_v19 = vor.u32 %v4700_v25, %v4529_v15 }
 0x304   : > { %v2882_v29 = vpop.permute.xlu2 %2881  ;;  %v3170_v46 = vpop.f32.mrf.mxu2 }
 0x305   : > { %3136 = vmatmul.bf16.gmra.mxu0 %v4408_v24  ;;  %v2802_v45 = vpop.permute.xlu0 %2801 }
 0x306   : > { %2810 = vst.msk [vmem:[#allocation4 + $0x28] sm:$0xf] %vm988_vm2, %v2802_v45 }
 0x307   : > { %2890 = vst.msk [vmem:[#allocation4 + $0x28] sm:$0xf] %vm1013_vm6, %v2882_v29 }
 0x308   : > { %v3411_v34 = vpop.permute.xlu1 %3410 }
 0x30c   : > { %v3391_v0 = vpop.permute.xlu2 %3390  ;;  %v3172_v59 = vpop.f32.mrf.mxu2 }
 0x30d   : > { %v3339_v32 = vpop.permute.xlu0 %3338 }
 0x30e   : > { %3350 = vst.msk [vmem:[#allocation4] sm:$0xf] %vm936_vm1, %v3339_v32  ;;  %v4409_v6 = vld [vmem:[#allocation4 + $0x24] sm:$0xf0] }
 0x30f   : > { %3398 = vst.msk [vmem:[#allocation4] sm:$0xf] %vm988_vm2, %v6201_v9  ;;  %v3472_v9 = vshll.u32 %v3431_v56, 16 }
 0x310   : > { %v2880_v60 = vpop.permute.xlu1 %2879  ;;  %3422 = vst.msk [vmem:[#allocation4] sm:$0xf] %vm1013_vm6, %v3411_v34 }
 0x311   : > { %2889 = vst.msk [vmem:[#allocation4 + $0x1c] sm:$0xf] %vm1013_vm6, %v2880_v60  ;;  %v3474_v23 = vrot.slane %v3472_v9, 5 }
 0x312   : > { %3497 = vst.msk [vmem:[#allocation4 + $0x28] sm:$0xf] %vm278_vm7, %v3489_v57 }
 0x313   : > { %v3475_v62 = vsel %vm5075_vm10, %v3470_v63, %v3474_v23 }
 0x314   : > { %v3417_v13 = vpop.permute.xlu2 %3416 }
 0x315   : > { %v3389_v1 = vpop.permute.xlu0 %3388 }
 0x317   : > { %v4509_v11 = vld [vmem:[#allocation4] sm:$0xf] }
 0x318   : > { %v3341_v3 = vpop.permute.xlu1 %3340  ;;  %v4674_v20 = vld [vmem:[#allocation4 + $0x1c] sm:$0xf] }
 0x319   : > { %3351 = vst.msk [vmem:[#allocation4 + $0xc] sm:$0xf] %vm936_vm1, %v3341_v3  ;;  %v4412_v4 = vor.u32 %v4674_v20, %v4409_v6 }
 0x31a   : > { %3399 = vst.msk [vmem:[#allocation4 + $0xc] sm:$0xf] %vm988_vm2, %v3389_v1 }
 0x31b   : > { %3423 = vst.msk [vmem:[#allocation4 + $0xc] sm:$0xf] %vm1013_vm6, %v6213_v36  ;;  %3155 = vmatmul.bf16.gmra.mxu1 %v4412_v4 }
 0x31c   : > { %3496 = vst.msk [vmem:[#allocation4 + $0x1c] sm:$0xf] %vm278_vm7, %v3475_v62  ;;  %v3638_v16 = vpop.permute.xlu2 %3637 }
 0x31d   : > { %v3531_v14 = vpop.permute.xlu0 %3530 }
 0x31e   : > { %3542 = vst.msk [vmem:[#allocation4 + $0x4] sm:$0xf] %vm936_vm1, %v3531_v14 }
 0x31f   : > { %3567 = vst.msk [vmem:[#allocation4 + $0x4] sm:$0xf] %vm988_vm2, %v6232_v28 }
 0x320   : > { %v3533_v49 = vpop.permute.xlu1 %3532 }
 0x321   : > { %3543 = vst.msk [vmem:[#allocation4 + $0x10] sm:$0xf] %vm936_vm1, %v3533_v49  ;;  %v3175_v49 = vpop.f32.mrf.mxu2 }
 0x322   : > { %v4696_v36 = vld [vmem:[#allocation4 + $0x8] sm:$0xf0] }
 0x323   : > { %v4510_v7 = vor.u32 %v4696_v36, %v4509_v11 }
 0x324   : > { %v3560_v2 = vpop.permute.xlu2 %3559 }
 0x325   : > { %3891 = vmatmul.bf16.vlgmr.msra.gmra.mxu3 %v4510_v7  ;;  %v3558_v37 = vpop.permute.xlu0 %3557 }
 0x326   : > { %3568 = vst.msk [vmem:[#allocation4 + $0x10] sm:$0xf] %vm988_vm2, %v3558_v37 }
 0x327   : > { %3648 = vst.msk [vmem:[#allocation4 + $0x10] sm:$0xf] %vm1013_vm6, %v3638_v16 }
 0x328   : > { %v3415_v17 = vpop.permute.xlu1 %3414 }
 0x32b   : > { %4603 = vmatmul.msk.bf16.vlgmr.msrb.gmra.mxu1 %vm1469_vm0, %v4518_v5 }
 0x32c   : > { %v3642_v29 = vpop.permute.xlu2 %3641 }
 0x32d   : > { %v3343_v18 = vpop.permute.xlu0 %3342 }
 0x32e   : > { %3352 = vst.msk [vmem:[#allocation4 + $0x18] sm:$0xf] %vm936_vm1, %v3343_v18  ;;  %v4511_v54 = vld [vmem:[#allocation4 + $0xc] sm:$0xf0] }
 0x32f   : > { %3400 = vst.msk [vmem:[#allocation4 + $0x18] sm:$0xf] %vm988_vm2, %v3391_v0 }
 0x330   : > { %v3636_v28 = vpop.permute.xlu1 %3635  ;;  %3424 = vst.msk [vmem:[#allocation4 + $0x18] sm:$0xf] %vm1013_vm6, %v3415_v17 }
 0x331   : > { %3647 = vst.msk [vmem:[#allocation4 + $0x4] sm:$0xf] %vm1013_vm6, %v3636_v28 }
 0x335   : > { %v3393_v21 = vpop.permute.xlu0 %3392 }
 0x337   : > { %v4521_v12 = vld [vmem:[#allocation4 + $0x18] sm:$0xf] }
 0x338   : > { %v3345_v22 = vpop.permute.xlu1 %3344  ;;  %v4695_v8 = vld [vmem:[#allocation4 + $0x4] sm:$0xf] }
 0x339   : > { %3353 = vst.msk [vmem:[#allocation4 + $0x24] sm:$0xf] %vm936_vm1, %v3345_v22  ;;  %v4514_v41 = vor.u32 %v4695_v8, %v4511_v54 }
 0x33a   : > { %3401 = vst.msk [vmem:[#allocation4 + $0x24] sm:$0xf] %vm988_vm2, %v3393_v21 }
 0x33b   : > { %3425 = vst.msk [vmem:[#allocation4 + $0x24] sm:$0xf] %vm1013_vm6, %v3417_v13  ;;  %3910 = vmatmul.bf16.vlgmr.msrb.gmra.mxu0 %v4514_v41  ;;  %4604 = vmatmul.msk.bf16.gmra.mxu1 %vm1469_vm0, %v4530_v19 }
 0x33d   : > { %v3535_v24 = vpop.permute.xlu0 %3534 }
 0x33e   : > { %3544 = vst.msk [vmem:[#allocation4 + $0x1c] sm:$0xf] %vm936_vm1, %v3535_v24 }
 0x33f   : > { %3569 = vst.msk [vmem:[#allocation4 + $0x1c] sm:$0xf] %vm988_vm2, %v3560_v2  ;;  %v3177_v2 = vpop.f32.mrf.mxu2 }
 0x340   : > { %v3537_v39 = vpop.permute.xlu1 %3536 }
 0x341   : > { %3545 = vst.msk [vmem:[#allocation4 + $0x28] sm:$0xf] %vm936_vm1, %v3537_v39 }
 0x342   : > { %v4699_v27 = vld [vmem:[#allocation4 + $0x20] sm:$0xf0] }
 0x343   : > { %v4522_v10 = vor.u32 %v4699_v27, %v4521_v12 }
 0x345   : > { %3896 = vmatmul.bf16.gmra.mxu3 %v4522_v10  ;;  %v3562_v35 = vpop.permute.xlu0 %3561 }
 0x346   : > { %3570 = vst.msk [vmem:[#allocation4 + $0x28] sm:$0xf] %vm988_vm2, %v3562_v35 }
 0x347   : > { %3650 = vst.msk [vmem:[#allocation4 + $0x28] sm:$0xf] %vm1013_vm6, %v3642_v29 }
 0x348   : > { %v3640_v45 = vpop.permute.xlu1 %3639 }
 0x349   : > { %3649 = vst.msk [vmem:[#allocation4 + $0x1c] sm:$0xf] %vm1013_vm6, %v3640_v45 }
 0x34e   : > { %v4523_v30 = vld [vmem:[#allocation4 + $0x24] sm:$0xf0] }
 0x350   : > { %v4698_v48 = vld [vmem:[#allocation4 + $0x1c] sm:$0xf] }
 0x351   : > { %v4526_v31 = vor.u32 %v4698_v48, %v4523_v30 }
 0x353   : > { %3915 = vmatmul.bf16.gmra.mxu0 %v4526_v31 }
 0x35d   : > { %v3132_v34 = vpop.f32.mrf.mxu0 }
 0x35e   : > { %v3133_v42 = vadd.f32 %v6320_v40, %v3132_v34 }
 0x365   : > { %v3134_v52 = vpop.f32.mrf.mxu0 }
 0x366   : > { %v3135_v43 = vadd.f32 %v6320_v40, %v3134_v52 }
 0x376   : > { %v3151_v50 = vpop.f32.mrf.mxu1 }
 0x377   : > { %v3152_v51 = vadd.f32 %v3151_v50, %v3133_v42  ;;  %v6338_v42 = vld [vmem:[%s6396_s6] ss:$0 sm:$0xff] }
 0x379   : > { %v3171_v44 = vadd.f32 %v3170_v46, %v3152_v51 }
 0x37b   : > { %v4491_v32 = vmul.f32 -1.442695, %v3171_v44 }
 0x37d   : > { %4835 = vpow2.f32 %v4491_v32 }
 0x37e   : > { %v3153_v58 = vpop.f32.mrf.mxu1 }
 0x37f   : > { %v3154_v55 = vadd.f32 %v3153_v58, %v3135_v43 }
 0x381   : > { %v3173_v60 = vadd.f32 %v3172_v59, %v3154_v55 }
 0x382   : > { %v3137_v63 = vpop.f32.mrf.mxu0 }
 0x383   : > { %v4836_v6 = vpop.eup %4835  ;;  %v4492_v61 = vmul.f32 -1.442695, %v3173_v60  ;;  %v3138_v14 = vadd.f32 %v6320_v40, %v3137_v63 }
 0x384   : > { %v3192_v56 = vadd.f32 1.0, %v4836_v6 }
 0x385   : > { %4837 = vpow2.f32 %v4492_v61 }
 0x386   : > { %4839 = vrcp.f32 %v3192_v56  ;;  %v3207_v1 = vand.u32 2147483648, %v3192_v56  ;;  %v3205_v3 = vand.u32 2147483647, %v3192_v56  ;;  %vm3201_vm5 = vweird.f32 %v3192_v56 }
 0x388   : > { %v3208_v4 = vor.u32 1.1754944e-38, %v3207_v1  ;;  %vm3206_vm10 = vcmp.eq.f32.partialorder %v3205_v3, 8.507059e+37 }
 0x38a   : > { %v3139_v18 = vpop.f32.mrf.mxu0 }
 0x38b   : > { %v4838_v33 = vpop.eup %4837  ;;  %v3140_v25 = vadd.f32 %v6320_v40, %v3139_v18 }
 0x38c   : > { %v4840_v57 = vpop.eup %4839  ;;  %v3193_v53 = vadd.f32 1.0, %v4838_v33 }
 0x38d   : > { %v3197_v0 = vmul.f32 %v4840_v57, %v3192_v56  ;;  %vm3202_vm3 = vweird.f32 %v4840_v57 }
 0x38e   : > { %4841 = vrcp.f32 %v3193_v53  ;;  %vm3203_vm7 = vmor %vm3201_vm5, %vm3202_vm3  ;;  %v3222_v17 = vand.u32 2147483648, %v3193_v53  ;;  %v3220_v38 = vand.u32 2147483647, %v3193_v53  ;;  %vm3216_vm0 = vweird.f32 %v3193_v53 }
 0x38f   : > { %v3198_v9 = vsub.f32 1.0, %v3197_v0 }
 0x390   : > { %v3223_v22 = vor.u32 1.1754944e-38, %v3222_v17  ;;  %vm3221_vm2 = vcmp.eq.f32.partialorder %v3220_v38, 8.507059e+37 }
 0x391   : > { %v3199_v26 = vmul.f32 %v4840_v57, %v3198_v9 }
 0x393   : > { %v3200_v23 = vadd.f32 %v4840_v57, %v3199_v26 }
 0x394   : > { %v4842_v20 = vpop.eup %4841 }
 0x395   : > { %v3204_v62 = vsel %vm3203_vm7, %v4840_v57, %v3200_v23  ;;  %v3212_v13 = vmul.f32 %v4842_v20, %v3193_v53  ;;  %vm3217_vm8 = vweird.f32 %v4842_v20 }
 0x396   : > { %v3209_v11 = vsel %vm3206_vm10, %v3208_v4, %v3204_v62  ;;  %vm3218_vm1 = vmor %vm3216_vm0, %vm3217_vm8 }
 0x397   : > { %v3256_v7 = vmul.f32 %v3209_v11, %v3171_v44  ;;  %v3213_v37 = vsub.f32 1.0, %v3212_v13 }
 0x398   : > { %v3156_v36 = vpop.f32.mrf.mxu1 }
 0x399   : > { %v3157_v16 = vadd.f32 %v3156_v36, %v3138_v14  ;;  %3261 = vst.msk [vmem:[%s6328_s19] sm:$0xff] %vm3260_vm15, %v3256_v7  ;;  %v3214_v47 = vmul.f32 %v4842_v20, %v3213_v37 }
 0x39b   : > { %v3176_v5 = vadd.f32 %v3175_v49, %v3157_v16  ;;  %v3215_v28 = vadd.f32 %v4842_v20, %v3214_v47 }
 0x39d   : > { %v4493_v21 = vmul.f32 -1.442695, %v3176_v5  ;;  %v3219_v15 = vsel %vm3218_vm1, %v4842_v20, %v3215_v28 }
 0x39e   : > { %v3224_v8 = vsel %vm3221_vm2, %v3223_v22, %v3219_v15 }
 0x39f   : > { %4843 = vpow2.f32 %v4493_v21  ;;  %v3257_v41 = vmul.f32 %v3224_v8, %v3173_v60 }
 0x3a0   : > { %v3158_v54 = vpop.f32.mrf.mxu1 }
 0x3a1   : > { %v3159_v19 = vadd.f32 %v3158_v54, %v3140_v25  ;;  %3262 = vst.msk [vmem:[%s6328_s19 + $0x8] sm:$0xff] %vm3260_vm15, %v3257_v41 }
 0x3a3   : > { %v3178_v24 = vadd.f32 %v3177_v2, %v3159_v19 }
 0x3a5   : > { %v4844_v39 = vpop.eup %4843  ;;  %v4494_v12 = vmul.f32 -1.442695, %v3178_v24 }
 0x3a6   : > { %v3194_v27 = vadd.f32 1.0, %v4844_v39 }
 0x3a7   : > { %4845 = vpow2.f32 %v4494_v12 }
 0x3a8   : > { %4847 = vrcp.f32 %v3194_v27  ;;  %v3237_v30 = vand.u32 2147483648, %v3194_v27  ;;  %v3892_v31 = vpop.f32.mrf.mxu3  ;;  %v3235_v40 = vand.u32 2147483647, %v3194_v27  ;;  %vm3231_vm11 = vweird.f32 %v3194_v27  ;;  %v3930_v58 = vpop.f32.mrf.mxu1 }
 0x3a9   : > { %v3893_v32 = vadd.f32 %v6338_v42, %v3892_v31 }
 0x3aa   : > { %v3238_v51 = vor.u32 1.1754944e-38, %v3237_v30  ;;  %vm3236_vm13 = vcmp.eq.f32.partialorder %v3235_v40, 8.507059e+37 }
 0x3ad   : > { %v4846_v10 = vpop.eup %4845 }
 0x3ae   : > { %v4848_v35 = vpop.eup %4847  ;;  %v3195_v29 = vadd.f32 1.0, %v4846_v10 }
 0x3af   : > { %v3227_v45 = vmul.f32 %v4848_v35, %v3194_v27  ;;  %vm3232_vm6 = vweird.f32 %v4848_v35 }
 0x3b0   : > { %4849 = vrcp.f32 %v3195_v29  ;;  %vm3233_vm12 = vmor %vm3231_vm11, %vm3232_vm6  ;;  %v3252_v61 = vand.u32 2147483648, %v3195_v29  ;;  %v3250_v33 = vand.u32 2147483647, %v3195_v29  ;;  %v3894_v53 = vpop.f32.mrf.mxu3  ;;  %vm3246_vm9 = vweird.f32 %v3195_v29  ;;  %v3932_v62 = vpop.f32.mrf.mxu1 }
 0x3b1   : > { %v3228_v48 = vsub.f32 1.0, %v3227_v45  ;;  %v3895_v26 = vadd.f32 %v6338_v42, %v3894_v53 }
 0x3b2   : > { %v3253_v1 = vor.u32 1.1754944e-38, %v3252_v61  ;;  %vm3251_vm3 = vcmp.eq.f32.partialorder %v3250_v33, 8.507059e+37 }
 0x3b3   : > { %v3229_v34 = vmul.f32 %v4848_v35, %v3228_v48 }
 0x3b5   : > { %v3230_v46 = vadd.f32 %v4848_v35, %v3229_v34 }
 0x3b6   : > { %v4850_v50 = vpop.eup %4849 }
 0x3b7   : > { %v3234_v44 = vsel %vm3233_vm12, %v4848_v35, %v3230_v46  ;;  %v3242_v52 = vmul.f32 %v4850_v50, %v3195_v29  ;;  %vm3247_vm14 = vweird.f32 %v4850_v50 }
 0x3b8   : > { %v3239_v43 = vsel %vm3236_vm13, %v3238_v51, %v3234_v44  ;;  %v3911_v55 = vpop.f32.mrf.mxu0  ;;  %vm3248_vm4 = vmor %vm3246_vm9, %vm3247_vm14  ;;  %v3935_v47 = vpop.f32.mrf.mxu1 }
 0x3b9   : > { %v3258_v59 = vmul.f32 %v3239_v43, %v3176_v5  ;;  %v3243_v60 = vsub.f32 1.0, %v3242_v52  ;;  %v3912_v6 = vadd.f32 %v3911_v55, %v3893_v32 }
 0x3bb   : > { %3263 = vst.msk [vmem:[%s6328_s19 + $0x10] sm:$0xff] %vm3260_vm15, %v3258_v59  ;;  %v3244_v56 = vmul.f32 %v4850_v50, %v3243_v60  ;;  %v3931_v57 = vadd.f32 %v3930_v58, %v3912_v6 }
 0x3bd   : > { %v3245_v0 = vadd.f32 %v4850_v50, %v3244_v56  ;;  %v4605_v9 = vmul.f32 -1.442695, %v3931_v57 }
 0x3bf   : > { %v3249_v63 = vsel %vm3248_vm4, %v4850_v50, %v3245_v0  ;;  %4851 = vpow2.f32 %v4605_v9 }
 0x3c0   : > { %v3254_v3 = vsel %vm3251_vm3, %v3253_v1, %v3249_v63  ;;  %v3913_v23 = vpop.f32.mrf.mxu0  ;;  %v3937_v48 = vpop.f32.mrf.mxu1 }
 0x3c1   : > { %v3259_v20 = vmul.f32 %v3254_v3, %v3178_v24  ;;  %v3914_v4 = vadd.f32 %v3913_v23, %v3895_v26 }
 0x3c3   : > { %3264 = vst.msk [vmem:[%s6328_s19 + $0x18] sm:$0xff] %vm3260_vm15, %v3259_v20  ;;  %v3933_v13 = vadd.f32 %v3932_v62, %v3914_v4 }
 0x3c5   : > { %v4852_v14 = vpop.eup %4851  ;;  %v4606_v49 = vmul.f32 -1.442695, %v3933_v13 }
 0x3c6   : > { %v3952_v11 = vadd.f32 1.0, %v4852_v14 }
 0x3c7   : > { %4853 = vpow2.f32 %v4606_v49 }
 0x3c8   : > { %4855 = vrcp.f32 %v3952_v11  ;;  %v3897_v36 = vpop.f32.mrf.mxu3  ;;  %v3967_v21 = vand.u32 2147483648, %v3952_v11  ;;  %v3965_v15 = vand.u32 2147483647, %v3952_v11  ;;  %vm3961_vm7 = vweird.f32 %v3952_v11 }
 0x3c9   : > { %v3898_v38 = vadd.f32 %v6338_v42, %v3897_v36 }
 0x3ca   : > { %v3968_v2 = vor.u32 1.1754944e-38, %v3967_v21  ;;  %vm3966_vm8 = vcmp.eq.f32.partialorder %v3965_v15, 8.507059e+37 }
 0x3cd   : > { %v4854_v7 = vpop.eup %4853 }
 0x3ce   : > { %v4856_v37 = vpop.eup %4855  ;;  %v3953_v16 = vadd.f32 1.0, %v4854_v7 }
 0x3cf   : > { %v3957_v17 = vmul.f32 %v4856_v37, %v3952_v11  ;;  %vm3962_vm5 = vweird.f32 %v4856_v37 }
 0x3d0   : > { %v3916_v5 = vpop.f32.mrf.mxu0  ;;  %4857 = vrcp.f32 %v3953_v16  ;;  %v3899_v25 = vpop.f32.mrf.mxu3  ;;  %vm3963_vm10 = vmor %vm3961_vm7, %vm3962_vm5  ;;  %v3982_v30 = vand.u32 2147483648, %v3953_v16  ;;  %v3980_v40 = vand.u32 2147483647, %v3953_v16  ;;  %vm3976_vm1 = vweird.f32 %v3953_v16 }
 0x3d1   : > { %v3958_v18 = vsub.f32 1.0, %v3957_v17  ;;  %v3917_v28 = vadd.f32 %v3916_v5, %v3898_v38  ;;  %v3900_v24 = vadd.f32 %v6338_v42, %v3899_v25 }
 0x3d2   : > { %v3983_v51 = vor.u32 1.1754944e-38, %v3982_v30  ;;  %vm3981_vm6 = vcmp.eq.f32.partialorder %v3980_v40, 8.507059e+37 }
 0x3d3   : > { %v3959_v22 = vmul.f32 %v4856_v37, %v3958_v18  ;;  %v3936_v8 = vadd.f32 %v3935_v47, %v3917_v28 }
 0x3d5   : > { %v3960_v54 = vadd.f32 %v4856_v37, %v3959_v22  ;;  %v4607_v41 = vmul.f32 -1.442695, %v3936_v8 }
 0x3d6   : > { %v4858_v19 = vpop.eup %4857 }
 0x3d7   : > { %v3964_v39 = vsel %vm3963_vm10, %v4856_v37, %v3960_v54  ;;  %v3972_v12 = vmul.f32 %v4858_v19, %v3953_v16  ;;  %4859 = vpow2.f32 %v4607_v41  ;;  %vm3977_vm0 = vweird.f32 %v4858_v19 }
 0x3d8   : > { %v3918_v27 = vpop.f32.mrf.mxu0  ;;  %v3969_v10 = vsel %vm3966_vm8, %v3968_v2, %v3964_v39  ;;  %vm3978_vm2 = vmor %vm3976_vm1, %vm3977_vm0 }
 0x3d9   : > { %v3919_v35 = vadd.f32 %v3918_v27, %v3900_v24  ;;  %v4016_v29 = vmul.f32 %v3969_v10, %v3931_v57  ;;  %v3973_v45 = vsub.f32 1.0, %v3972_v12 }
 0x3db   : > { %v3938_v31 = vadd.f32 %v3937_v48, %v3919_v35  ;;  %4020 = vst.msk [vmem:[%s6328_s19 + $0x20] sm:$0xff] %vm3260_vm15, %v4016_v29  ;;  %v3974_v34 = vmul.f32 %v4858_v19, %v3973_v45 }
 0x3dd   : > { %v4608_v46 = vmul.f32 -1.442695, %v3938_v31  ;;  %v4860_v42 = vpop.eup %4859  ;;  %v3975_v50 = vadd.f32 %v4858_v19, %v3974_v34 }
 0x3de   : > { %v3954_v44 = vadd.f32 1.0, %v4860_v42 }
 0x3df   : > { %4861 = vpow2.f32 %v4608_v46  ;;  %v3979_v52 = vsel %vm3978_vm2, %v4858_v19, %v3975_v50 }
 0x3e0   : > { %v3984_v32 = vsel %vm3981_vm6, %v3983_v51, %v3979_v52  ;;  %4863 = vrcp.f32 %v3954_v44  ;;  %v3997_v61 = vand.u32 2147483648, %v3954_v44  ;;  %v3995_v33 = vand.u32 2147483647, %v3954_v44 }
 0x3e1   : > { %v4017_v43 = vmul.f32 %v3984_v32, %v3933_v13  ;;  %vm3991_vm12 = vweird.f32 %v3954_v44 }
 0x3e2   : > { %v3998_v0 = vor.u32 1.1754944e-38, %v3997_v61  ;;  %vm3996_vm14 = vcmp.eq.f32.partialorder %v3995_v33, 8.507059e+37 }
 0x3e3   : > { %4021 = vst.msk [vmem:[%s6328_s19 + $0x28] sm:$0xff] %vm3260_vm15, %v4017_v43 }
 0x3e5   : > { %v4862_v58 = vpop.eup %4861 }
 0x3e6   : > { %v3955_v55 = vadd.f32 1.0, %v4862_v58  ;;  %v4864_v59 = vpop.eup %4863 }
 0x3e7   : > { %v3987_v60 = vmul.f32 %v4864_v59, %v3954_v44  ;;  %vm3992_vm11 = vweird.f32 %v4864_v59 }
 0x3e8   : > { %4865 = vrcp.f32 %v3955_v55  ;;  %vm3993_vm13 = vmor %vm3991_vm12, %vm3992_vm11  ;;  %v4012_v23 = vand.u32 2147483648, %v3955_v55  ;;  %v4010_v4 = vand.u32 2147483647, %v3955_v55  ;;  %vm4006_vm4 = vweird.f32 %v3955_v55 }
 0x3e9   : > { %v3988_v6 = vsub.f32 1.0, %v3987_v60 }
 0x3ea   : > { %v4013_v13 = vor.u32 1.1754944e-38, %v4012_v23  ;;  %vm4011_vm5 = vcmp.eq.f32.partialorder %v4010_v4, 8.507059e+37 }
 0x3eb   : > { %v3989_v56 = vmul.f32 %v4864_v59, %v3988_v6 }
 0x3ed   : > { %v3990_v53 = vadd.f32 %v4864_v59, %v3989_v56 }
 0x3ee   : > { %v4866_v57 = vpop.eup %4865 }
 0x3ef   : > { %v4002_v9 = vmul.f32 %v4866_v57, %v3955_v55  ;;  %v3994_v1 = vsel %vm3993_vm13, %v4864_v59, %v3990_v53  ;;  %vm4007_vm9 = vweird.f32 %v4866_v57 }
 0x3f0   : > { %v3999_v63 = vsel %vm3996_vm14, %v3998_v0, %v3994_v1  ;;  %vm4008_vm3 = vmor %vm4006_vm4, %vm4007_vm9 }
 0x3f1   : > { %v4003_v26 = vsub.f32 1.0, %v4002_v9  ;;  %v4018_v3 = vmul.f32 %v3999_v63, %v3936_v8 }
 0x3f3   : > { %v4004_v20 = vmul.f32 %v4866_v57, %v4003_v26  ;;  %4022 = vst.msk [vmem:[%s6328_s19 + $0x30] sm:$0xff] %vm3260_vm15, %v4018_v3 }
 0x3f5   : > { %v4005_v62 = vadd.f32 %v4866_v57, %v4004_v20 }
 0x3f7   : > { %v4009_v14 = vsel %vm4008_vm3, %v4866_v57, %v4005_v62 }
 0x3f8   : > { %v4014_v49 = vsel %vm4011_vm5, %v4013_v13, %v4009_v14 }
 0x3f9   : > { %v4019_v11 = vmul.f32 %v4014_v49, %v3938_v31 }
 0x3fb   : > { %4023 = vst.msk [vmem:[%s6328_s19 + $0x38] sm:$0xff] %vm3260_vm15, %v4019_v11 }
 0x3fc   : > { %4894 = shalt.err (!%p4891_p3)
}
 0x3fd   : > { %s4935_s20 = smov 128   ;;  %s4936_s19 = smov 8  }
 0x3fe   : > { %4720 = dma.vmem_to_hbm [thread:$0]  (%p5015_p5), %s4038_s13, 1024, %s4040_s28, %s4025_s14, %s4935_s20, %s4935_s20, %s4936_s19  }
 0x3ff PF: > { %p4726_p4 = scmp.ge.s32.totalorder %s4929_s27, 2  ;;  %s4054_s29 = sand.u32 1, %s4917_s24  }
 0x400   : > { %s4055_s8 = scalar_lea.sflag [#allocation6], %s4054_s29 }
 0x401   : > { %p4723_p7 = pnand %p4726_p4, %p5019_p6 }
 0x403   : > { %p4724_p8 = pneg %p4723_p7 }
 0x405   : > { %4912 = dma.done.wait (%p4724_p8), %s4055_s8, 1024  }
 0x406   : > { %4914 = vsyncadd (%p4724_p8), %s4055_s8, 4294966272  ;;  %p17_p9 = scmp.ge.s32.totalorder %s5002_s30, 4   ;;  %s6440_s24 = smov %s4921_s25 }
 0x407   : > { %s6441_s25 = smov %s4925_s26  ;;  %s6442_s26 = smov %s5013_s10 }
 0x408   : > { %s6443_s27 = smov %s5002_s30  ;;  %19 = sbr.rel (!%p17_p9) target bundleno = 3 (0x3), region = 95 }
 0x40d   :  { %4061 = vsyncpa [#allocation6], 1 }
 0x40e   :  { %4063 = vsyncpa [#allocation6 + $0x1], 1 }

</bundles_post_ra>
